<compile_context>
chip_gen: v6e
topology: v6e:2x2x1
jax: 0.10.0
libtpu: 0.0.40
codegen_flags: <defaults>
</compile_context>

<pallas_src>
import functools
import math

import jax
import jax.numpy as jnp
from jax.experimental import pallas as pl
from jax.experimental.pallas import tpu as pltpu


def _round_up(v, m):
    return ((v + m - 1) // m) * m


def _fused_mlp_kernel(x_ref, alpha_ref, *rest, n_layers, prelu_dtype):
    """rest = (w0, b0, w1, b1, ..., w_{L-1}, b_{L-1}, o_ref).

    x_ref : (tm, in_feats)      input dtype (f32 ok; cast in-kernel)
    w_l   : (f_l, f_{l+1}_pad)  compute dtype (bf16)
    b_l   : (1, f_{l+1}_pad)    float32
    alpha : (1,) float32 scalar in SMEM
    o_ref : (tm, f_last_pad)    out dtype (bf16 by default)
    """
    o_ref = rest[-1]
    wb = rest[:-1]
    compute_dtype = wb[0].dtype
    alpha = alpha_ref[0].astype(prelu_dtype)      # scalar PReLU param (SMEM)

    h = x_ref[...].astype(compute_dtype)          # f32 tile -> bf16 in VMEM
    for layer in range(n_layers):
        w_ref = wb[2 * layer]
        b_ref = wb[2 * layer + 1]
        # bf16 x bf16 -> f32 accumulate on the MXU
        y = jnp.dot(h, w_ref[...], preferred_element_type=jnp.float32)
        y = y + b_ref[...]
        if layer < n_layers - 1:
            # PReLU in prelu_dtype (bf16 on v6e/v7x; pass f32 on v5e).
            # where() form is correct for ANY alpha (not only 0<=alpha<=1).
            act = y.astype(prelu_dtype)
            act = jnp.where(act >= 0, act, alpha * act)
            # dropout: identity in eval mode
            h = act.astype(compute_dtype)
        else:
            o_ref[...] = y.astype(o_ref.dtype)    # only the final layer stores


def prepare_params(params, *, compute_dtype=jnp.bfloat16):
    """One-time pad + cast of Linear params into TPU-friendly shapes.

    Done ONCE at param-load time (not per forward call) so the forward pass
    makes no extra HBM passes over the weights.

    Each layer's OUT dim is zero-padded to a multiple of 128 lanes; layer l>0's
    IN dim is zero-padded to match the previous padded OUT dim.  Layer 0's IN
    dim stays at in_feats (its BlockSpec covers the full array dim, so the
    (8,128) constraint does not apply).  Zero padding propagates exactly
    (zero rows/cols + zero bias + PReLU(0)=0).
    """
    out_dims = [w.shape[1] for (w, _) in params]
    out_dims_p = [_round_up(d, 128) for d in out_dims]
    in_dims_p = [params[0][0].shape[0]] + out_dims_p[:-1]

    prepared = []
    for layer, (w, b) in enumerate(params):
        w_p = jnp.zeros((in_dims_p[layer], out_dims_p[layer]), compute_dtype)
        w_p = w_p.at[:w.shape[0], :w.shape[1]].set(w.astype(compute_dtype))
        b_p = jnp.zeros((1, out_dims_p[layer]), jnp.float32)
        b_p = b_p.at[0, :b.shape[0]].set(b.astype(jnp.float32))
        prepared.append((w_p, b_p))
    return prepared


def feedforward_net_forward(x, prepared_params, alpha, *, out_feats=None,
                            tm=512, out_dtype=jnp.bfloat16, prelu_dtype=None,
                            single_buffer_weights=True):
    """Fused SIGN FeedForwardNet forward (inference) on TPU.

    x:               (N, in_feats) float32 (passed straight through, no copy)
    prepared_params: output of prepare_params() (bf16, pre-padded)
    alpha:           PReLU scalar
    out_feats:       logical output width (slices off lane padding); None = padded
    tm:              row tile; 512-1024 recommended for large N.  For v7x pick
                     tm so pl.cdiv(N, tm) >= 4 (>=2 steps per TensorCore).
    prelu_dtype:     dtype for the PReLU math; default = compute dtype (bf16).
                     Use jnp.float32 on v5e (no bf16 VALU).
    """
    n_layers = len(prepared_params)
    N, in_feats = x.shape
    assert prepared_params[0][0].shape[0] == in_feats, "x / params feature mismatch"

    compute_dtype = prepared_params[0][0].dtype
    if prelu_dtype is None:
        prelu_dtype = compute_dtype
    out_pad = prepared_params[-1][0].shape[1]     # already a multiple of 128

    # Row tile: multiple of 8, no bigger than needed.  Grid masks the ragged
    # last block (rows >= N are never stored).
    tm_eff = _round_up(min(tm, _round_up(N, 8)), 8)
    grid = (pl.cdiv(N, tm_eff),)

    alpha_arr = jnp.asarray(alpha, jnp.float32).reshape((1,))

    # VMEM budget: x/out tiles double-buffered + resident params (worst case
    # double-buffered) + f32 intermediate headroom.  Cap at 48 MiB so v7x
    # (64 MiB physical) keeps headroom; v5e/v6e could go higher if needed.
    param_bytes = sum(w.size * w.dtype.itemsize + b.size * b.dtype.itemsize
                      for (w, b) in prepared_params)
    max_width = max([in_feats] + [w.shape[1] for (w, _) in prepared_params])
    est = (2 * tm_eff * in_feats * x.dtype.itemsize
           + 2 * tm_eff * out_pad * jnp.dtype(out_dtype).itemsize
           + 2 * param_bytes
           + 4 * tm_eff * max_width * 4)
    vmem_limit = int(min(48 * 2**20, max(32 * 2**20, int(est * 1.5))))

    flat_params = []
    for (w_p, b_p) in prepared_params:
        flat_params += [w_p, b_p]

    def build(single_buffer):
        # Weights/biases have a constant index_map -> they never change across
        # grid steps; single buffering halves their VMEM residency.
        weight_kw = {"pipeline_mode": pl.Buffered(1)} if single_buffer else {}
        in_specs = [
            pl.BlockSpec((tm_eff, in_feats), lambda i: (i, 0)),        # x row tile
            pl.BlockSpec(memory_space=pltpu.MemorySpace.SMEM),         # PReLU alpha
        ]
        for (w_p, b_p) in prepared_params:
            # Full weight resident per step.  Fine for SIGN's small hidden
            # sizes; if hidden grows into the thousands, add a trailing
            # "arbitrary" K grid axis + f32 VMEM accumulator (and consider
            # fp8 weights on v7x).
            in_specs.append(pl.BlockSpec(w_p.shape, lambda i: (0, 0), **weight_kw))
            in_specs.append(pl.BlockSpec(b_p.shape, lambda i: (0, 0), **weight_kw))

        return pl.pallas_call(
            functools.partial(_fused_mlp_kernel, n_layers=n_layers,
                              prelu_dtype=prelu_dtype),
            out_shape=jax.ShapeDtypeStruct((N, out_pad), out_dtype),
            grid_spec=pltpu.PrefetchScalarGridSpec(
                num_scalar_prefetch=0,
                grid=grid,
                in_specs=in_specs,
                out_specs=pl.BlockSpec((tm_eff, out_pad), lambda i: (i, 0)),
            ),
            compiler_params=pltpu.CompilerParams(
                dimension_semantics=("parallel",),   # row tiles shard across TCs
                vmem_limit_bytes=vmem_limit,
            ),
        )

    try:
        out = build(single_buffer_weights)(x, alpha_arr, *flat_params)
    except Exception:
        if not single_buffer_weights:
            raise
        # Older jax may not accept pipeline_mode / Buffered(1): fall back to
        # default double buffering (correctness identical, slightly more VMEM).
        out = build(False)(x, alpha_arr, *flat_params)

    if out_feats is not None:
        out = out[:, :out_feats]
    return out


def init_feedforward_params(key, in_feats, hidden, out_feats, n_layers):
    """Deterministic init matching reset_parameters():
    xavier_uniform_(weight, gain=calculate_gain('relu')), zeros_(bias)."""
    gain = math.sqrt(2.0)  # nn.init.calculate_gain('relu')
    if n_layers == 1:
        dims = [(in_feats, out_feats)]
    else:
        dims = [(in_feats, hidden)]
        dims += [(hidden, hidden)] * (n_layers - 2)
        dims += [(hidden, out_feats)]

    params = []
    for fan_in, fan_out in dims:
        key, sub = jax.random.split(key)
        bound = gain * math.sqrt(6.0 / (fan_in + fan_out))
        # stored as (in, out) so kernel computes x @ W  (== torch x @ W.T)
        w = jax.random.uniform(sub, (fan_in, fan_out), jnp.float32,
                               minval=-bound, maxval=bound)
        b = jnp.zeros((fan_out,), jnp.float32)
        params.append((w, b))
    prelu_alpha = jnp.float32(0.25)  # nn.PReLU() default init
    return params, prelu_alpha


def feedforward_net_reference(x, params, alpha, *, compute_dtype=jnp.bfloat16,
                              prelu_dtype=None, out_dtype=jnp.bfloat16):
    """Pure-JAX reference using the same bf16-matmul / f32-accumulate math."""
    if prelu_dtype is None:
        prelu_dtype = compute_dtype
    n_layers = len(params)
    h = x.astype(compute_dtype)
    for layer_id, (w, b) in enumerate(params):
        y = jnp.dot(h, w.astype(compute_dtype),
                    preferred_element_type=jnp.float32) + b.astype(jnp.float32)
        if layer_id < n_layers - 1:
            a = y.astype(prelu_dtype)
            a = jnp.where(a >= 0, a, jnp.asarray(alpha, prelu_dtype) * a)
            h = a.astype(compute_dtype)          # PReLU; dropout = identity
        else:
            h = y.astype(out_dtype)
    return h


if __name__ == "__main__":
    key = jax.random.PRNGKey(0)

    # Shapes chosen so the row grid has 4 steps at tm=512 (>=2 per TC on v7x)
    # and exercises the ragged last block (N not a multiple of tm).
    N, in_feats, hidden, out_feats, n_layers = 2000, 256, 128, 64, 3
    dropout = 0.5  # unused at inference (eval-mode identity)

    k_x, k_p = jax.random.split(key)
    x = jax.random.normal(k_x, (N, in_feats), jnp.float32)
    params, alpha = init_feedforward_params(k_p, in_feats, hidden, out_feats,
                                            n_layers)

    # One-time param prep (pad + bf16 cast) -- NOT part of the per-call path.
    prepared = prepare_params(params)

    out = feedforward_net_forward(x, prepared, alpha, out_feats=out_feats,
                                  tm=512)
    out = jax.block_until_ready(out)

    ref = feedforward_net_reference(x, params, alpha)
    assert out.shape == (N, out_feats)
    out_f = out.astype(jnp.float32)
    ref_f = ref.astype(jnp.float32)
    max_diff = float(jnp.max(jnp.abs(out_f - ref_f)))
    assert bool(jnp.allclose(out_f, ref_f, atol=2e-2, rtol=2e-2)), (
        "mismatch vs reference, max |diff| = " + str(max_diff))

    print("KERNEL_OK")
</pallas_src>

<mosaic_0001>
module attributes {stable_mosaic.version = 11 : i64} {
  func.func @_fused_mlp_kernel(%arg0: i32, %arg1: memref<512x256xf32, #tpu.memory_space<vmem>>, %arg2: memref<1xf32, #tpu.memory_space<smem>>, %arg3: memref<256x128xbf16, #tpu.memory_space<vmem>>, %arg4: memref<1x128xf32, #tpu.memory_space<vmem>>, %arg5: memref<128x128xbf16, #tpu.memory_space<vmem>>, %arg6: memref<1x128xf32, #tpu.memory_space<vmem>>, %arg7: memref<128x128xbf16, #tpu.memory_space<vmem>>, %arg8: memref<1x128xf32, #tpu.memory_space<vmem>>, %arg9: memref<512x128xbf16, #tpu.memory_space<vmem>>) attributes {dimension_semantics = [#tpu.dimension_semantics<parallel>], iteration_bounds = array<i64: 4>, scalar_prefetch = 0 : i64, scratch_operands = 0 : i64, tpu.core_type = #tpu.core_type<tc>, window_params = [{transform_indices = @transform_0, window_bounds = array<i64: 512, 256>}, {transform_indices = @transform_1, window_bounds = array<i64: 1>}, {pipeline_mode = #tpu.pipeline_mode<synchronous>, transform_indices = @transform_2, window_bounds = array<i64: 256, 128>}, {pipeline_mode = #tpu.pipeline_mode<synchronous>, transform_indices = @transform_3, window_bounds = array<i64: 1, 128>}, {pipeline_mode = #tpu.pipeline_mode<synchronous>, transform_indices = @transform_4, window_bounds = array<i64: 128, 128>}, {pipeline_mode = #tpu.pipeline_mode<synchronous>, transform_indices = @transform_5, window_bounds = array<i64: 1, 128>}, {pipeline_mode = #tpu.pipeline_mode<synchronous>, transform_indices = @transform_6, window_bounds = array<i64: 128, 128>}, {pipeline_mode = #tpu.pipeline_mode<synchronous>, transform_indices = @transform_7, window_bounds = array<i64: 1, 128>}, {transform_indices = @transform_8, window_bounds = array<i64: 512, 128>}]} {
    %c0 = arith.constant 0 : index
    %0 = memref.load %arg2[%c0] : memref<1xf32, #tpu.memory_space<smem>>
    %1 = arith.truncf %0 : f32 to bf16
    %c0_0 = arith.constant 0 : index
    %c0_1 = arith.constant 0 : index
    %2 = vector.load %arg1[%c0_0, %c0_1] : memref<512x256xf32, #tpu.memory_space<vmem>>, vector<512x256xf32>
    %3 = arith.truncf %2 : vector<512x256xf32> to vector<512x256xbf16>
    %c0_2 = arith.constant 0 : index
    %c0_3 = arith.constant 0 : index
    %4 = vector.load %arg3[%c0_2, %c0_3] : memref<256x128xbf16, #tpu.memory_space<vmem>>, vector<256x128xbf16>
    %cst = arith.constant dense<0.000000e+00> : vector<512x128xf32>
    %5 = tpu.matmul %3, %4, %cst {dimension_numbers = #tpu.dot_dimension_numbers<[1], [0], [0], [1], [0, 0, 1, 1], [], []>} : vector<512x256xbf16>, vector<256x128xbf16>, vector<512x128xf32> -> vector<512x128xf32>
    %c0_4 = arith.constant 0 : index
    %c0_5 = arith.constant 0 : index
    %6 = vector.load %arg4[%c0_4, %c0_5] : memref<1x128xf32, #tpu.memory_space<vmem>>, vector<1x128xf32>
    %7 = vector.broadcast %6 : vector<1x128xf32> to vector<512x128xf32>
    %8 = arith.addf %5, %7 : vector<512x128xf32>
    %9 = arith.truncf %8 : vector<512x128xf32> to vector<512x128xbf16>
    %cst_6 = arith.constant 0.000000e+00 : bf16
    %10 = vector.broadcast %cst_6 : bf16 to vector<512x128xbf16>
    %11 = arith.cmpf oge, %9, %10 : vector<512x128xbf16>
    %12 = vector.broadcast %1 : bf16 to vector<512x128xbf16>
    %13 = arith.mulf %12, %9 : vector<512x128xbf16>
    %14 = arith.select %11, %9, %13 : vector<512x128xi1>, vector<512x128xbf16>
    %c0_7 = arith.constant 0 : index
    %c0_8 = arith.constant 0 : index
    %15 = vector.load %arg5[%c0_7, %c0_8] : memref<128x128xbf16, #tpu.memory_space<vmem>>, vector<128x128xbf16>
    %cst_9 = arith.constant dense<0.000000e+00> : vector<512x128xf32>
    %16 = tpu.matmul %14, %15, %cst_9 {dimension_numbers = #tpu.dot_dimension_numbers<[1], [0], [0], [1], [0, 0, 1, 1], [], []>} : vector<512x128xbf16>, vector<128x128xbf16>, vector<512x128xf32> -> vector<512x128xf32>
    %c0_10 = arith.constant 0 : index
    %c0_11 = arith.constant 0 : index
    %17 = vector.load %arg6[%c0_10, %c0_11] : memref<1x128xf32, #tpu.memory_space<vmem>>, vector<1x128xf32>
    %18 = vector.broadcast %17 : vector<1x128xf32> to vector<512x128xf32>
    %19 = arith.addf %16, %18 : vector<512x128xf32>
    %20 = arith.truncf %19 : vector<512x128xf32> to vector<512x128xbf16>
    %cst_12 = arith.constant 0.000000e+00 : bf16
    %21 = vector.broadcast %cst_12 : bf16 to vector<512x128xbf16>
    %22 = arith.cmpf oge, %20, %21 : vector<512x128xbf16>
    %23 = vector.broadcast %1 : bf16 to vector<512x128xbf16>
    %24 = arith.mulf %23, %20 : vector<512x128xbf16>
    %25 = arith.select %22, %20, %24 : vector<512x128xi1>, vector<512x128xbf16>
    %c0_13 = arith.constant 0 : index
    %c0_14 = arith.constant 0 : index
    %26 = vector.load %arg7[%c0_13, %c0_14] : memref<128x128xbf16, #tpu.memory_space<vmem>>, vector<128x128xbf16>
    %cst_15 = arith.constant dense<0.000000e+00> : vector<512x128xf32>
    %27 = tpu.matmul %25, %26, %cst_15 {dimension_numbers = #tpu.dot_dimension_numbers<[1], [0], [0], [1], [0, 0, 1, 1], [], []>} : vector<512x128xbf16>, vector<128x128xbf16>, vector<512x128xf32> -> vector<512x128xf32>
    %c0_16 = arith.constant 0 : index
    %c0_17 = arith.constant 0 : index
    %28 = vector.load %arg8[%c0_16, %c0_17] : memref<1x128xf32, #tpu.memory_space<vmem>>, vector<1x128xf32>
    %29 = vector.broadcast %28 : vector<1x128xf32> to vector<512x128xf32>
    %30 = arith.addf %27, %29 : vector<512x128xf32>
    %31 = arith.truncf %30 : vector<512x128xf32> to vector<512x128xbf16>
    %c0_18 = arith.constant 0 : index
    %c0_19 = arith.constant 0 : index
    %32 = vector.load %arg9[%c0_18, %c0_19] : memref<512x128xbf16, #tpu.memory_space<vmem>>, vector<512x128xbf16>
    tpu.vector_store %arg9[%c0_18, %c0_19], %31 {strides = array<i32>} : memref<512x128xbf16, #tpu.memory_space<vmem>>, vector<512x128xbf16>,
    return
  }
  func.func @transform_0(%arg0: i32) -> (i32, i32) {
    %c0_i32 = arith.constant 0 : i32
    %c0_i32_0 = arith.constant 0 : i32
    return %arg0, %c0_i32 : i32, i32
  }
  func.func @transform_1(%arg0: i32) -> i32 {
    %c0_i32 = arith.constant 0 : i32
    %c0_i32_0 = arith.constant 0 : i32
    return %c0_i32 : i32
  }
  func.func @transform_2(%arg0: i32) -> (i32, i32) {
    %c0_i32 = arith.constant 0 : i32
    %c0_i32_0 = arith.constant 0 : i32
    %c0_i32_1 = arith.constant 0 : i32
    return %c0_i32, %c0_i32_0 : i32, i32
  }
  func.func @transform_3(%arg0: i32) -> (i32, i32) {
    %c0_i32 = arith.constant 0 : i32
    %c0_i32_0 = arith.constant 0 : i32
    %c0_i32_1 = arith.constant 0 : i32
    return %c0_i32, %c0_i32_0 : i32, i32
  }
  func.func @transform_4(%arg0: i32) -> (i32, i32) {
    %c0_i32 = arith.constant 0 : i32
    %c0_i32_0 = arith.constant 0 : i32
    %c0_i32_1 = arith.constant 0 : i32
    return %c0_i32, %c0_i32_0 : i32, i32
  }
  func.func @transform_5(%arg0: i32) -> (i32, i32) {
    %c0_i32 = arith.constant 0 : i32
    %c0_i32_0 = arith.constant 0 : i32
    %c0_i32_1 = arith.constant 0 : i32
    return %c0_i32, %c0_i32_0 : i32, i32
  }
  func.func @transform_6(%arg0: i32) -> (i32, i32) {
    %c0_i32 = arith.constant 0 : i32
    %c0_i32_0 = arith.constant 0 : i32
    %c0_i32_1 = arith.constant 0 : i32
    return %c0_i32, %c0_i32_0 : i32, i32
  }
  func.func @transform_7(%arg0: i32) -> (i32, i32) {
    %c0_i32 = arith.constant 0 : i32
    %c0_i32_0 = arith.constant 0 : i32
    %c0_i32_1 = arith.constant 0 : i32
    return %c0_i32, %c0_i32_0 : i32, i32
  }
  func.func @transform_8(%arg0: i32) -> (i32, i32) {
    %c0_i32 = arith.constant 0 : i32
    %c0_i32_0 = arith.constant 0 : i32
    return %arg0, %c0_i32 : i32, i32
  }
}

module attributes {stable_mosaic.version = 11 : i64} {
  func.func @_fused_mlp_kernel(%arg0: i32, %arg1: memref<512x256xf32, #tpu.memory_space<vmem>>, %arg2: memref<1xf32, #tpu.memory_space<smem>>, %arg3: memref<256x128xbf16, #tpu.memory_space<vmem>>, %arg4: memref<1x128xf32, #tpu.memory_space<vmem>>, %arg5: memref<128x128xbf16, #tpu.memory_space<vmem>>, %arg6: memref<1x128xf32, #tpu.memory_space<vmem>>, %arg7: memref<128x128xbf16, #tpu.memory_space<vmem>>, %arg8: memref<1x128xf32, #tpu.memory_space<vmem>>, %arg9: memref<512x128xbf16, #tpu.memory_space<vmem>>) attributes {dimension_semantics = [#tpu.dimension_semantics<parallel>], iteration_bounds = array<i64: 4>, scalar_prefetch = 0 : i64, scratch_operands = 0 : i64, tpu.core_type = #tpu.core_type<tc>, window_params = [{transform_indices = @transform_0, window_bounds = array<i64: 512, 256>}, {transform_indices = @transform_1, window_bounds = array<i64: 1>}, {pipeline_mode = #tpu.pipeline_mode<synchronous>, transform_indices = @transform_2, window_bounds = array<i64: 256, 128>}, {pipeline_mode = #tpu.pipeline_mode<synchronous>, transform_indices = @transform_3, window_bounds = array<i64: 1, 128>}, {pipeline_mode = #tpu.pipeline_mode<synchronous>, transform_indices = @transform_4, window_bounds = array<i64: 128, 128>}, {pipeline_mode = #tpu.pipeline_mode<synchronous>, transform_indices = @transform_5, window_bounds = array<i64: 1, 128>}, {pipeline_mode = #tpu.pipeline_mode<synchronous>, transform_indices = @transform_6, window_bounds = array<i64: 128, 128>}, {pipeline_mode = #tpu.pipeline_mode<synchronous>, transform_indices = @transform_7, window_bounds = array<i64: 1, 128>}, {transform_indices = @transform_8, window_bounds = array<i64: 512, 128>}]} {
    %c0 = arith.constant 0 : index
    %0 = memref.load %arg2[%c0] : memref<1xf32, #tpu.memory_space<smem>>
    %1 = arith.truncf %0 : f32 to bf16
    %c0_0 = arith.constant 0 : index
    %c0_1 = arith.constant 0 : index
    %2 = vector.load %arg1[%c0_0, %c0_1] : memref<512x256xf32, #tpu.memory_space<vmem>>, vector<512x256xf32>
    %3 = arith.truncf %2 : vector<512x256xf32> to vector<512x256xbf16>
    %c0_2 = arith.constant 0 : index
    %c0_3 = arith.constant 0 : index
    %4 = vector.load %arg3[%c0_2, %c0_3] : memref<256x128xbf16, #tpu.memory_space<vmem>>, vector<256x128xbf16>
    %cst = arith.constant dense<0.000000e+00> : vector<512x128xf32>
    %5 = tpu.matmul %3, %4, %cst {dimension_numbers = #tpu.dot_dimension_numbers<[1], [0], [0], [1], [0, 0, 1, 1], [], []>} : vector<512x256xbf16>, vector<256x128xbf16>, vector<512x128xf32> -> vector<512x128xf32>
    %c0_4 = arith.constant 0 : index
    %c0_5 = arith.constant 0 : index
    %6 = vector.load %arg4[%c0_4, %c0_5] : memref<1x128xf32, #tpu.memory_space<vmem>>, vector<1x128xf32>
    %7 = vector.broadcast %6 : vector<1x128xf32> to vector<512x128xf32>
    %8 = arith.addf %5, %7 : vector<512x128xf32>
    %9 = arith.truncf %8 : vector<512x128xf32> to vector<512x128xbf16>
    %cst_6 = arith.constant 0.000000e+00 : bf16
    %10 = vector.broadcast %cst_6 : bf16 to vector<512x128xbf16>
    %11 = arith.cmpf oge, %9, %10 : vector<512x128xbf16>
    %12 = vector.broadcast %1 : bf16 to vector<512x128xbf16>
    %13 = arith.mulf %12, %9 : vector<512x128xbf16>
    %14 = arith.select %11, %9, %13 : vector<512x128xi1>, vector<512x128xbf16>
    %c0_7 = arith.constant 0 : index
    %c0_8 = arith.constant 0 : index
    %15 = vector.load %arg5[%c0_7, %c0_8] : memref<128x128xbf16, #tpu.memory_space<vmem>>, vector<128x128xbf16>
    %cst_9 = arith.constant dense<0.000000e+00> : vector<512x128xf32>
    %16 = tpu.matmul %14, %15, %cst_9 {dimension_numbers = #tpu.dot_dimension_numbers<[1], [0], [0], [1], [0, 0, 1, 1], [], []>} : vector<512x128xbf16>, vector<128x128xbf16>, vector<512x128xf32> -> vector<512x128xf32>
    %c0_10 = arith.constant 0 : index
    %c0_11 = arith.constant 0 : index
    %17 = vector.load %arg6[%c0_10, %c0_11] : memref<1x128xf32, #tpu.memory_space<vmem>>, vector<1x128xf32>
    %18 = vector.broadcast %17 : vector<1x128xf32> to vector<512x128xf32>
    %19 = arith.addf %16, %18 : vector<512x128xf32>
    %20 = arith.truncf %19 : vector<512x128xf32> to vector<512x128xbf16>
    %cst_12 = arith.constant 0.000000e+00 : bf16
    %21 = vector.broadcast %cst_12 : bf16 to vector<512x128xbf16>
    %22 = arith.cmpf oge, %20, %21 : vector<512x128xbf16>
    %23 = vector.broadcast %1 : bf16 to vector<512x128xbf16>
    %24 = arith.mulf %23, %20 : vector<512x128xbf16>
    %25 = arith.select %22, %20, %24 : vector<512x128xi1>, vector<512x128xbf16>
    %c0_13 = arith.constant 0 : index
    %c0_14 = arith.constant 0 : index
    %26 = vector.load %arg7[%c0_13, %c0_14] : memref<128x128xbf16, #tpu.memory_space<vmem>>, vector<128x128xbf16>
    %cst_15 = arith.constant dense<0.000000e+00> : vector<512x128xf32>
    %27 = tpu.matmul %25, %26, %cst_15 {dimension_numbers = #tpu.dot_dimension_numbers<[1], [0], [0], [1], [0, 0, 1, 1], [], []>} : vector<512x128xbf16>, vector<128x128xbf16>, vector<512x128xf32> -> vector<512x128xf32>
    %c0_16 = arith.constant 0 : index
    %c0_17 = arith.constant 0 : index
    %28 = vector.load %arg8[%c0_16, %c0_17] : memref<1x128xf32, #tpu.memory_space<vmem>>, vector<1x128xf32>
    %29 = vector.broadcast %28 : vector<1x128xf32> to vector<512x128xf32>
    %30 = arith.addf %27, %29 : vector<512x128xf32>
    %31 = arith.truncf %30 : vector<512x128xf32> to vector<512x128xbf16>
    %c0_18 = arith.constant 0 : index
    %c0_19 = arith.constant 0 : index
    %32 = vector.load %arg9[%c0_18, %c0_19] : memref<512x128xbf16, #tpu.memory_space<vmem>>, vector<512x128xbf16>
    tpu.vector_store %arg9[%c0_18, %c0_19], %31 {strides = array<i32>} : memref<512x128xbf16, #tpu.memory_space<vmem>>, vector<512x128xbf16>,
    return
  }
  func.func @transform_0(%arg0: i32) -> (i32, i32) {
    %c0_i32 = arith.constant 0 : i32
    %c0_i32_0 = arith.constant 0 : i32
    return %arg0, %c0_i32 : i32, i32
  }
  func.func @transform_1(%arg0: i32) -> i32 {
    %c0_i32 = arith.constant 0 : i32
    %c0_i32_0 = arith.constant 0 : i32
    return %c0_i32 : i32
  }
  func.func @transform_2(%arg0: i32) -> (i32, i32) {
    %c0_i32 = arith.constant 0 : i32
    %c0_i32_0 = arith.constant 0 : i32
    %c0_i32_1 = arith.constant 0 : i32
    return %c0_i32, %c0_i32_0 : i32, i32
  }
  func.func @transform_3(%arg0: i32) -> (i32, i32) {
    %c0_i32 = arith.constant 0 : i32
    %c0_i32_0 = arith.constant 0 : i32
    %c0_i32_1 = arith.constant 0 : i32
    return %c0_i32, %c0_i32_0 : i32, i32
  }
  func.func @transform_4(%arg0: i32) -> (i32, i32) {
    %c0_i32 = arith.constant 0 : i32
    %c0_i32_0 = arith.constant 0 : i32
    %c0_i32_1 = arith.constant 0 : i32
    return %c0_i32, %c0_i32_0 : i32, i32
  }
  func.func @transform_5(%arg0: i32) -> (i32, i32) {
    %c0_i32 = arith.constant 0 : i32
    %c0_i32_0 = arith.constant 0 : i32
    %c0_i32_1 = arith.constant 0 : i32
    return %c0_i32, %c0_i32_0 : i32, i32
  }
  func.func @transform_6(%arg0: i32) -> (i32, i32) {
    %c0_i32 = arith.constant 0 : i32
    %c0_i32_0 = arith.constant 0 : i32
    %c0_i32_1 = arith.constant 0 : i32
    return %c0_i32, %c0_i32_0 : i32, i32
  }
  func.func @transform_7(%arg0: i32) -> (i32, i32) {
    %c0_i32 = arith.constant 0 : i32
    %c0_i32_0 = arith.constant 0 : i32
    %c0_i32_1 = arith.constant 0 : i32
    return %c0_i32, %c0_i32_0 : i32, i32
  }
  func.func @transform_8(%arg0: i32) -> (i32, i32) {
    %c0_i32 = arith.constant 0 : i32
    %c0_i32_0 = arith.constant 0 : i32
    return %arg0, %c0_i32 : i32, i32
  }
}

</mosaic_0001>

<bundles_post_ra>
// kernel: tpu_custom_call.1
= control target key start
LH: loop header
LB: loop body
LE: loop exit
PB: predicated region body
PF: predicated region fallthrough
CT: control target
= control target key end

     0   :  { %s4297_s0 = inlined_call_operand.hbm [shape: f32[2000,256], index: 0, kind: input, shape index: {}]   ;;  %s4298_s1 = inlined_call_operand.<no memory space> [shape: f32[1], index: 1, kind: input, shape index: {}]   ;;  %s4299_s2 = inlined_call_operand.hbm [shape: bf16[256,128], index: 2, kind: input, shape index: {}]   ;;  %s4300_s3 = inlined_call_operand.hbm [shape: f32[1,128], index: 3, kind: input, shape index: {}]   ;;  %s4301_s4 = inlined_call_operand.hbm [shape: bf16[128,128], index: 4, kind: input, shape index: {}]   ;;  %s4302_s5 = inlined_call_operand.hbm [shape: f32[1,128], index: 5, kind: input, shape index: {}]   ;;  %s4303_s6 = inlined_call_operand.hbm [shape: bf16[128,128], index: 6, kind: input, shape index: {}]   ;;  %s4304_s7 = inlined_call_operand.hbm [shape: f32[1,128], index: 7, kind: input, shape index: {}]   ;;  %s4305_s8 = inlined_call_operand.hbm [shape: bf16[2000,128], index: 8, kind: output, shape index: {}]  }
   0x1   :  { %4309 = sst [smem:[#allocation22_spill]] %s4299_s2 }
   0x2   :  { %13 = sst [smem:[#allocation2]] %s4298_s1 }
   0x3   :  { %14 = vsyncpa [#allocation4], 0 }
   0x4   :  { %16 = vsyncpa [#allocation4 + $0x1], 0 }
   0x5   :  { %17 = vsyncpa [#allocation7], 0 }
   0x6   :  { %18 = vsyncpa [#allocation10], 0 }
   0x7   :  { %19 = vsyncpa [#allocation13], 0 }
   0x8   :  { %20 = vsyncpa [#allocation5], 0 }
   0x9   :  { %22 = vsyncpa [#allocation5 + $0x1], 0  ;;  %s3599_s29 = smov 0   ;;  %s3601_s30 = smov 0  }
   0xa   :  { %s3603_s9 = smov 0   ;;  %s3605_s10 = smov 0  }
   0xb LB: > { %s3620_s1 = sadd.s32 4294967295, %s3534_s10   ;;  %s2503_s11 = sadd.s32 4294967294, %s3534_s10   ;;  %s3534_s10 = sphi %s3605_s10, %s4333_s10   ;;  %s3530_s9 = sphi %s3603_s9, %s4332_s9   ;;  %s3526_s30 = sphi %s3601_s30, %s4331_s30   ;;  %s3522_s29 = sphi %s3599_s29, %s4330_s29  }
   0xc   : > { %s3624_s12 = sadd.s32 1, %s3534_s10   ;;  %s35_s13 = sadd.s32 1, %s3530_s9 }
   0xd   : > { %s32_s14 = ssub.s32 %s3534_s10, %s3624_s12  ;;  %p42_p0 = scmp.ne.s32.totalorder %s3530_s9, %s3526_s30 }
   0xe   : > { %p33_p1 = scmp.eq.s32.totalorder %s32_s14, 0  ;;  %p43_p2 = scmp.eq.s32.totalorder %s3534_s10, 0 }
   0xf   : > { %p48_p3 = scmp.ne.s32.totalorder %s3526_s30, %s3522_s29  ;;  %p4306_p4 = scmp.eq.s32.totalorder %s3620_s1, 0 }
  0x10   : > { %s3636_s15 = scalar_select %p33_p1, %s3530_s9, %s35_s13  }
  0x11   : > { %p3638_p5 = por %p43_p2, %p42_p0  ;;  %p3644_p6 = por %p4306_p4, %p48_p3 }
  0x12   : > { %4310 = sst [smem:[#allocation21_spill]] %s3636_s15  ;;  %p219_p7 = scmp.eq.s32.totalorder %s3620_s1, 3 }
  0x13   : > { %s4312_s17 = scalar_select %p3644_p6, 1, 0 }
  0x14   : > { %p225_p8 = scmp.eq.s32.totalorder %s2503_s11, 3  ;;  %p2504_p9 = scmp.ge.s32.totalorder %s3534_s10, 1 }
  0x15   : > { %p232_p10 = scmp.lt.s32.totalorder %s3534_s10, 5  ;;  %p3651_p11 = por %p219_p7, %p42_p0 }
  0x16   : > { %p3655_p12 = por %p225_p8, %p48_p3  ;;  %s3536_s21 = smov [#allocation6]  }
  0x17   : > { %s4313_s18 = scalar_select %p3651_p11, 1, 0 }
  0x18   : > { %s4314_s19 = scalar_select %p3655_p12, 1, 0 }
  0x19   : > { %p3659_p13 = pnand %p2504_p9, %p232_p10  ;;  %s247_s22 = sshll.u32 %s3536_s21, 4  ;;  %s248_s22 = int_to_ptr.vmem [resolvable:$true] %s247_s22 }
  0x1a   : > { %s3537_s24 = smov [#allocation9]   ;;  %s3287_s27 = scalar_lea.vmem %s248_s22, 2048 }
  0x1b   : > { %s4315_s20 = scalar_select %p3659_p13, 1, 0 }
  0x1c   : > { %p3163_p1 = pneg %p3659_p13  ;;  %s271_s25 = sshll.u32 %s3537_s24, 4  ;;  %s272_s25 = int_to_ptr.vmem [resolvable:$true] %s271_s25 }
  0x1d   : > { %p3288_p3 = scmp.ne.s32.totalorder %s248_s22, %s3287_s27  ;;  %p3295_p9 = scmp.lt.s32.totalorder %s248_s22, %s248_s22 }
  0x1e   : > { %p3667_p2 = pnand %p3163_p1, %p4306_p4  ;;  %p3296_p10 = scmp.lt.s32.totalorder %s3287_s27, %s3287_s27 }
  0x20   : > { %p3673_p0 = pneg %p3667_p2  ;;  %p3297_p1 = por %p3296_p10, %p3295_p9 }
  0x22   : > { %p3290_p7 = pnand %p3288_p3, %p3673_p0 }
  0x24   : > { %p3291_p8 = pneg %p3290_p7 }
  0x26   : > { %p3298_p4 = pnand %p3297_p1, %p3291_p8 }
  0x28   : > { %3301 = shalt.err (!%p3298_p4)
}
  0x29   : > { %s3538_s28 = smov 64   ;;  %s3539_s11 = smov 4  }
  0x2a   : > { %s4318_s2 = sld [smem:[#allocation22_spill]]  ;;  %s3313_s21 = scalar_lea.vmem %s272_s25, 1024 }
  0x2b   : > { %p3314_p3 = scmp.ne.s32.totalorder %s272_s25, %s3313_s21  ;;  %p3321_p9 = scmp.lt.s32.totalorder %s272_s25, %s272_s25 }
  0x2c   : > { %p3322_p8 = scmp.lt.s32.totalorder %s3313_s21, %s3313_s21 }
  0x2d   : > { %p3316_p7 = pnand %p3314_p3, %p3673_p0 }
  0x2e   : > { %p3323_p4 = por %p3322_p8, %p3321_p9 }
  0x2f   : > { %p3317_p12 = pneg %p3316_p7 }
  0x30   : > { %3166 = dma.hbm_to_vmem [thread:$0]  (!%p3667_p2), %s4318_s2, 2048, %s248_s22, [#allocation7], %s3538_s28, %s3538_s28, %s3539_s11  }
  0x31   : > { %p3324_p10 = pnand %p3323_p4, %p3317_p12 }
  0x33   : > { %3327 = shalt.err (!%p3324_p10)
}
  0x34   : > { %3172 = dma.hbm_to_vmem [thread:$0]  (!%p3667_p2), %s4301_s4, 1024, %s272_s25, [#allocation10], %s3538_s28, %s3538_s28, %s3539_s11  }
  0x35   : > { %s3540_s22 = smov [#allocation12]   ;;  %s3541_s14 = smov [#allocation8]  }
  0x36   : > { %s295_s13 = sshll.u32 %s3540_s22, 4  ;;  %s261_s2 = sshll.u32 %s3541_s14, 4  ;;  %s296_s13 = int_to_ptr.vmem [resolvable:$true] %s295_s13  ;;  %s262_s2 = int_to_ptr.vmem [resolvable:$true] %s261_s2 }
  0x37   : > { %s3339_s15 = scalar_lea.vmem %s296_s13, 1024  ;;  %p3347_p7 = scmp.lt.s32.totalorder %s296_s13, %s296_s13 }
  0x38   : > { %p3340_p1 = scmp.ne.s32.totalorder %s296_s13, %s3339_s15  ;;  %p3348_p9 = scmp.lt.s32.totalorder %s3339_s15, %s3339_s15 }
  0x3a   : > { %p3342_p12 = pnand %p3340_p1, %p3673_p0  ;;  %p3349_p8 = por %p3348_p9, %p3347_p7 }
  0x3c   : > { %p3343_p3 = pneg %p3342_p12 }
  0x3e   : > { %p3350_p4 = pnand %p3349_p8, %p3343_p3 }
  0x40   : > { %3353 = shalt.err (!%p3350_p4)
}
  0x41   : > { %3178 = dma.hbm_to_vmem [thread:$0]  (!%p3667_p2), %s4303_s6, 1024, %s296_s13, [#allocation13], %s3538_s28, %s3538_s28, %s3539_s11  }
  0x42   : > { %s3365_s24 = scalar_lea.vmem %s262_s2, 16  ;;  %s3372_s15 = scalar_lea.vmem %s262_s2, 32 }
  0x43   : > { %p3366_p10 = scmp.ne.s32.totalorder %s262_s2, %s3365_s24  ;;  %p3373_p7 = scmp.lt.s32.totalorder %s262_s2, %s262_s2 }
  0x44   : > { %p3374_p3 = scmp.lt.s32.totalorder %s3372_s15, %s3365_s24 }
  0x45   : > { %p3368_p1 = pnand %p3366_p10, %p3673_p0 }
  0x46   : > { %p3375_p9 = por %p3374_p3, %p3373_p7 }
  0x47   : > { %p3369_p12 = pneg %p3368_p1 }
  0x49   : > { %p3376_p8 = pnand %p3375_p9, %p3369_p12 }
  0x4b   : > { %3379 = shalt.err (!%p3376_p8)
}
  0x4c   : > { %3169 = dma.hbm_to_vmem [thread:$0]  (!%p3667_p2), %s4300_s3, 16, %s262_s2, [#allocation7]  }
  0x4d   : > { %s3542_s28 = smov [#allocation11]   ;;  %s3543_s13 = smov [#allocation14]  }
  0x4e   : > { %s285_s11 = sshll.u32 %s3542_s28, 4  ;;  %s309_s14 = sshll.u32 %s3543_s13, 4  ;;  %s286_s11 = int_to_ptr.vmem [resolvable:$true] %s285_s11  ;;  %s310_s14 = int_to_ptr.vmem [resolvable:$true] %s309_s14 }
  0x4f   : > { %s3391_s25 = scalar_lea.vmem %s286_s11, 16  ;;  %s3398_s21 = scalar_lea.vmem %s286_s11, 32 }
  0x50   : > { %p3392_p4 = scmp.ne.s32.totalorder %s286_s11, %s3391_s25  ;;  %p3399_p12 = scmp.lt.s32.totalorder %s286_s11, %s286_s11 }
  0x51   : > { %p3400_p7 = scmp.lt.s32.totalorder %s3398_s21, %s3391_s25 }
  0x52   : > { %p3394_p10 = pnand %p3392_p4, %p3673_p0 }
  0x53   : > { %p3401_p3 = por %p3400_p7, %p3399_p12 }
  0x54   : > { %p3395_p1 = pneg %p3394_p10 }
  0x56   : > { %p3402_p9 = pnand %p3401_p3, %p3395_p1 }
  0x58   : > { %3405 = shalt.err (!%p3402_p9)
}
  0x59   : > { %3175 = dma.hbm_to_vmem [thread:$0]  (!%p3667_p2), %s4302_s5, 16, %s286_s11, [#allocation10]  }
  0x5a   : > { %s3417_s15 = scalar_lea.vmem %s310_s14, 16  ;;  %s3424_s27 = scalar_lea.vmem %s310_s14, 32 }
  0x5b   : > { %p3418_p8 = scmp.ne.s32.totalorder %s310_s14, %s3417_s15  ;;  %p3425_p10 = scmp.lt.s32.totalorder %s310_s14, %s310_s14 }
  0x5c   : > { %p3426_p6 = scmp.lt.s32.totalorder %s3424_s27, %s3417_s15 }
  0x5d   : > { %p3420_p11 = pnand %p3418_p8, %p3673_p0 }
  0x5e   : > { %p3427_p13 = por %p3426_p6, %p3425_p10 }
  0x5f   : > { %p3421_p4 = pneg %p3420_p11 }
  0x61   : > { %p3428_p12 = pnand %p3427_p13, %p3421_p4 }
  0x63   : > { %3431 = shalt.err (!%p3428_p12)
}
  0x64   : > { %3181 = dma.hbm_to_vmem [thread:$0]  (!%p3667_p2), %s4304_s7, 16, %s310_s14, [#allocation13]  }
  0x65   : > { %p2511_p1 = scmp.ge.s32.totalorder %s3534_s10, 4 }
  0x67   : > { %316 = sbr.rel (%p2511_p1) target bundleno = 140 (0x8c), region = 44 }
  0x6c   : > { %319 = sbr.rel (!%p3638_p5) target bundleno = 140 (0x8c), region = 48  ;;  %s320_s26 = sand.u32 (%p3638_p5), 1, %s3530_s9  }
  0x6d   : > { %s2513_s11 = sshll.u32 (%p3638_p5), %s3534_s10, 6  ;;  %s2512_s13 = sshll.u32 (%p3638_p5), %s320_s26, 10 }
  0x6e   : > { %s326_s25 = ssub.s32 (%p3638_p5), 250, %s2513_s11  ;;  %s3736_s24 = scalar_lea.sflag (%p3638_p5), [#allocation4], %s320_s26 }
  0x6f   : > { %p327_p6 = scmp.lt.s32.totalorder (%p3638_p5), %s326_s25, 64  ;;  %s324_s14 = scalar_lea.vmem (%p3638_p5), [#allocation3], %s2512_s13 }
  0x71   : > { %s4335_s25 = smov (!%p327_p6, %s326_s25), 64 }
  0x72   : > { %s3733_s21 = sshll.u32 %s4335_s25, 8 }
  0x73   : > { %s332_s23 = ssub.s32 16384, %s3733_s21 }
  0x74   : > { %333 = vsyncadd %s3736_s24, %s332_s23  ;;  %p2516_p5 = scmp.ne.s32.totalorder %s3733_s21, 0  ;;  %s2640_s16 = sshll.u32 %s3534_s10, 14 }
  0x75   : > { %s3744_s27 = scalar_lea.hbm %s4297_s0, %s2640_s16  ;;  %s339_s22 = sshll.u32 %s324_s14, 4  ;;  %s3746_s22 = int_to_ptr.vmem [resolvable:$true] %s339_s22 }
  0x76   : > { %s3432_s28 = scalar_lea.hbm %s3744_s27, %s3733_s21  ;;  %s3436_s13 = scalar_lea.hbm %s4297_s0, 64000 }
  0x77   : > { %p3433_p11 = scmp.ne.s32.totalorder %s3744_s27, %s3432_s28  ;;  %p3437_p0 = scmp.lt.s32.totalorder %s3744_s27, %s4297_s0 }
  0x78   : > { %p3438_p7 = scmp.lt.s32.totalorder %s3436_s13, %s3432_s28 }
  0x79   : > { %p3434_p13 = pnand %p3433_p11, %p2516_p5 }
  0x7a   : > { %p3439_p3 = por %p3438_p7, %p3437_p0 }
  0x7b   : > { %p3435_p2 = pneg %p3434_p13 }
  0x7d   : > { %p3440_p9 = pnand %p3439_p3, %p3435_p2 }
  0x7f   : > { %3443 = shalt.err (!%p3440_p9)
}
  0x80   : > { %s3444_s14 = scalar_lea.vmem %s3746_s22, %s3733_s21  ;;  %s3544_s16 = smov [#allocation3]  }
  0x81   : > { %p3445_p8 = scmp.ne.s32.totalorder %s3746_s22, %s3444_s14  ;;  %s3448_s2 = sshll.u32 %s3544_s16, 4  ;;  %s3449_s2 = int_to_ptr.vmem [resolvable:$false] %s3448_s2 }
  0x82   : > { %s3450_s15 = scalar_lea.vmem %s3449_s2, 32768  ;;  %p3451_p12 = scmp.lt.s32.totalorder %s3746_s22, %s3449_s2 }
  0x83   : > { %p3446_p4 = pnand %p3445_p8, %p2516_p5  ;;  %p3452_p1 = scmp.lt.s32.totalorder %s3450_s15, %s3444_s14 }
  0x85   : > { %p3447_p10 = pneg %p3446_p4  ;;  %p3453_p6 = por %p3452_p1, %p3451_p12 }
  0x87   : > { %p3454_p11 = pnand %p3453_p6, %p3447_p10 }
  0x89   : > { %3457 = shalt.err (!%p3454_p11)
}
  0x8a   : > { %s3545_s28 = smov 256   ;;  %s3546_s26 = smov 16  }
  0x8b   : > { %345 = dma.hbm_to_vmem [thread:$0]  (%p2516_p5), %s3744_s27, %s3733_s21, %s3746_s22, %s3736_s24, %s3545_s28, %s3545_s28, %s3546_s26  }
  0x8c PF: > { %p4319_p13 = scmp.ne.s32.totalorder %s4315_s20, 0 }
  0x8d   : > { %s3775_s11 = sand.u32 (!%p4319_p13), 1, %s3526_s30   ;;  %p4320_p2 = scmp.ne.s32.totalorder (!%p4319_p13), %s4312_s17, 0 }
  0x8e   : > { %351 = sbr.rel (%p4319_p13) target bundleno = 1113 (0x459), region = 52  ;;  %s2522_s13 = sshll.u32 (!%p4319_p13), %s3775_s11, 10 }
  0x8f   : > { %s354_s25 = scalar_lea.sflag (!%p4319_p13), [#allocation4], %s3775_s11  ;;  %s3779_s23 = scalar_lea.vmem (!%p4319_p13), [#allocation3], %s2522_s13 }
  0x93   : > { %3501 = dma.done.wait (%p4320_p2), %s354_s25, 16384  }
  0x94   : > { %3503 = vsyncadd (%p4320_p2), %s354_s25, 4294950912  ;;  %p4321_p5 = scmp.eq.s32.totalorder %s3620_s1, 0 }
  0x96   : > { %3505 = dma.done.wait (%p4321_p5), [#allocation7], 2064   ;;  %p4322_p0 = pmov %p4321_p5 }
  0x98   : > { %3507 = vsyncadd (%p4322_p0), [#allocation7], 4294965232  ;;  %p4323_p7 = pmov %p4322_p0 }
  0x99   : > { %p4324_p3 = pmov %p4322_p0 }
  0x9a   : > { %3509 = dma.done.wait (%p4323_p7), [#allocation10], 1040  }
  0x9b   : > { %3511 = vsyncadd (%p4324_p3), [#allocation10], 4294966256  ;;  %p4325_p9 = pmov %p4322_p0 }
  0x9c   : > { %p4326_p8 = pmov %p4322_p0 }
  0x9d   : > { %3513 = dma.done.wait (%p4325_p9), [#allocation13], 1040  }
  0x9e   : > { %3515 = vsyncadd (%p4326_p8), [#allocation13], 4294966256  ;;  %v3547_v0 = vmov 0   ;;  %v3244_v1 = vld [vmem:[#allocation6 + $0x38] sm:$0xff]   ;;  %v3245_v2 = vld [vmem:[#allocation6 + $0x30] sm:$0xff]   ;;  %s3887_s17 = sld [smem:[#allocation2]] }
  0x9f   : > { %764 = vmatprep.subr.bf16.mxu0 %v3547_v0  ;;  %v3246_v3 = vld [vmem:[#allocation6 + $0x28] sm:$0xff]   ;;  %v3247_v4 = vld [vmem:[#allocation6 + $0x20] sm:$0xff]   ;;  %v3248_v5 = vld [vmem:[#allocation6 + $0x18] sm:$0xff]   ;;  %s2529_s15 = sshll.u32 %s3775_s11, 8  ;;  %s2354_s26 = scalar_lea.sflag [#allocation5], %s3775_s11 }
  0xa0   : > { %765 = vmatpush1.bf16.msra.mxu0 %v3244_v1  ;;  %v438_v6 = vld [vmem:[%s3779_s23 + $0x8] sm:$0xff]  ;;  %v440_v7 = vld [vmem:[%s3779_s23 + $0x18] sm:$0xff]  ;;  %v3249_v9 = vld [vmem:[#allocation6 + $0x10] sm:$0xff]   ;;  %s4142_s28 = scalar_lea.vmem [#allocation15], %s2529_s15  ;;  %p4327_p10 = scmp.ne.s32.totalorder %s4313_s18, 0 }
  0xa1   : > { %766 = vmatprep.subr.bf16.mxu0 %v3547_v0  ;;  %v566_v8 = vpack.c.bf16 %v440_v7, %v438_v6  ;;  %v3250_v10 = vld [vmem:[#allocation6 + $0x8] sm:$0xff]   ;;  %v3251_v11 = vld [vmem:[#allocation6] sm:$0xff]   ;;  %v3252_v12 = vld [vmem:[#allocation6 + $0x78] sm:$0xff]   ;;  %s2630_s13 = sshll.u32 (%p4327_p10), %s3620_s1, 6 }
  0xa2   : > { %v3253_v13 = vld [vmem:[#allocation6 + $0x70] sm:$0xff]   ;;  %v3254_v14 = vld [vmem:[#allocation6 + $0x68] sm:$0xff]   ;;  %v3255_v15 = vld [vmem:[#allocation6 + $0x60] sm:$0xff]   ;;  %s2362_s25 = ssub.s32 (%p4327_p10), 250, %s2630_s13 }
  0xa3   : > { %796 = vmatprep.mubr.bf16.mxu0 %v566_v8  ;;  %v3256_v16 = vld [vmem:[#allocation6 + $0x58] sm:$0xff]   ;;  %v3257_v17 = vld [vmem:[#allocation6 + $0x50] sm:$0xff]   ;;  %v3258_v18 = vld [vmem:[#allocation6 + $0x48] sm:$0xff]   ;;  %p2363_p12 = scmp.lt.s32.totalorder (%p4327_p10), %s2362_s25, 64 }
  0xa4   : > { %767 = vmatpush1.bf16.msra.mxu0 %v3245_v2  ;;  %v3259_v19 = vld [vmem:[#allocation6 + $0x40] sm:$0xff]   ;;  %v439_v21 = vld [vmem:[%s3779_s23 + $0x10] sm:$0xff]  ;;  %v442_v22 = vld [vmem:[%s3779_s23 + $0x28] sm:$0xff]  ;;  %s429_s20 = sshrl.u32 %s3887_s17, 16  ;;  %p428_p4 = scmp.ne.f32.partialorder %s3887_s17, %s3887_s17 }
  0xa5   : > { %768 = vmatprep.subr.bf16.mxu0 %v3547_v0  ;;  %v437_v20 = vld [vmem:[%s3779_s23] sm:$0xff]  ;;  %v444_v23 = vld [vmem:[%s3779_s23 + $0x38] sm:$0xff]  ;;  %v443_v27 = vld [vmem:[%s3779_s23 + $0x30] sm:$0xff]  ;;  %s430_s21 = sand.u32 1, %s429_s20 }
  0xa6   : > { %v565_v24 = vpack.c.bf16 %v439_v21, %v437_v20  ;;  %v568_v25 = vpack.c.bf16 %v444_v23, %v442_v22  ;;  %v441_v26 = vld [vmem:[%s3779_s23 + $0x20] sm:$0xff]  ;;  %v446_v28 = vld [vmem:[%s3779_s23 + $0x48] sm:$0xff]  ;;  %v448_v29 = vld [vmem:[%s3779_s23 + $0x58] sm:$0xff]  ;;  %s431_s24 = sadd.s32 32767, %s430_s21 }
  0xa7   : > { %v567_v30 = vpack.c.bf16 %v443_v27, %v441_v26  ;;  %v570_v31 = vpack.c.bf16 %v448_v29, %v446_v28  ;;  %v445_v32 = vld [vmem:[%s3779_s23 + $0x40] sm:$0xff]  ;;  %v447_v33 = vld [vmem:[%s3779_s23 + $0x50] sm:$0xff]  ;;  %v450_v34 = vld [vmem:[%s3779_s23 + $0x68] sm:$0xff]  ;;  %s432_s27 = sadd.s32 %s431_s24, %s3887_s17 }
  0xa8   : > { %769 = vmatpush1.bf16.msra.mxu0 %v3246_v3  ;;  %v452_v35 = vld [vmem:[%s3779_s23 + $0x78] sm:$0xff]  ;;  %v569_v36 = vpack.c.bf16 %v447_v33, %v445_v32  ;;  %v449_v38 = vld [vmem:[%s3779_s23 + $0x60] sm:$0xff]  ;;  %v451_v39 = vld [vmem:[%s3779_s23 + $0x70] sm:$0xff]  ;;  %s433_s22 = sand.u32 4294901760, %s432_s27 }
  0xa9   : > { %770 = vmatprep.subr.bf16.mxu0 %v3547_v0  ;;  %v572_v37 = vpack.c.bf16 %v452_v35, %v450_v34  ;;  %v454_v40 = vld [vmem:[%s3779_s23 + $0x88] sm:$0xff]  ;;  %v456_v41 = vld [vmem:[%s3779_s23 + $0x98] sm:$0xff]  ;;  %v571_v42 = vpack.c.bf16 %v451_v39, %v449_v38  ;;  %v453_v44 = vld [vmem:[%s3779_s23 + $0x80] sm:$0xff]  ;;  %s4337_s22 = smov (%p428_p4, %s433_s22), 2143289344 }
  0xaa   : > { %v574_v43 = vpack.c.bf16 %v456_v41, %v454_v40  ;;  %v455_v45 = vld [vmem:[%s3779_s23 + $0x90] sm:$0xff]  ;;  %v458_v46 = vld [vmem:[%s3779_s23 + $0xa8] sm:$0xff]  ;;  %v460_v47 = vld [vmem:[%s3779_s23 + $0xb8] sm:$0xff]  ;;  %s436_s14 = sshrl.u32 %s4337_s22, 16 }
  0xab   : > { %v573_v48 = vpack.c.bf16 %v455_v45, %v453_v44  ;;  %v576_v49 = vpack.c.bf16 %v460_v47, %v458_v46  ;;  %v457_v50 = vld [vmem:[%s3779_s23 + $0xa0] sm:$0xff]  ;;  %v459_v51 = vld [vmem:[%s3779_s23 + $0xb0] sm:$0xff]  ;;  %v462_v52 = vld [vmem:[%s3779_s23 + $0xc8] sm:$0xff]  ;;  %s1117_s16 = sshll.u32 %s436_s14, 16 }
  0xac   : > { %771 = vmatpush1.bf16.msra.mxu0 %v3247_v4  ;;  %v464_v53 = vld [vmem:[%s3779_s23 + $0xd8] sm:$0xff]  ;;  %v575_v54 = vpack.c.bf16 %v459_v51, %v457_v50  ;;  %v461_v56 = vld [vmem:[%s3779_s23 + $0xc0] sm:$0xff]  ;;  %v463_v57 = vld [vmem:[%s3779_s23 + $0xd0] sm:$0xff]  ;;  %s1118_s2 = sor.u32 %s1117_s16, %s436_s14 }
  0xad   : > { %772 = vmatprep.subr.bf16.mxu0 %v3547_v0  ;;  %v578_v55 = vpack.c.bf16 %v464_v53, %v462_v52  ;;  %v466_v58 = vld [vmem:[%s3779_s23 + $0xe8] sm:$0xff]  ;;  %v468_v59 = vld [vmem:[%s3779_s23 + $0xf8] sm:$0xff]  ;;  %v577_v60 = vpack.c.bf16 %v463_v57, %v461_v56  ;;  %v465_v63 = vld [vmem:[%s3779_s23 + $0xe0] sm:$0xff] }
  0xae   : > { %v580_v61 = vpack.c.bf16 %v468_v59, %v466_v58  ;;  %v3260_v62 = vld [vmem:[#allocation9 + $0x38] sm:$0xff]   ;;  %v470_v1 = vld [vmem:[%s3779_s23 + $0x108] sm:$0xff]  ;;  %v471_v8 = vld [vmem:[%s3779_s23 + $0x110] sm:$0xff] }
  0xaf   : > { %v472_v2 = vld [vmem:[%s3779_s23 + $0x118] sm:$0xff]  ;;  %2977 = vmatprep.subr.bf16.mxu1 %v3260_v62  ;;  %v3262_v6 = vld [vmem:[#allocation9 + $0x28] sm:$0xff]   ;;  %v469_v7 = vld [vmem:[%s3779_s23 + $0x100] sm:$0xff] }
  0xb0   : > { %773 = vmatpush1.bf16.msra.mxu0 %v3248_v5  ;;  %2978 = vmatpush3.bf16.msra.mxu1 %v3260_v62  ;;  %v582_v4 = vpack.c.bf16 %v472_v2, %v470_v1  ;;  %v3261_v5 = vld [vmem:[#allocation9 + $0x30] sm:$0xff]   ;;  %v477_v22 = vld [vmem:[%s3779_s23 + $0x140] sm:$0xff]  ;;  %v3266_v26 = vld [vmem:[#allocation9 + $0x8] sm:$0xff]  }
  0xb1   : > { %774 = vmatprep.subr.bf16.mxu0 %v3547_v0  ;;  %2979 = vmatprep.subr.bf16.mxu1 %v3261_v5  ;;  %v3265_v21 = vld [vmem:[#allocation9 + $0x10] sm:$0xff]   ;;  %v3267_v29 = vld [vmem:[#allocation9] sm:$0xff]  }
  0xb2   : > { %v479_v23 = vld [vmem:[%s3779_s23 + $0x150] sm:$0xff]  ;;  %v486_v32 = vld [vmem:[%s3779_s23 + $0x188] sm:$0xff]  ;;  %v488_v33 = vld [vmem:[%s3779_s23 + $0x198] sm:$0xff] }
  0xb3   : > { %v585_v27 = vpack.c.bf16 %v479_v23, %v477_v22  ;;  %v590_v35 = vpack.c.bf16 %v488_v33, %v486_v32  ;;  %v490_v38 = vld [vmem:[%s3779_s23 + $0x1a8] sm:$0xff]  ;;  %v492_v39 = vld [vmem:[%s3779_s23 + $0x1b8] sm:$0xff]  ;;  %v505_v2 = vld [vmem:[%s3779_s23 + $0x220] sm:$0xff] }
  0xb4   : > { %775 = vmatpush1.bf16.msra.mxu0 %v3249_v9  ;;  %2980 = vmatpush3.bf16.msra.mxu1 %v3261_v5  ;;  %v474_v9 = vld [vmem:[%s3779_s23 + $0x128] sm:$0xff]  ;;  %v592_v41 = vpack.c.bf16 %v492_v39, %v490_v38  ;;  %v496_v45 = vld [vmem:[%s3779_s23 + $0x1d8] sm:$0xff]  ;;  %v525_v32 = vld [vmem:[%s3779_s23 + $0x2c0] sm:$0xff] }
  0xb5   : > { %776 = vmatprep.subr.bf16.mxu0 %v3547_v0  ;;  %2981 = vmatprep.subr.bf16.mxu1 %v3262_v6  ;;  %v494_v44 = vld [vmem:[%s3779_s23 + $0x1c8] sm:$0xff]  ;;  %v500_v51 = vld [vmem:[%s3779_s23 + $0x1f8] sm:$0xff]  ;;  %v527_v33 = vld [vmem:[%s3779_s23 + $0x2d0] sm:$0xff] }
  0xb6   : > { %v594_v47 = vpack.c.bf16 %v496_v45, %v494_v44  ;;  %v498_v50 = vld [vmem:[%s3779_s23 + $0x1e8] sm:$0xff]  ;;  %v504_v57 = vld [vmem:[%s3779_s23 + $0x218] sm:$0xff]  ;;  %v529_v38 = vld [vmem:[%s3779_s23 + $0x2e0] sm:$0xff] }
  0xb7   : > { %v596_v53 = vpack.c.bf16 %v500_v51, %v498_v50  ;;  %v502_v56 = vld [vmem:[%s3779_s23 + $0x208] sm:$0xff]  ;;  %v512_v5 = vld [vmem:[%s3779_s23 + $0x258] sm:$0xff]  ;;  %v531_v39 = vld [vmem:[%s3779_s23 + $0x2f0] sm:$0xff] }
  0xb8   : > { %777 = vmatpush1.bf16.msra.mxu0 %v3250_v10  ;;  %v476_v10 = vld [vmem:[%s3779_s23 + $0x138] sm:$0xff]  ;;  %2982 = vmatpush3.bf16.msra.mxu1 %v3262_v6  ;;  %v598_v59 = vpack.c.bf16 %v504_v57, %v502_v56  ;;  %v506_v62 = vld [vmem:[%s3779_s23 + $0x228] sm:$0xff]  ;;  %v533_v44 = vld [vmem:[%s3779_s23 + $0x300] sm:$0xff] }
  0xb9   : > { %778 = vmatprep.subr.bf16.mxu0 %v3547_v0  ;;  %v522_v22 = vld [vmem:[%s3779_s23 + $0x2a8] sm:$0xff]  ;;  %v524_v23 = vld [vmem:[%s3779_s23 + $0x2b8] sm:$0xff]  ;;  %v535_v45 = vld [vmem:[%s3779_s23 + $0x310] sm:$0xff] }
  0xba   : > { %v537_v51 = vld [vmem:[%s3779_s23 + $0x320] sm:$0xff]  ;;  %v544_v56 = vld [vmem:[%s3779_s23 + $0x358] sm:$0xff] }
  0xbc   : > { %779 = vmatpush1.bf16.msra.mxu0 %v3251_v11  ;;  %v581_v11 = vpack.c.bf16 %v471_v8, %v469_v7  ;;  %v509_v8 = vld [vmem:[%s3779_s23 + $0x240] sm:$0xff] }
  0xbd   : > { %780 = vmatprep.subr.bf16.mxu0 %v3547_v0 }
  0xc0   : > { %781 = vmatpush2.bf16.msra.mxu0 %v3252_v12  ;;  %v584_v12 = vpack.c.bf16 %v476_v10, %v474_v9  ;;  %v511_v9 = vld [vmem:[%s3779_s23 + $0x250] sm:$0xff]  ;;  %v514_v10 = vld [vmem:[%s3779_s23 + $0x268] sm:$0xff] }
  0xc1   : > { %782 = vmatprep.subr.bf16.mxu0 %v3547_v0 }
  0xc4   : > { %783 = vmatpush2.bf16.msra.mxu0 %v3253_v13  ;;  %v3263_v13 = vld [vmem:[#allocation9 + $0x20] sm:$0xff]  }
  0xc5   : > { %784 = vmatprep.subr.bf16.mxu0 %v3547_v0  ;;  %2983 = vmatprep.subr.bf16.mxu1 %v3263_v13 }
  0xc6   : > { %2984 = vmatpush3.bf16.msra.mxu1 %v3263_v13 }
  0xc8   : > { %785 = vmatpush2.bf16.msra.mxu0 %v3254_v14  ;;  %v473_v14 = vld [vmem:[%s3779_s23 + $0x120] sm:$0xff] }
  0xc9   : > { %786 = vmatprep.subr.bf16.mxu0 %v3547_v0 }
  0xcc   : > { %787 = vmatpush2.bf16.msra.mxu0 %v3255_v15  ;;  %v475_v15 = vld [vmem:[%s3779_s23 + $0x130] sm:$0xff] }
  0xcd   : > { %788 = vmatprep.subr.bf16.mxu0 %v3547_v0 }
  0xd0   : > { %789 = vmatpush2.bf16.msra.mxu0 %v3256_v16  ;;  %v478_v16 = vld [vmem:[%s3779_s23 + $0x148] sm:$0xff] }
  0xd1   : > { %790 = vmatprep.subr.bf16.mxu0 %v3547_v0 }
  0xd4   : > { %791 = vmatpush2.bf16.msra.mxu0 %v3257_v17  ;;  %v480_v17 = vld [vmem:[%s3779_s23 + $0x158] sm:$0xff] }
  0xd5   : > { %792 = vmatprep.subr.bf16.mxu0 %v3547_v0  ;;  %v586_v20 = vpack.c.bf16 %v480_v17, %v478_v16  ;;  %v518_v16 = vld [vmem:[%s3779_s23 + $0x288] sm:$0xff]  ;;  %v520_v17 = vld [vmem:[%s3779_s23 + $0x298] sm:$0xff] }
  0xd8   : > { %793 = vmatpush2.bf16.msra.mxu0 %v3258_v18  ;;  %v3264_v18 = vld [vmem:[#allocation9 + $0x18] sm:$0xff]  }
  0xd9   : > { %794 = vmatprep.subr.bf16.mxu0 %v3547_v0  ;;  %v467_v0 = vld [vmem:[%s3779_s23 + $0xf0] sm:$0xff]  ;;  %2985 = vmatprep.subr.bf16.mxu1 %v3264_v18 }
  0xda   : > { %v579_v3 = vpack.c.bf16 %v467_v0, %v465_v63  ;;  %2986 = vmatpush3.bf16.msra.mxu1 %v3264_v18  ;;  %v508_v63 = vld [vmem:[%s3779_s23 + $0x238] sm:$0xff] }
  0xdb   : > { %2987 = vmatprep.subr.bf16.mxu1 %v3265_v21  ;;  %v600_v1 = vpack.c.bf16 %v508_v63, %v506_v62  ;;  %v3913_v63 = vstv %s1118_s2 }
  0xdc   : > { %795 = vmatpush2.bf16.msra.mxu0 %v3259_v19  ;;  %v583_v19 = vpack.c.bf16 %v475_v15, %v473_v14  ;;  %v513_v14 = vld [vmem:[%s3779_s23 + $0x260] sm:$0xff]  ;;  %v515_v15 = vld [vmem:[%s3779_s23 + $0x270] sm:$0xff] }
  0xdd   : > { %v603_v18 = vpack.c.bf16 %v515_v15, %v513_v14 }
  0xde   : > { %2988 = vmatpush3.bf16.msra.mxu1 %v3265_v21  ;;  %v519_v21 = vld [vmem:[%s3779_s23 + $0x290] sm:$0xff] }
  0xdf   : > { %797 = vmatmul.mubr.bf16.vlgmr.msra.gmra.mxu0 %v565_v24  ;;  %v482_v24 = vld [vmem:[%s3779_s23 + $0x168] sm:$0xff]  ;;  %2989 = vmatprep.subr.bf16.mxu1 %v3266_v26 }
  0xe0   : > { %804 = vmatprep.mubr.bf16.mxu0 %v568_v25  ;;  %v484_v25 = vld [vmem:[%s3779_s23 + $0x178] sm:$0xff] }
  0xe1   : > { %v588_v28 = vpack.c.bf16 %v484_v25, %v482_v24  ;;  %v608_v25 = vpack.c.bf16 %v524_v23, %v522_v22  ;;  %v552_v22 = vld [vmem:[%s3779_s23 + $0x398] sm:$0xff] }
  0xe2   : > { %2990 = vmatpush3.bf16.msra.mxu1 %v3266_v26  ;;  %v521_v26 = vld [vmem:[%s3779_s23 + $0x2a0] sm:$0xff] }
  0xe3   : > { %2991 = vmatprep.subr.bf16.mxu1 %v3267_v29 }
  0xe6   : > { %2992 = vmatpush3.bf16.msra.mxu1 %v3267_v29  ;;  %v528_v29 = vld [vmem:[%s3779_s23 + $0x2d8] sm:$0xff] }
  0xe7   : > { %805 = vmatmul.mubr.bf16.gmra.mxu0 %v567_v30  ;;  %v481_v30 = vld [vmem:[%s3779_s23 + $0x160] sm:$0xff] }
  0xe8   : > { %812 = vmatprep.mubr.bf16.mxu0 %v570_v31  ;;  %v483_v31 = vld [vmem:[%s3779_s23 + $0x170] sm:$0xff] }
  0xe9   : > { %v587_v34 = vpack.c.bf16 %v483_v31, %v481_v30 }
  0xef   : > { %813 = vmatmul.mubr.bf16.gmra.mxu0 %v569_v36  ;;  %v485_v36 = vld [vmem:[%s3779_s23 + $0x180] sm:$0xff] }
  0xf0   : > { %820 = vmatprep.mubr.bf16.mxu0 %v572_v37  ;;  %v487_v37 = vld [vmem:[%s3779_s23 + $0x190] sm:$0xff] }
  0xf1   : > { %v589_v40 = vpack.c.bf16 %v487_v37, %v485_v36  ;;  %v609_v36 = vpack.c.bf16 %v527_v33, %v525_v32  ;;  %v549_v33 = vld [vmem:[%s3779_s23 + $0x380] sm:$0xff] }
  0xf7   : > { %821 = vmatmul.mubr.bf16.gmra.mxu0 %v571_v42  ;;  %v489_v42 = vld [vmem:[%s3779_s23 + $0x1a0] sm:$0xff] }
  0xf8   : > { %828 = vmatprep.mubr.bf16.mxu0 %v574_v43  ;;  %v491_v43 = vld [vmem:[%s3779_s23 + $0x1b0] sm:$0xff] }
  0xf9   : > { %v591_v46 = vpack.c.bf16 %v491_v43, %v489_v42  ;;  %v611_v42 = vpack.c.bf16 %v531_v39, %v529_v38 }
  0xff   : > { %829 = vmatmul.mubr.bf16.gmra.mxu0 %v573_v48  ;;  %v493_v48 = vld [vmem:[%s3779_s23 + $0x1c0] sm:$0xff] }
 0x100   : > { %836 = vmatprep.mubr.bf16.mxu0 %v576_v49  ;;  %v495_v49 = vld [vmem:[%s3779_s23 + $0x1d0] sm:$0xff] }
 0x101   : > { %v593_v52 = vpack.c.bf16 %v495_v49, %v493_v48  ;;  %v613_v48 = vpack.c.bf16 %v535_v45, %v533_v44 }
 0x107   : > { %837 = vmatmul.mubr.bf16.gmra.mxu0 %v575_v54  ;;  %v497_v54 = vld [vmem:[%s3779_s23 + $0x1e0] sm:$0xff] }
 0x108   : > { %844 = vmatprep.mubr.bf16.mxu0 %v578_v55  ;;  %v499_v55 = vld [vmem:[%s3779_s23 + $0x1f0] sm:$0xff] }
 0x109   : > { %v595_v58 = vpack.c.bf16 %v499_v55, %v497_v54  ;;  %v542_v55 = vld [vmem:[%s3779_s23 + $0x348] sm:$0xff] }
 0x10f   : > { %845 = vmatmul.mubr.bf16.gmra.mxu0 %v577_v60  ;;  %v501_v60 = vld [vmem:[%s3779_s23 + $0x200] sm:$0xff] }
 0x110   : > { %852 = vmatprep.mubr.bf16.mxu0 %v580_v61  ;;  %v503_v61 = vld [vmem:[%s3779_s23 + $0x210] sm:$0xff] }
 0x111   : > { %v597_v0 = vpack.c.bf16 %v503_v61, %v501_v60  ;;  %v618_v61 = vpack.c.bf16 %v544_v56, %v542_v55 }
 0x117   : > { %853 = vmatmul.mubr.bf16.gmra.mxu0 %v579_v3  ;;  %v507_v3 = vld [vmem:[%s3779_s23 + $0x230] sm:$0xff] }
 0x118   : > { %860 = vmatprep.mubr.bf16.mxu0 %v582_v4  ;;  %v510_v4 = vld [vmem:[%s3779_s23 + $0x248] sm:$0xff]  ;;  %v599_v6 = vpack.c.bf16 %v507_v3, %v505_v2  ;;  %v541_v3 = vld [vmem:[%s3779_s23 + $0x340] sm:$0xff] }
 0x119   : > { %v602_v7 = vpack.c.bf16 %v512_v5, %v510_v4  ;;  %v543_v4 = vld [vmem:[%s3779_s23 + $0x350] sm:$0xff] }
 0x11f   : > { %861 = vmatmul.mubr.bf16.gmra.mxu0 %v581_v11  ;;  %v516_v11 = vld [vmem:[%s3779_s23 + $0x278] sm:$0xff] }
 0x120   : > { %868 = vmatprep.mubr.bf16.mxu0 %v584_v12  ;;  %v601_v12 = vpack.c.bf16 %v511_v9, %v509_v8  ;;  %v604_v13 = vpack.c.bf16 %v516_v11, %v514_v10  ;;  %v617_v10 = vpack.c.bf16 %v543_v4, %v541_v3  ;;  %v562_v4 = vld [vmem:[%s3779_s23 + $0x3e8] sm:$0xff] }
 0x127   : > { %869 = vmatmul.mubr.bf16.gmra.mxu0 %v583_v19  ;;  %v606_v19 = vpack.c.bf16 %v520_v17, %v518_v16 }
 0x128   : > { %876 = vmatprep.mubr.bf16.mxu0 %v586_v20  ;;  %v517_v20 = vld [vmem:[%s3779_s23 + $0x280] sm:$0xff] }
 0x129   : > { %v605_v24 = vpack.c.bf16 %v519_v21, %v517_v20  ;;  %v550_v21 = vld [vmem:[%s3779_s23 + $0x388] sm:$0xff] }
 0x12f   : > { %877 = vmatmul.mubr.bf16.gmra.mxu0 %v585_v27  ;;  %v523_v27 = vld [vmem:[%s3779_s23 + $0x2b0] sm:$0xff] }
 0x130   : > { %884 = vmatprep.mubr.bf16.mxu0 %v588_v28  ;;  %v526_v28 = vld [vmem:[%s3779_s23 + $0x2c8] sm:$0xff]  ;;  %v607_v30 = vpack.c.bf16 %v523_v27, %v521_v26 }
 0x131   : > { %v610_v31 = vpack.c.bf16 %v528_v29, %v526_v28  ;;  %v622_v28 = vpack.c.bf16 %v552_v22, %v550_v21 }
 0x137   : > { %885 = vmatmul.mubr.bf16.gmra.mxu0 %v587_v34  ;;  %v530_v34 = vld [vmem:[%s3779_s23 + $0x2e8] sm:$0xff] }
 0x138   : > { %892 = vmatprep.mubr.bf16.mxu0 %v590_v35  ;;  %v532_v35 = vld [vmem:[%s3779_s23 + $0x2f8] sm:$0xff] }
 0x139   : > { %v612_v37 = vpack.c.bf16 %v532_v35, %v530_v34  ;;  %v551_v34 = vld [vmem:[%s3779_s23 + $0x390] sm:$0xff] }
 0x13f   : > { %893 = vmatmul.mubr.bf16.gmra.mxu0 %v589_v40  ;;  %v534_v40 = vld [vmem:[%s3779_s23 + $0x308] sm:$0xff] }
 0x140   : > { %900 = vmatprep.mubr.bf16.mxu0 %v592_v41  ;;  %v536_v41 = vld [vmem:[%s3779_s23 + $0x318] sm:$0xff] }
 0x141   : > { %v614_v43 = vpack.c.bf16 %v536_v41, %v534_v40  ;;  %v621_v40 = vpack.c.bf16 %v551_v34, %v549_v33 }
 0x147   : > { %901 = vmatmul.mubr.bf16.gmra.mxu0 %v591_v46  ;;  %v538_v46 = vld [vmem:[%s3779_s23 + $0x328] sm:$0xff] }
 0x148   : > { %908 = vmatprep.mubr.bf16.mxu0 %v594_v47  ;;  %v540_v47 = vld [vmem:[%s3779_s23 + $0x338] sm:$0xff] }
 0x149   : > { %v616_v49 = vpack.c.bf16 %v540_v47, %v538_v46 }
 0x14f   : > { %909 = vmatmul.mubr.bf16.gmra.mxu0 %v593_v52  ;;  %v539_v52 = vld [vmem:[%s3779_s23 + $0x330] sm:$0xff] }
 0x150   : > { %916 = vmatprep.mubr.bf16.mxu0 %v596_v53  ;;  %v3907_v53 = vld [vmem:[#allocation8] ss:$0 sm:$0xff] }
 0x157   : > { %917 = vmatmul.mubr.bf16.gmra.mxu0 %v595_v58  ;;  %v615_v58 = vpack.c.bf16 %v539_v52, %v537_v51  ;;  %v558_v51 = vld [vmem:[%s3779_s23 + $0x3c8] sm:$0xff]  ;;  %v560_v52 = vld [vmem:[%s3779_s23 + $0x3d8] sm:$0xff] }
 0x158   : > { %924 = vmatprep.mubr.bf16.mxu0 %v598_v59 }
 0x15f   : > { %925 = vmatmul.mubr.bf16.gmra.mxu0 %v597_v0 }
 0x160   : > { %932 = vmatprep.mubr.bf16.mxu0 %v600_v1 }
 0x167   : > { %933 = vmatmul.mubr.bf16.gmra.mxu0 %v599_v6  ;;  %v546_v6 = vld [vmem:[%s3779_s23 + $0x368] sm:$0xff] }
 0x168   : > { %940 = vmatprep.mubr.bf16.mxu0 %v602_v7  ;;  %v548_v7 = vld [vmem:[%s3779_s23 + $0x378] sm:$0xff] }
 0x16f   : > { %941 = vmatmul.mubr.bf16.gmra.mxu0 %v601_v12 }
 0x170   : > { %948 = vmatprep.mubr.bf16.mxu0 %v604_v13  ;;  %v620_v13 = vpack.c.bf16 %v548_v7, %v546_v6 }
 0x177   : > { %949 = vmatmul.mubr.bf16.gmra.mxu0 %v603_v18  ;;  %v545_v18 = vld [vmem:[%s3779_s23 + $0x360] sm:$0xff] }
 0x178   : > { %956 = vmatprep.mubr.bf16.mxu0 %v606_v19  ;;  %v547_v19 = vld [vmem:[%s3779_s23 + $0x370] sm:$0xff] }
 0x17f   : > { %957 = vmatmul.mubr.bf16.gmra.mxu0 %v605_v24 }
 0x180   : > { %964 = vmatprep.mubr.bf16.mxu0 %v608_v25  ;;  %v619_v25 = vpack.c.bf16 %v547_v19, %v545_v18 }
 0x187   : > { %965 = vmatmul.mubr.bf16.gmra.mxu0 %v607_v30 }
 0x188   : > { %972 = vmatprep.mubr.bf16.mxu0 %v610_v31 }
 0x18f   : > { %973 = vmatmul.mubr.bf16.gmra.mxu0 %v609_v36  ;;  %v554_v36 = vld [vmem:[%s3779_s23 + $0x3a8] sm:$0xff] }
 0x190   : > { %980 = vmatprep.mubr.bf16.mxu0 %v612_v37  ;;  %v556_v37 = vld [vmem:[%s3779_s23 + $0x3b8] sm:$0xff] }
 0x197   : > { %981 = vmatmul.mubr.bf16.gmra.mxu0 %v611_v42 }
 0x198   : > { %988 = vmatprep.mubr.bf16.mxu0 %v614_v43  ;;  %v624_v43 = vpack.c.bf16 %v556_v37, %v554_v36 }
 0x19f   : > { %v798_v50 = vpop.f32.mrf.mxu0  ;;  %989 = vmatmul.mubr.bf16.gmra.mxu0 %v613_v48  ;;  %v553_v48 = vld [vmem:[%s3779_s23 + $0x3a0] sm:$0xff] }
 0x1a0   : > { %996 = vmatprep.mubr.bf16.mxu0 %v616_v49  ;;  %v799_v59 = vadd.f32 %v3907_v53, %v798_v50  ;;  %v555_v49 = vld [vmem:[%s3779_s23 + $0x3b0] sm:$0xff] }
 0x1a1   : > { %v800_v54 = vpop.f32.mrf.mxu0  ;;  %v623_v56 = vpack.c.bf16 %v555_v49, %v553_v48 }
 0x1a3   : > { %v801_v57 = vpop.f32.mrf.mxu0 }
 0x1a4   : > { %v802_v60 = vadd.f32 %v3907_v53, %v801_v57 }
 0x1a5   : > { %v803_v62 = vpop.f32.mrf.mxu0 }
 0x1a6   : > { %v1053_v0 = vpack.c.bf16 %v802_v60, %v799_v59  ;;  %v626_v59 = vpack.c.bf16 %v560_v52, %v558_v51 }
 0x1a7   : > { %v806_v1 = vpop.f32.mrf.mxu0  ;;  %997 = vmatmul.mubr.bf16.gmra.mxu0 %v615_v58 }
 0x1a8   : > { %vm1085_vm0 = vcmp.ge.bf16.partialorder %v1053_v0, 0  ;;  %v1121_v2 = vmul.bf16 %v3913_v63, %v1053_v0  ;;  %1004 = vmatprep.mubr.bf16.mxu0 %v618_v61  ;;  %v807_v11 = vadd.f32 %v3907_v53, %v806_v1  ;;  %v557_v1 = vld [vmem:[%s3779_s23 + $0x3c0] sm:$0xff] }
 0x1a9   : > { %v808_v5 = vpop.f32.mrf.mxu0 }
 0x1aa   : > { %v1153_v8 = vsel %vm1085_vm0, %v1053_v0, %v1121_v2  ;;  %v559_v2 = vld [vmem:[%s3779_s23 + $0x3d0] sm:$0xff]  ;;  %v564_v5 = vld [vmem:[%s3779_s23 + $0x3f8] sm:$0xff] }
 0x1ab   : > { %v809_v9 = vpop.f32.mrf.mxu0  ;;  %2993 = vmatprep.mubr.bf16.mxu1 %v1153_v8  ;;  %v625_v8 = vpack.c.bf16 %v559_v2, %v557_v1 }
 0x1ac   : > { %v810_v12 = vadd.f32 %v3907_v53, %v809_v9 }
 0x1ad   : > { %v811_v14 = vpop.f32.mrf.mxu0 }
 0x1ae   : > { %v1054_v15 = vpack.c.bf16 %v810_v12, %v807_v11  ;;  %v628_v11 = vpack.c.bf16 %v564_v5, %v562_v4 }
 0x1af   : > { %v814_v16 = vpop.f32.mrf.mxu0  ;;  %1005 = vmatmul.mubr.bf16.gmra.mxu0 %v617_v10 }
 0x1b0   : > { %vm1086_vm1 = vcmp.ge.bf16.partialorder %v1054_v15, 0  ;;  %v1122_v17 = vmul.bf16 %v3913_v63, %v1054_v15  ;;  %1012 = vmatprep.mubr.bf16.mxu0 %v620_v13  ;;  %v815_v26 = vadd.f32 %v3907_v53, %v814_v16  ;;  %v561_v16 = vld [vmem:[%s3779_s23 + $0x3e0] sm:$0xff] }
 0x1b1   : > { %v816_v20 = vpop.f32.mrf.mxu0 }
 0x1b2   : > { %v1154_v23 = vsel %vm1086_vm1, %v1054_v15, %v1122_v17  ;;  %v563_v17 = vld [vmem:[%s3779_s23 + $0x3f0] sm:$0xff] }
 0x1b3   : > { %v817_v24 = vpop.f32.mrf.mxu0  ;;  %2994 = vmatmul.mubr.bf16.vlgmr.msra.gmra.mxu1 %v1154_v23  ;;  %v627_v21 = vpack.c.bf16 %v563_v17, %v561_v16 }
 0x1b4   : > { %v818_v27 = vadd.f32 %v3907_v53, %v817_v24 }
 0x1b5   : > { %v819_v29 = vpop.f32.mrf.mxu0 }
 0x1b6   : > { %v1055_v30 = vpack.c.bf16 %v818_v27, %v815_v26 }
 0x1b7   : > { %v822_v31 = vpop.f32.mrf.mxu0  ;;  %1013 = vmatmul.mubr.bf16.gmra.mxu0 %v619_v25 }
 0x1b8   : > { %vm1087_vm2 = vcmp.ge.bf16.partialorder %v1055_v30, 0  ;;  %v1123_v32 = vmul.bf16 %v3913_v63, %v1055_v30  ;;  %1020 = vmatprep.mubr.bf16.mxu0 %v622_v28  ;;  %v823_v41 = vadd.f32 %v3907_v53, %v822_v31 }
 0x1b9   : > { %v824_v35 = vpop.f32.mrf.mxu0 }
 0x1ba   : > { %v1155_v38 = vsel %vm1087_vm2, %v1055_v30, %v1123_v32 }
 0x1bb   : > { %v825_v39 = vpop.f32.mrf.mxu0  ;;  %2997 = vmatprep.mubr.bf16.mxu1 %v1155_v38 }
 0x1bc   : > { %v826_v42 = vadd.f32 %v3907_v53, %v825_v39 }
 0x1bd   : > { %v827_v44 = vpop.f32.mrf.mxu0 }
 0x1be   : > { %v1056_v45 = vpack.c.bf16 %v826_v42, %v823_v41 }
 0x1bf   : > { %v830_v46 = vpop.f32.mrf.mxu0  ;;  %1021 = vmatmul.mubr.bf16.gmra.mxu0 %v621_v40 }
 0x1c0   : > { %vm1088_vm3 = vcmp.ge.bf16.partialorder %v1056_v45, 0  ;;  %v1124_v47 = vmul.bf16 %v3913_v63, %v1056_v45  ;;  %1028 = vmatprep.mubr.bf16.mxu0 %v624_v43  ;;  %v831_v57 = vadd.f32 %v3907_v53, %v830_v46 }
 0x1c1   : > { %v832_v50 = vpop.f32.mrf.mxu0 }
 0x1c2   : > { %v1156_v54 = vsel %vm1088_vm3, %v1056_v45, %v1124_v47 }
 0x1c3   : > { %v833_v55 = vpop.f32.mrf.mxu0  ;;  %2998 = vmatmul.mubr.bf16.gmra.mxu1 %v1156_v54 }
 0x1c4   : > { %v834_v58 = vadd.f32 %v3907_v53, %v833_v55 }
 0x1c5   : > { %v835_v60 = vpop.f32.mrf.mxu0 }
 0x1c6   : > { %v1057_v61 = vpack.c.bf16 %v834_v58, %v831_v57 }
 0x1c7   : > { %v838_v62 = vpop.f32.mrf.mxu0  ;;  %1029 = vmatmul.mubr.bf16.gmra.mxu0 %v623_v56 }
 0x1c8   : > { %vm1089_vm4 = vcmp.ge.bf16.partialorder %v1057_v61, 0  ;;  %v1125_v0 = vmul.bf16 %v3913_v63, %v1057_v61  ;;  %1036 = vmatprep.mubr.bf16.mxu0 %v626_v59  ;;  %v839_v9 = vadd.f32 %v3907_v53, %v838_v62 }
 0x1c9   : > { %v840_v3 = vpop.f32.mrf.mxu0 }
 0x1ca   : > { %v1157_v6 = vsel %vm1089_vm4, %v1057_v61, %v1125_v0 }
 0x1cb   : > { %v841_v7 = vpop.f32.mrf.mxu0  ;;  %3001 = vmatprep.mubr.bf16.mxu1 %v1157_v6 }
 0x1cc   : > { %v842_v10 = vadd.f32 %v3907_v53, %v841_v7  ;;  %v3268_v7 = vld [vmem:[#allocation12 + $0x38] sm:$0xff]  }
 0x1cd   : > { %v843_v12 = vpop.f32.mrf.mxu0  ;;  %3057 = vmatprep.subr.bf16.mxu1 %v3268_v7 }
 0x1ce   : > { %v1058_v13 = vpack.c.bf16 %v842_v10, %v839_v9  ;;  %3058 = vmatpush3.bf16.msra.mxu1 %v3268_v7 }
 0x1cf   : > { %v846_v14 = vpop.f32.mrf.mxu0  ;;  %1037 = vmatmul.mubr.bf16.gmra.mxu0 %v625_v8 }
 0x1d0   : > { %vm1090_vm5 = vcmp.ge.bf16.partialorder %v1058_v13, 0  ;;  %v1126_v15 = vmul.bf16 %v3913_v63, %v1058_v13  ;;  %1044 = vmatprep.mubr.bf16.mxu0 %v628_v11  ;;  %v847_v22 = vadd.f32 %v3907_v53, %v846_v14 }
 0x1d1   : > { %v848_v18 = vpop.f32.mrf.mxu0 }
 0x1d2   : > { %v1158_v19 = vsel %vm1090_vm5, %v1058_v13, %v1126_v15 }
 0x1d3   : > { %v849_v20 = vpop.f32.mrf.mxu0  ;;  %3002 = vmatmul.mubr.bf16.gmra.mxu1 %v1158_v19 }
 0x1d4   : > { %v850_v23 = vadd.f32 %v3907_v53, %v849_v20 }
 0x1d5   : > { %v851_v24 = vpop.f32.mrf.mxu0 }
 0x1d6   : > { %v1059_v25 = vpack.c.bf16 %v850_v23, %v847_v22 }
 0x1d7   : > { %v854_v26 = vpop.f32.mrf.mxu0  ;;  %1045 = vmatmul.mubr.bf16.gmra.mxu0 %v627_v21 }
 0x1d8   : > { %vm1091_vm6 = vcmp.ge.bf16.partialorder %v1059_v25, 0  ;;  %v1127_v27 = vmul.bf16 %v3913_v63, %v1059_v25  ;;  %v855_v31 = vadd.f32 %v3907_v53, %v854_v26  ;;  %v3269_v26 = vld [vmem:[#allocation12 + $0x30] sm:$0xff]  }
 0x1d9   : > { %v856_v28 = vpop.f32.mrf.mxu0  ;;  %3059 = vmatprep.subr.bf16.mxu1 %v3269_v26 }
 0x1da   : > { %v1159_v29 = vsel %vm1091_vm6, %v1059_v25, %v1127_v27  ;;  %3060 = vmatpush3.bf16.msra.mxu1 %v3269_v26 }
 0x1db   : > { %v857_v30 = vpop.f32.mrf.mxu0  ;;  %3005 = vmatprep.mubr.bf16.mxu1 %v1159_v29 }
 0x1dc   : > { %v858_v32 = vadd.f32 %v3907_v53, %v857_v30 }
 0x1dd   : > { %v859_v33 = vpop.f32.mrf.mxu0 }
 0x1de   : > { %v1060_v34 = vpack.c.bf16 %v858_v32, %v855_v31  ;;  %v3270_v32 = vld [vmem:[#allocation12 + $0x28] sm:$0xff]  }
 0x1df   : > { %v862_v35 = vpop.f32.mrf.mxu0  ;;  %3061 = vmatprep.subr.bf16.mxu1 %v3270_v32 }
 0x1e0   : > { %vm1092_vm7 = vcmp.ge.bf16.partialorder %v1060_v34, 0  ;;  %v1128_v36 = vmul.bf16 %v3913_v63, %v1060_v34  ;;  %v863_v40 = vadd.f32 %v3907_v53, %v862_v35  ;;  %3062 = vmatpush3.bf16.msra.mxu1 %v3270_v32 }
 0x1e1   : > { %v864_v37 = vpop.f32.mrf.mxu0 }
 0x1e2   : > { %v1160_v38 = vsel %vm1092_vm7, %v1060_v34, %v1128_v36 }
 0x1e3   : > { %v865_v39 = vpop.f32.mrf.mxu0  ;;  %3006 = vmatmul.mubr.bf16.gmra.mxu1 %v1160_v38  ;;  %v3271_v38 = vld [vmem:[#allocation12 + $0x20] sm:$0xff]  }
 0x1e4   : > { %v866_v41 = vadd.f32 %v3907_v53, %v865_v39  ;;  %3063 = vmatprep.subr.bf16.mxu1 %v3271_v38 }
 0x1e5   : > { %v867_v42 = vpop.f32.mrf.mxu0  ;;  %3064 = vmatpush3.bf16.msra.mxu1 %v3271_v38 }
 0x1e6   : > { %v1061_v43 = vpack.c.bf16 %v866_v41, %v863_v40 }
 0x1e7   : > { %v870_v44 = vpop.f32.mrf.mxu0 }
 0x1e8   : > { %vm1093_vm8 = vcmp.ge.bf16.partialorder %v1061_v43, 0  ;;  %v1129_v45 = vmul.bf16 %v3913_v63, %v1061_v43  ;;  %v871_v49 = vadd.f32 %v3907_v53, %v870_v44 }
 0x1e9   : > { %v872_v46 = vpop.f32.mrf.mxu0 }
 0x1ea   : > { %v1161_v47 = vsel %vm1093_vm8, %v1061_v43, %v1129_v45  ;;  %v3272_v43 = vld [vmem:[#allocation12 + $0x18] sm:$0xff]  }
 0x1eb   : > { %v873_v48 = vpop.f32.mrf.mxu0  ;;  %3009 = vmatprep.mubr.bf16.mxu1 %v1161_v47  ;;  %3065 = vmatprep.subr.bf16.mxu1 %v3272_v43 }
 0x1ec   : > { %v874_v50 = vadd.f32 %v3907_v53, %v873_v48  ;;  %3066 = vmatpush3.bf16.msra.mxu1 %v3272_v43 }
 0x1ed   : > { %v875_v51 = vpop.f32.mrf.mxu0 }
 0x1ee   : > { %v1062_v52 = vpack.c.bf16 %v874_v50, %v871_v49  ;;  %v3273_v49 = vld [vmem:[#allocation12 + $0x10] sm:$0xff]  }
 0x1ef   : > { %v878_v54 = vpop.f32.mrf.mxu0  ;;  %3067 = vmatprep.subr.bf16.mxu1 %v3273_v49 }
 0x1f0   : > { %vm1094_vm9 = vcmp.ge.bf16.partialorder %v1062_v52, 0  ;;  %v1130_v55 = vmul.bf16 %v3913_v63, %v1062_v52  ;;  %v879_v59 = vadd.f32 %v3907_v53, %v878_v54  ;;  %3068 = vmatpush3.bf16.msra.mxu1 %v3273_v49 }
 0x1f1   : > { %v880_v56 = vpop.f32.mrf.mxu0 }
 0x1f2   : > { %v1162_v57 = vsel %vm1094_vm9, %v1062_v52, %v1130_v55  ;;  %v3274_v55 = vld [vmem:[#allocation12 + $0x8] sm:$0xff]  }
 0x1f3   : > { %v881_v58 = vpop.f32.mrf.mxu0  ;;  %3010 = vmatmul.mubr.bf16.gmra.mxu1 %v1162_v57  ;;  %3069 = vmatprep.subr.bf16.mxu1 %v3274_v55 }
 0x1f4   : > { %v882_v60 = vadd.f32 %v3907_v53, %v881_v58  ;;  %3070 = vmatpush3.bf16.msra.mxu1 %v3274_v55 }
 0x1f5   : > { %v883_v61 = vpop.f32.mrf.mxu0 }
 0x1f6   : > { %v1063_v62 = vpack.c.bf16 %v882_v60, %v879_v59  ;;  %v3275_v61 = vld [vmem:[#allocation12] sm:$0xff]  }
 0x1f7   : > { %v886_v0 = vpop.f32.mrf.mxu0  ;;  %3071 = vmatprep.subr.bf16.mxu1 %v3275_v61 }
 0x1f8   : > { %vm1095_vm10 = vcmp.ge.bf16.partialorder %v1063_v62, 0  ;;  %v1131_v1 = vmul.bf16 %v3913_v63, %v1063_v62  ;;  %v887_v5 = vadd.f32 %v3907_v53, %v886_v0  ;;  %3072 = vmatpush3.bf16.msra.mxu1 %v3275_v61 }
 0x1f9   : > { %v888_v2 = vpop.f32.mrf.mxu0 }
 0x1fa   : > { %v1163_v3 = vsel %vm1095_vm10, %v1063_v62, %v1131_v1 }
 0x1fb   : > { %v889_v4 = vpop.f32.mrf.mxu0  ;;  %3013 = vmatprep.mubr.bf16.mxu1 %v1163_v3 }
 0x1fc   : > { %v890_v6 = vadd.f32 %v3907_v53, %v889_v4 }
 0x1fd   : > { %v891_v8 = vpop.f32.mrf.mxu0 }
 0x1fe   : > { %v1064_v9 = vpack.c.bf16 %v890_v6, %v887_v5 }
 0x1ff   : > { %v894_v10 = vpop.f32.mrf.mxu0 }
 0x200   : > { %vm1096_vm11 = vcmp.ge.bf16.partialorder %v1064_v9, 0  ;;  %v1132_v11 = vmul.bf16 %v3913_v63, %v1064_v9  ;;  %v895_v15 = vadd.f32 %v3907_v53, %v894_v10 }
 0x201   : > { %v896_v12 = vpop.f32.mrf.mxu0 }
 0x202   : > { %v1164_v13 = vsel %vm1096_vm11, %v1064_v9, %v1132_v11 }
 0x203   : > { %v897_v14 = vpop.f32.mrf.mxu0  ;;  %3014 = vmatmul.mubr.bf16.gmra.mxu1 %v1164_v13 }
 0x204   : > { %v898_v16 = vadd.f32 %v3907_v53, %v897_v14 }
 0x205   : > { %v899_v17 = vpop.f32.mrf.mxu0 }
 0x206   : > { %v1065_v18 = vpack.c.bf16 %v898_v16, %v895_v15 }
 0x207   : > { %v902_v19 = vpop.f32.mrf.mxu0 }
 0x208   : > { %vm1097_vm12 = vcmp.ge.bf16.partialorder %v1065_v18, 0  ;;  %v1133_v20 = vmul.bf16 %v3913_v63, %v1065_v18  ;;  %v903_v24 = vadd.f32 %v3907_v53, %v902_v19 }
 0x209   : > { %v904_v21 = vpop.f32.mrf.mxu0 }
 0x20a   : > { %v1165_v22 = vsel %vm1097_vm12, %v1065_v18, %v1133_v20 }
 0x20b   : > { %v905_v23 = vpop.f32.mrf.mxu0  ;;  %3017 = vmatprep.mubr.bf16.mxu1 %v1165_v22 }
 0x20c   : > { %v906_v25 = vadd.f32 %v3907_v53, %v905_v23 }
 0x20d   : > { %v907_v27 = vpop.f32.mrf.mxu0 }
 0x20e   : > { %v1066_v28 = vpack.c.bf16 %v906_v25, %v903_v24 }
 0x20f   : > { %v910_v29 = vpop.f32.mrf.mxu0 }
 0x210   : > { %vm1098_vm13 = vcmp.ge.bf16.partialorder %v1066_v28, 0  ;;  %v1134_v30 = vmul.bf16 %v3913_v63, %v1066_v28  ;;  %v911_v35 = vadd.f32 %v3907_v53, %v910_v29 }
 0x211   : > { %v912_v31 = vpop.f32.mrf.mxu0 }
 0x212   : > { %v1166_v33 = vsel %vm1098_vm13, %v1066_v28, %v1134_v30 }
 0x213   : > { %v913_v34 = vpop.f32.mrf.mxu0  ;;  %3018 = vmatmul.mubr.bf16.gmra.mxu1 %v1166_v33 }
 0x214   : > { %v914_v36 = vadd.f32 %v3907_v53, %v913_v34 }
 0x215   : > { %v915_v37 = vpop.f32.mrf.mxu0 }
 0x216   : > { %v1067_v39 = vpack.c.bf16 %v914_v36, %v911_v35 }
 0x217   : > { %v918_v40 = vpop.f32.mrf.mxu0 }
 0x218   : > { %vm1099_vm14 = vcmp.ge.bf16.partialorder %v1067_v39, 0  ;;  %v1135_v41 = vmul.bf16 %v3913_v63, %v1067_v39  ;;  %v919_v46 = vadd.f32 %v3907_v53, %v918_v40 }
 0x219   : > { %v920_v42 = vpop.f32.mrf.mxu0 }
 0x21a   : > { %v1167_v44 = vsel %vm1099_vm14, %v1067_v39, %v1135_v41 }
 0x21b   : > { %v921_v45 = vpop.f32.mrf.mxu0  ;;  %3021 = vmatprep.mubr.bf16.mxu1 %v1167_v44 }
 0x21c   : > { %v922_v47 = vadd.f32 %v3907_v53, %v921_v45 }
 0x21d   : > { %v923_v48 = vpop.f32.mrf.mxu0 }
 0x21e   : > { %v1068_v50 = vpack.c.bf16 %v922_v47, %v919_v46 }
 0x21f   : > { %v926_v51 = vpop.f32.mrf.mxu0 }
 0x220   : > { %vm1100_vm15 = vcmp.ge.bf16.partialorder %v1068_v50, 0  ;;  %v1136_v52 = vmul.bf16 %v3913_v63, %v1068_v50  ;;  %v927_v58 = vadd.f32 %v3907_v53, %v926_v51 }
 0x221   : > { %v928_v54 = vpop.f32.mrf.mxu0 }
 0x222   : > { %v1168_v56 = vsel %vm1100_vm15, %v1068_v50, %v1136_v52 }
 0x223   : > { %v929_v57 = vpop.f32.mrf.mxu0  ;;  %3022 = vmatmul.mubr.bf16.gmra.mxu1 %v1168_v56 }
 0x224   : > { %v930_v59 = vadd.f32 %v3907_v53, %v929_v57 }
 0x225   : > { %v931_v60 = vpop.f32.mrf.mxu0 }
 0x226   : > { %v1069_v62 = vpack.c.bf16 %v930_v59, %v927_v58 }
 0x227   : > { %v934_v0 = vpop.f32.mrf.mxu0 }
 0x228   : > { %vm1101_vm0 = vcmp.ge.bf16.partialorder %v1069_v62, 0  ;;  %v1137_v1 = vmul.bf16 %v3913_v63, %v1069_v62  ;;  %v935_v5 = vadd.f32 %v3907_v53, %v934_v0 }
 0x229   : > { %v936_v2 = vpop.f32.mrf.mxu0 }
 0x22a   : > { %v1169_v3 = vsel %vm1101_vm0, %v1069_v62, %v1137_v1 }
 0x22b   : > { %v937_v4 = vpop.f32.mrf.mxu0  ;;  %3025 = vmatprep.mubr.bf16.mxu1 %v1169_v3 }
 0x22c   : > { %v938_v6 = vadd.f32 %v3907_v53, %v937_v4 }
 0x22d   : > { %v939_v7 = vpop.f32.mrf.mxu0 }
 0x22e   : > { %v1070_v8 = vpack.c.bf16 %v938_v6, %v935_v5 }
 0x22f   : > { %v942_v9 = vpop.f32.mrf.mxu0 }
 0x230   : > { %vm1102_vm1 = vcmp.ge.bf16.partialorder %v1070_v8, 0  ;;  %v1138_v10 = vmul.bf16 %v3913_v63, %v1070_v8  ;;  %v943_v14 = vadd.f32 %v3907_v53, %v942_v9 }
 0x231   : > { %v944_v11 = vpop.f32.mrf.mxu0 }
 0x232   : > { %v1170_v12 = vsel %vm1102_vm1, %v1070_v8, %v1138_v10 }
 0x233   : > { %v945_v13 = vpop.f32.mrf.mxu0  ;;  %3026 = vmatmul.mubr.bf16.gmra.mxu1 %v1170_v12 }
 0x234   : > { %v946_v15 = vadd.f32 %v3907_v53, %v945_v13 }
 0x235   : > { %v947_v16 = vpop.f32.mrf.mxu0 }
 0x236   : > { %v1071_v17 = vpack.c.bf16 %v946_v15, %v943_v14 }
 0x237   : > { %v950_v18 = vpop.f32.mrf.mxu0 }
 0x238   : > { %vm1103_vm2 = vcmp.ge.bf16.partialorder %v1071_v17, 0  ;;  %v1139_v19 = vmul.bf16 %v3913_v63, %v1071_v17  ;;  %v951_v23 = vadd.f32 %v3907_v53, %v950_v18 }
 0x239   : > { %v952_v20 = vpop.f32.mrf.mxu0 }
 0x23a   : > { %v1171_v21 = vsel %vm1103_vm2, %v1071_v17, %v1139_v19 }
 0x23b   : > { %v953_v22 = vpop.f32.mrf.mxu0  ;;  %3029 = vmatprep.mubr.bf16.mxu1 %v1171_v21 }
 0x23c   : > { %v954_v24 = vadd.f32 %v3907_v53, %v953_v22 }
 0x23d   : > { %v955_v25 = vpop.f32.mrf.mxu0 }
 0x23e   : > { %v1072_v26 = vpack.c.bf16 %v954_v24, %v951_v23 }
 0x23f   : > { %v958_v27 = vpop.f32.mrf.mxu0 }
 0x240   : > { %vm1104_vm3 = vcmp.ge.bf16.partialorder %v1072_v26, 0  ;;  %v1140_v28 = vmul.bf16 %v3913_v63, %v1072_v26  ;;  %v959_v32 = vadd.f32 %v3907_v53, %v958_v27 }
 0x241   : > { %v960_v29 = vpop.f32.mrf.mxu0 }
 0x242   : > { %v1172_v30 = vsel %vm1104_vm3, %v1072_v26, %v1140_v28 }
 0x243   : > { %v961_v31 = vpop.f32.mrf.mxu0  ;;  %3030 = vmatmul.mubr.bf16.gmra.mxu1 %v1172_v30 }
 0x244   : > { %v962_v33 = vadd.f32 %v3907_v53, %v961_v31 }
 0x245   : > { %v963_v34 = vpop.f32.mrf.mxu0 }
 0x246   : > { %v1073_v35 = vpack.c.bf16 %v962_v33, %v959_v32 }
 0x247   : > { %v966_v36 = vpop.f32.mrf.mxu0 }
 0x248   : > { %vm1105_vm4 = vcmp.ge.bf16.partialorder %v1073_v35, 0  ;;  %v1141_v37 = vmul.bf16 %v3913_v63, %v1073_v35  ;;  %v967_v41 = vadd.f32 %v3907_v53, %v966_v36 }
 0x249   : > { %v968_v38 = vpop.f32.mrf.mxu0 }
 0x24a   : > { %v1173_v39 = vsel %vm1105_vm4, %v1073_v35, %v1141_v37 }
 0x24b   : > { %v969_v40 = vpop.f32.mrf.mxu0  ;;  %3033 = vmatprep.mubr.bf16.mxu1 %v1173_v39 }
 0x24c   : > { %v970_v42 = vadd.f32 %v3907_v53, %v969_v40 }
 0x24d   : > { %v971_v43 = vpop.f32.mrf.mxu0 }
 0x24e   : > { %v1074_v44 = vpack.c.bf16 %v970_v42, %v967_v41 }
 0x24f   : > { %v974_v45 = vpop.f32.mrf.mxu0 }
 0x250   : > { %vm1106_vm5 = vcmp.ge.bf16.partialorder %v1074_v44, 0  ;;  %v1142_v46 = vmul.bf16 %v3913_v63, %v1074_v44  ;;  %v975_v50 = vadd.f32 %v3907_v53, %v974_v45 }
 0x251   : > { %v976_v47 = vpop.f32.mrf.mxu0 }
 0x252   : > { %v1174_v48 = vsel %vm1106_vm5, %v1074_v44, %v1142_v46 }
 0x253   : > { %v977_v49 = vpop.f32.mrf.mxu0  ;;  %3034 = vmatmul.mubr.bf16.gmra.mxu1 %v1174_v48 }
 0x254   : > { %v978_v51 = vadd.f32 %v3907_v53, %v977_v49 }
 0x255   : > { %v979_v52 = vpop.f32.mrf.mxu0 }
 0x256   : > { %v1075_v54 = vpack.c.bf16 %v978_v51, %v975_v50 }
 0x257   : > { %v982_v55 = vpop.f32.mrf.mxu0 }
 0x258   : > { %vm1107_vm6 = vcmp.ge.bf16.partialorder %v1075_v54, 0  ;;  %v1143_v56 = vmul.bf16 %v3913_v63, %v1075_v54  ;;  %v983_v60 = vadd.f32 %v3907_v53, %v982_v55 }
 0x259   : > { %v984_v57 = vpop.f32.mrf.mxu0 }
 0x25a   : > { %v1175_v58 = vsel %vm1107_vm6, %v1075_v54, %v1143_v56 }
 0x25b   : > { %v985_v59 = vpop.f32.mrf.mxu0  ;;  %3037 = vmatprep.mubr.bf16.mxu1 %v1175_v58 }
 0x25c   : > { %v986_v61 = vadd.f32 %v3907_v53, %v985_v59 }
 0x25d   : > { %v987_v62 = vpop.f32.mrf.mxu0 }
 0x25e   : > { %v1076_v0 = vpack.c.bf16 %v986_v61, %v983_v60 }
 0x25f   : > { %v990_v1 = vpop.f32.mrf.mxu0 }
 0x260   : > { %vm1108_vm7 = vcmp.ge.bf16.partialorder %v1076_v0, 0  ;;  %v1144_v2 = vmul.bf16 %v3913_v63, %v1076_v0  ;;  %v991_v6 = vadd.f32 %v3907_v53, %v990_v1 }
 0x261   : > { %v992_v3 = vpop.f32.mrf.mxu0 }
 0x262   : > { %v1176_v4 = vsel %vm1108_vm7, %v1076_v0, %v1144_v2 }
 0x263   : > { %v993_v5 = vpop.f32.mrf.mxu0  ;;  %3038 = vmatmul.mubr.bf16.gmra.mxu1 %v1176_v4 }
 0x264   : > { %v994_v7 = vadd.f32 %v3907_v53, %v993_v5 }
 0x265   : > { %v995_v8 = vpop.f32.mrf.mxu0 }
 0x266   : > { %v1077_v9 = vpack.c.bf16 %v994_v7, %v991_v6 }
 0x267   : > { %v998_v10 = vpop.f32.mrf.mxu0 }
 0x268   : > { %vm1109_vm8 = vcmp.ge.bf16.partialorder %v1077_v9, 0  ;;  %v1145_v11 = vmul.bf16 %v3913_v63, %v1077_v9  ;;  %v999_v15 = vadd.f32 %v3907_v53, %v998_v10  ;;  %v4031_v10 = vld [vmem:[#allocation11] ss:$0 sm:$0xff] }
 0x269   : > { %v1000_v12 = vpop.f32.mrf.mxu0 }
 0x26a   : > { %v1177_v13 = vsel %vm1109_vm8, %v1077_v9, %v1145_v11 }
 0x26b   : > { %v1001_v14 = vpop.f32.mrf.mxu0  ;;  %3041 = vmatprep.mubr.bf16.mxu1 %v1177_v13 }
 0x26c   : > { %v1002_v16 = vadd.f32 %v3907_v53, %v1001_v14 }
 0x26d   : > { %v1003_v17 = vpop.f32.mrf.mxu0 }
 0x26e   : > { %v1078_v18 = vpack.c.bf16 %v1002_v16, %v999_v15 }
 0x26f   : > { %v1006_v19 = vpop.f32.mrf.mxu0 }
 0x270   : > { %vm1110_vm9 = vcmp.ge.bf16.partialorder %v1078_v18, 0  ;;  %v1146_v20 = vmul.bf16 %v3913_v63, %v1078_v18  ;;  %v1007_v24 = vadd.f32 %v3907_v53, %v1006_v19 }
 0x271   : > { %v1008_v21 = vpop.f32.mrf.mxu0 }
 0x272   : > { %v1178_v22 = vsel %vm1110_vm9, %v1078_v18, %v1146_v20 }
 0x273   : > { %v1009_v23 = vpop.f32.mrf.mxu0  ;;  %3042 = vmatmul.mubr.bf16.gmra.mxu1 %v1178_v22  ;;  %v4016_v30 = vpop.f32.mrf.mxu1 }
 0x274   : > { %v1010_v25 = vadd.f32 %v3907_v53, %v1009_v23 }
 0x275   : > { %v1011_v26 = vpop.f32.mrf.mxu0  ;;  %v1290_v36 = vpop.f32.mrf.mxu1 }
 0x276   : > { %v1079_v27 = vpack.c.bf16 %v1010_v25, %v1007_v24  ;;  %v1291_v15 = vadd.f32 %v4031_v10, %v1290_v36 }
 0x277   : > { %v1014_v28 = vpop.f32.mrf.mxu0  ;;  %v2996_v41 = vpop.f32.mrf.mxu1 }
 0x278   : > { %vm1111_vm10 = vcmp.ge.bf16.partialorder %v1079_v27, 0  ;;  %v1147_v29 = vmul.bf16 %v3913_v63, %v1079_v27  ;;  %v1015_v34 = vadd.f32 %v3907_v53, %v1014_v28  ;;  %v1302_v25 = vadd.f32 %v2996_v41, %v4031_v10 }
 0x279   : > { %v1016_v31 = vpop.f32.mrf.mxu0  ;;  %v1293_v47 = vpop.f32.mrf.mxu1 }
 0x27a   : > { %v1179_v32 = vsel %vm1111_vm10, %v1079_v27, %v1147_v29  ;;  %v1294_v12 = vadd.f32 %v4031_v10, %v1293_v47  ;;  %v1299_v29 = vadd.f32 %v4016_v30, %v4031_v10 }
 0x27b   : > { %v1017_v33 = vpop.f32.mrf.mxu0  ;;  %3045 = vmatprep.mubr.bf16.mxu1 %v1179_v32 }
 0x27c   : > { %v1018_v35 = vadd.f32 %v3907_v53, %v1017_v33  ;;  %v1545_v19 = vpack.c.bf16 %v1294_v12, %v1291_v15 }
 0x27d   : > { %v1019_v37 = vpop.f32.mrf.mxu0 }
 0x27e   : > { %v1080_v38 = vpack.c.bf16 %v1018_v35, %v1015_v34  ;;  %v1609_v28 = vmul.bf16 %v1545_v19, %v3913_v63  ;;  %vm1577_vm0 = vcmp.ge.bf16.partialorder %v1545_v19, 0 }
 0x27f   : > { %v1022_v39 = vpop.f32.mrf.mxu0 }
 0x280   : > { %vm1112_vm11 = vcmp.ge.bf16.partialorder %v1080_v38, 0  ;;  %v1148_v40 = vmul.bf16 %v3913_v63, %v1080_v38  ;;  %v1023_v45 = vadd.f32 %v3907_v53, %v1022_v39  ;;  %v1641_v37 = vsel %vm1577_vm0, %v1545_v19, %v1609_v28 }
 0x281   : > { %v1024_v42 = vpop.f32.mrf.mxu0 }
 0x282   : > { %v1180_v43 = vsel %vm1112_vm11, %v1080_v38, %v1148_v40 }
 0x283   : > { %v1025_v44 = vpop.f32.mrf.mxu0  ;;  %3046 = vmatmul.mubr.bf16.gmra.mxu1 %v1180_v43  ;;  %v4023_v50 = vpop.f32.mrf.mxu1 }
 0x284   : > { %v1026_v46 = vadd.f32 %v3907_v53, %v1025_v44  ;;  %v1315_v42 = vadd.f32 %v4023_v50, %v4031_v10 }
 0x285   : > { %v1027_v48 = vpop.f32.mrf.mxu0  ;;  %v1306_v56 = vpop.f32.mrf.mxu1 }
 0x286   : > { %v1081_v49 = vpack.c.bf16 %v1026_v46, %v1023_v45  ;;  %v1307_v32 = vadd.f32 %v4031_v10, %v1306_v56 }
 0x287   : > { %v1030_v51 = vpop.f32.mrf.mxu0  ;;  %v3000_v62 = vpop.f32.mrf.mxu1 }
 0x288   : > { %vm1113_vm12 = vcmp.ge.bf16.partialorder %v1081_v49, 0  ;;  %v1149_v52 = vmul.bf16 %v3913_v63, %v1081_v49  ;;  %v1031_v58 = vadd.f32 %v3907_v53, %v1030_v51  ;;  %v1318_v40 = vadd.f32 %v3000_v62, %v4031_v10 }
 0x289   : > { %v1032_v54 = vpop.f32.mrf.mxu0  ;;  %v1309_v4 = vpop.f32.mrf.mxu1 }
 0x28a   : > { %v1181_v55 = vsel %vm1113_vm12, %v1081_v49, %v1149_v52  ;;  %v1310_v27 = vadd.f32 %v4031_v10, %v1309_v4  ;;  %v1548_v45 = vpack.c.bf16 %v1318_v40, %v1315_v42 }
 0x28b   : > { %v1033_v57 = vpop.f32.mrf.mxu0  ;;  %3049 = vmatprep.mubr.bf16.mxu1 %v1181_v55 }
 0x28c   : > { %v1034_v59 = vadd.f32 %v3907_v53, %v1033_v57  ;;  %v1547_v35 = vpack.c.bf16 %v1310_v27, %v1307_v32  ;;  %v1612_v52 = vmul.bf16 %v1548_v45, %v3913_v63  ;;  %vm1580_vm3 = vcmp.ge.bf16.partialorder %v1548_v45, 0 }
 0x28d   : > { %v1035_v60 = vpop.f32.mrf.mxu0 }
 0x28e   : > { %v1082_v61 = vpack.c.bf16 %v1034_v59, %v1031_v58  ;;  %v1611_v41 = vmul.bf16 %v1547_v35, %v3913_v63  ;;  %vm1579_vm2 = vcmp.ge.bf16.partialorder %v1547_v35, 0  ;;  %v1644_v58 = vsel %vm1580_vm3, %v1548_v45, %v1612_v52 }
 0x28f   : > { %v1038_v0 = vpop.f32.mrf.mxu0 }
 0x290   : > { %vm1114_vm13 = vcmp.ge.bf16.partialorder %v1082_v61, 0  ;;  %v1150_v1 = vmul.bf16 %v3913_v63, %v1082_v61  ;;  %v1039_v6 = vadd.f32 %v3907_v53, %v1038_v0  ;;  %v1643_v48 = vsel %vm1579_vm2, %v1547_v35, %v1611_v41 }
 0x291   : > { %v1040_v2 = vpop.f32.mrf.mxu0 }
 0x292   : > { %v1182_v3 = vsel %vm1114_vm13, %v1082_v61, %v1150_v1 }
 0x293   : > { %v1041_v5 = vpop.f32.mrf.mxu0  ;;  %3050 = vmatmul.mubr.bf16.gmra.mxu1 %v1182_v3  ;;  %v3003_v8 = vpop.f32.mrf.mxu1 }
 0x294   : > { %v1042_v7 = vadd.f32 %v3907_v53, %v1041_v5  ;;  %v1331_v55 = vadd.f32 %v3003_v8, %v4031_v10 }
 0x295   : > { %v1043_v9 = vpop.f32.mrf.mxu0  ;;  %v1322_v16 = vpop.f32.mrf.mxu1 }
 0x296   : > { %v1083_v11 = vpack.c.bf16 %v1042_v7, %v1039_v6  ;;  %v1323_v44 = vadd.f32 %v4031_v10, %v1322_v16 }
 0x297   : > { %v1046_v13 = vpop.f32.mrf.mxu0  ;;  %v3004_v23 = vpop.f32.mrf.mxu1 }
 0x298   : > { %vm1115_vm14 = vcmp.ge.bf16.partialorder %v1083_v11, 0  ;;  %v1151_v14 = vmul.bf16 %v3913_v63, %v1083_v11  ;;  %v1047_v21 = vadd.f32 %v3907_v53, %v1046_v13  ;;  %v1334_v51 = vadd.f32 %v3004_v23, %v4031_v10 }
 0x299   : > { %v1048_v17 = vpop.f32.mrf.mxu0  ;;  %v1325_v33 = vpop.f32.mrf.mxu1 }
 0x29a   : > { %v1183_v18 = vsel %vm1115_vm14, %v1083_v11, %v1151_v14  ;;  %v1326_v30 = vadd.f32 %v4031_v10, %v1325_v33  ;;  %v1550_v57 = vpack.c.bf16 %v1334_v51, %v1331_v55 }
 0x29b   : > { %v1049_v20 = vpop.f32.mrf.mxu0  ;;  %3053 = vmatprep.mubr.bf16.mxu1 %v1183_v18 }
 0x29c   : > { %v1050_v22 = vadd.f32 %v3907_v53, %v1049_v20  ;;  %v1546_v53 = vpack.c.bf16 %v1302_v25, %v1299_v29  ;;  %v1549_v47 = vpack.c.bf16 %v1326_v30, %v1323_v44  ;;  %v1614_v1 = vmul.bf16 %v1550_v57, %v3913_v63 }
 0x29d   : > { %v1051_v24 = vpop.f32.mrf.mxu0  ;;  %vm1582_vm5 = vcmp.ge.bf16.partialorder %v1550_v57, 0 }
 0x29e   : > { %v1084_v26 = vpack.c.bf16 %v1050_v22, %v1047_v21  ;;  %v1610_v39 = vmul.bf16 %v1546_v53, %v3913_v63  ;;  %vm1578_vm1 = vcmp.ge.bf16.partialorder %v1546_v53, 0  ;;  %v1613_v50 = vmul.bf16 %v1549_v47, %v3913_v63 }
 0x29f   : > { %vm1581_vm4 = vcmp.ge.bf16.partialorder %v1549_v47, 0  ;;  %v1646_v9 = vsel %vm1582_vm5, %v1550_v57, %v1614_v1 }
 0x2a0   : > { %vm1116_vm15 = vcmp.ge.bf16.partialorder %v1084_v26, 0  ;;  %v1152_v31 = vmul.bf16 %v3913_v63, %v1084_v26  ;;  %v1642_v46 = vsel %vm1578_vm1, %v1546_v53, %v1610_v39  ;;  %v1645_v61 = vsel %vm1581_vm4, %v1549_v47, %v1613_v50 }
 0x2a2   : > { %v1184_v34 = vsel %vm1116_vm15, %v1084_v26, %v1152_v31 }
 0x2a3   : > { %v3007_v36 = vpop.f32.mrf.mxu1  ;;  %3054 = vmatmul.mubr.bf16.gmra.mxu1 %v1184_v34 }
 0x2a4   : > { %3073 = vmatprep.mubr.bf16.mxu1 %v1641_v37  ;;  %v1347_v4 = vadd.f32 %v3007_v36, %v4031_v10 }
 0x2a5   : > { %v1338_v38 = vpop.f32.mrf.mxu1 }
 0x2a6   : > { %v1339_v56 = vadd.f32 %v4031_v10, %v1338_v38 }
 0x2a7   : > { %v3008_v43 = vpop.f32.mrf.mxu1 }
 0x2a8   : > { %v1350_v0 = vadd.f32 %v3008_v43, %v4031_v10 }
 0x2a9   : > { %v1341_v49 = vpop.f32.mrf.mxu1 }
 0x2aa   : > { %v1342_v54 = vadd.f32 %v4031_v10, %v1341_v49  ;;  %v1552_v6 = vpack.c.bf16 %v1350_v0, %v1347_v4 }
 0x2ab   : > { %3074 = vmatmul.mubr.bf16.vlgmr.msra.gmra.mxu1 %v1642_v46 }
 0x2ac   : > { %3077 = vmatprep.mubr.bf16.mxu1 %v1643_v48  ;;  %v1551_v59 = vpack.c.bf16 %v1342_v54, %v1339_v56  ;;  %v1616_v14 = vmul.bf16 %v1552_v6, %v3913_v63  ;;  %vm1584_vm7 = vcmp.ge.bf16.partialorder %v1552_v6, 0 }
 0x2ae   : > { %v1615_v3 = vmul.bf16 %v1551_v59, %v3913_v63  ;;  %vm1583_vm6 = vcmp.ge.bf16.partialorder %v1551_v59, 0  ;;  %v1648_v18 = vsel %vm1584_vm7, %v1552_v6, %v1616_v14 }
 0x2b0   : > { %v1647_v11 = vsel %vm1583_vm6, %v1551_v59, %v1615_v3 }
 0x2b3   : > { %v3011_v60 = vpop.f32.mrf.mxu1  ;;  %3078 = vmatmul.mubr.bf16.gmra.mxu1 %v1644_v58 }
 0x2b4   : > { %3081 = vmatprep.mubr.bf16.mxu1 %v1645_v61  ;;  %v1363_v16 = vadd.f32 %v3011_v60, %v4031_v10 }
 0x2b5   : > { %v1354_v62 = vpop.f32.mrf.mxu1 }
 0x2b6   : > { %v1355_v7 = vadd.f32 %v4031_v10, %v1354_v62 }
 0x2b7   : > { %v3012_v2 = vpop.f32.mrf.mxu1 }
 0x2b8   : > { %v1366_v13 = vadd.f32 %v3012_v2, %v4031_v10 }
 0x2b9   : > { %v1357_v5 = vpop.f32.mrf.mxu1 }
 0x2ba   : > { %v1358_v8 = vadd.f32 %v4031_v10, %v1357_v5  ;;  %v1554_v17 = vpack.c.bf16 %v1366_v13, %v1363_v16 }
 0x2bb   : > { %3082 = vmatmul.mubr.bf16.gmra.mxu1 %v1646_v9 }
 0x2bc   : > { %v1553_v12 = vpack.c.bf16 %v1358_v8, %v1355_v7  ;;  %3085 = vmatprep.mubr.bf16.mxu1 %v1647_v11  ;;  %v1618_v22 = vmul.bf16 %v1554_v17, %v3913_v63  ;;  %vm1586_vm9 = vcmp.ge.bf16.partialorder %v1554_v17, 0 }
 0x2be   : > { %v1617_v15 = vmul.bf16 %v1553_v12, %v3913_v63  ;;  %vm1585_vm8 = vcmp.ge.bf16.partialorder %v1553_v12, 0  ;;  %v1650_v31 = vsel %vm1586_vm9, %v1554_v17, %v1618_v22 }
 0x2c0   : > { %v1649_v20 = vsel %vm1585_vm8, %v1553_v12, %v1617_v15 }
 0x2c3   : > { %v3015_v19 = vpop.f32.mrf.mxu1  ;;  %3086 = vmatmul.mubr.bf16.gmra.mxu1 %v1648_v18 }
 0x2c4   : > { %3089 = vmatprep.mubr.bf16.mxu1 %v1649_v20  ;;  %v1379_v24 = vadd.f32 %v3015_v19, %v4031_v10 }
 0x2c5   : > { %v1370_v21 = vpop.f32.mrf.mxu1 }
 0x2c6   : > { %v1371_v27 = vadd.f32 %v4031_v10, %v1370_v21 }
 0x2c7   : > { %v3016_v23 = vpop.f32.mrf.mxu1 }
 0x2c8   : > { %v1382_v25 = vadd.f32 %v3016_v23, %v4031_v10 }
 0x2c9   : > { %v1373_v26 = vpop.f32.mrf.mxu1 }
 0x2ca   : > { %v1556_v28 = vpack.c.bf16 %v1382_v25, %v1379_v24  ;;  %v1374_v29 = vadd.f32 %v4031_v10, %v1373_v26 }
 0x2cb   : > { %3090 = vmatmul.mubr.bf16.gmra.mxu1 %v1650_v31 }
 0x2cc   : > { %v1555_v32 = vpack.c.bf16 %v1374_v29, %v1371_v27  ;;  %v1620_v53 = vmul.bf16 %v1556_v28, %v3913_v63  ;;  %vm1588_vm11 = vcmp.ge.bf16.partialorder %v1556_v28, 0 }
 0x2ce   : > { %vm1587_vm10 = vcmp.ge.bf16.partialorder %v1555_v32, 0  ;;  %v1619_v33 = vmul.bf16 %v1555_v32, %v3913_v63  ;;  %v1652_v35 = vsel %vm1588_vm11, %v1556_v28, %v1620_v53 }
 0x2d0   : > { %v1651_v34 = vsel %vm1587_vm10, %v1555_v32, %v1619_v33 }
 0x2d1   : > { %3093 = vmatprep.mubr.bf16.mxu1 %v1651_v34 }
 0x2d3   : > { %v3019_v36 = vpop.f32.mrf.mxu1  ;;  %3094 = vmatmul.mubr.bf16.gmra.mxu1 %v1652_v35 }
 0x2d4   : > { %v1395_v39 = vadd.f32 %v3019_v36, %v4031_v10 }
 0x2d5   : > { %v1386_v37 = vpop.f32.mrf.mxu1 }
 0x2d6   : > { %v1387_v41 = vadd.f32 %v4031_v10, %v1386_v37 }
 0x2d7   : > { %v3020_v38 = vpop.f32.mrf.mxu1 }
 0x2d8   : > { %v1398_v40 = vadd.f32 %v3020_v38, %v4031_v10 }
 0x2d9   : > { %v1389_v30 = vpop.f32.mrf.mxu1 }
 0x2da   : > { %v1558_v42 = vpack.c.bf16 %v1398_v40, %v1395_v39  ;;  %v1390_v43 = vadd.f32 %v4031_v10, %v1389_v30 }
 0x2dc   : > { %v1557_v44 = vpack.c.bf16 %v1390_v43, %v1387_v41  ;;  %v1622_v45 = vmul.bf16 %v1558_v42, %v3913_v63  ;;  %vm1590_vm13 = vcmp.ge.bf16.partialorder %v1558_v42, 0 }
 0x2de   : > { %vm1589_vm12 = vcmp.ge.bf16.partialorder %v1557_v44, 0  ;;  %v1621_v46 = vmul.bf16 %v1557_v44, %v3913_v63  ;;  %v1654_v48 = vsel %vm1590_vm13, %v1558_v42, %v1622_v45 }
 0x2e0   : > { %v1653_v47 = vsel %vm1589_vm12, %v1557_v44, %v1621_v46 }
 0x2e1   : > { %3097 = vmatprep.mubr.bf16.mxu1 %v1653_v47 }
 0x2e2   : > { %3098 = vmatmul.mubr.bf16.gmra.mxu1 %v1654_v48 }
 0x2e3   : > { %v3023_v49 = vpop.f32.mrf.mxu1 }
 0x2e4   : > { %v1411_v54 = vadd.f32 %v3023_v49, %v4031_v10 }
 0x2e5   : > { %v1402_v51 = vpop.f32.mrf.mxu1 }
 0x2e6   : > { %v1403_v56 = vadd.f32 %v4031_v10, %v1402_v51 }
 0x2e7   : > { %v3024_v52 = vpop.f32.mrf.mxu1 }
 0x2e8   : > { %v1414_v50 = vadd.f32 %v3024_v52, %v4031_v10 }
 0x2e9   : > { %v1405_v55 = vpop.f32.mrf.mxu1 }
 0x2ea   : > { %v1560_v57 = vpack.c.bf16 %v1414_v50, %v1411_v54  ;;  %v1406_v58 = vadd.f32 %v4031_v10, %v1405_v55 }
 0x2ec   : > { %v1559_v59 = vpack.c.bf16 %v1406_v58, %v1403_v56  ;;  %v1624_v60 = vmul.bf16 %v1560_v57, %v3913_v63  ;;  %vm1592_vm15 = vcmp.ge.bf16.partialorder %v1560_v57, 0 }
 0x2ee   : > { %vm1591_vm14 = vcmp.ge.bf16.partialorder %v1559_v59, 0  ;;  %v1623_v61 = vmul.bf16 %v1559_v59, %v3913_v63  ;;  %v1656_v0 = vsel %vm1592_vm15, %v1560_v57, %v1624_v60 }
 0x2f0   : > { %v1655_v62 = vsel %vm1591_vm14, %v1559_v59, %v1623_v61 }
 0x2f1   : > { %3101 = vmatprep.mubr.bf16.mxu1 %v1655_v62 }
 0x2f2   : > { %3102 = vmatmul.mubr.bf16.gmra.mxu1 %v1656_v0 }
 0x2f3   : > { %v3027_v1 = vpop.f32.mrf.mxu1 }
 0x2f4   : > { %v1427_v4 = vadd.f32 %v3027_v1, %v4031_v10 }
 0x2f5   : > { %v1418_v2 = vpop.f32.mrf.mxu1 }
 0x2f6   : > { %v1419_v7 = vadd.f32 %v4031_v10, %v1418_v2 }
 0x2f7   : > { %v3028_v3 = vpop.f32.mrf.mxu1 }
 0x2f8   : > { %v1430_v5 = vadd.f32 %v3028_v3, %v4031_v10 }
 0x2f9   : > { %v1421_v6 = vpop.f32.mrf.mxu1 }
 0x2fa   : > { %v1562_v8 = vpack.c.bf16 %v1430_v5, %v1427_v4  ;;  %v1422_v9 = vadd.f32 %v4031_v10, %v1421_v6 }
 0x2fc   : > { %v1561_v11 = vpack.c.bf16 %v1422_v9, %v1419_v7  ;;  %v1626_v12 = vmul.bf16 %v1562_v8, %v3913_v63  ;;  %vm1594_vm1 = vcmp.ge.bf16.partialorder %v1562_v8, 0 }
 0x2fe   : > { %vm1593_vm0 = vcmp.ge.bf16.partialorder %v1561_v11, 0  ;;  %v1625_v13 = vmul.bf16 %v1561_v11, %v3913_v63  ;;  %v1658_v15 = vsel %vm1594_vm1, %v1562_v8, %v1626_v12 }
 0x300   : > { %v1657_v14 = vsel %vm1593_vm0, %v1561_v11, %v1625_v13 }
 0x301   : > { %3105 = vmatprep.mubr.bf16.mxu1 %v1657_v14 }
 0x302   : > { %3106 = vmatmul.mubr.bf16.gmra.mxu1 %v1658_v15 }
 0x303   : > { %v3031_v16 = vpop.f32.mrf.mxu1 }
 0x304   : > { %v1443_v19 = vadd.f32 %v3031_v16, %v4031_v10 }
 0x305   : > { %v1434_v17 = vpop.f32.mrf.mxu1 }
 0x306   : > { %v1435_v22 = vadd.f32 %v4031_v10, %v1434_v17 }
 0x307   : > { %v3032_v18 = vpop.f32.mrf.mxu1 }
 0x308   : > { %v1446_v20 = vadd.f32 %v3032_v18, %v4031_v10 }
 0x309   : > { %v1437_v21 = vpop.f32.mrf.mxu1 }
 0x30a   : > { %v1564_v23 = vpack.c.bf16 %v1446_v20, %v1443_v19  ;;  %v1438_v24 = vadd.f32 %v4031_v10, %v1437_v21 }
 0x30c   : > { %v1563_v25 = vpack.c.bf16 %v1438_v24, %v1435_v22  ;;  %v1628_v26 = vmul.bf16 %v1564_v23, %v3913_v63  ;;  %vm1596_vm3 = vcmp.ge.bf16.partialorder %v1564_v23, 0 }
 0x30e   : > { %vm1595_vm2 = vcmp.ge.bf16.partialorder %v1563_v25, 0  ;;  %v1627_v27 = vmul.bf16 %v1563_v25, %v3913_v63  ;;  %v1660_v29 = vsel %vm1596_vm3, %v1564_v23, %v1628_v26 }
 0x310   : > { %v1659_v28 = vsel %vm1595_vm2, %v1563_v25, %v1627_v27 }
 0x311   : > { %3109 = vmatprep.mubr.bf16.mxu1 %v1659_v28 }
 0x312   : > { %3110 = vmatmul.mubr.bf16.gmra.mxu1 %v1660_v29 }
 0x313   : > { %v3035_v31 = vpop.f32.mrf.mxu1 }
 0x314   : > { %v1459_v53 = vadd.f32 %v3035_v31, %v4031_v10 }
 0x315   : > { %v1450_v32 = vpop.f32.mrf.mxu1 }
 0x316   : > { %v1451_v36 = vadd.f32 %v4031_v10, %v1450_v32 }
 0x317   : > { %v3036_v33 = vpop.f32.mrf.mxu1 }
 0x318   : > { %v1462_v34 = vadd.f32 %v3036_v33, %v4031_v10 }
 0x319   : > { %v1453_v35 = vpop.f32.mrf.mxu1 }
 0x31a   : > { %v1566_v37 = vpack.c.bf16 %v1462_v34, %v1459_v53  ;;  %v1454_v38 = vadd.f32 %v4031_v10, %v1453_v35 }
 0x31c   : > { %v1565_v39 = vpack.c.bf16 %v1454_v38, %v1451_v36  ;;  %v1630_v40 = vmul.bf16 %v1566_v37, %v3913_v63  ;;  %vm1598_vm5 = vcmp.ge.bf16.partialorder %v1566_v37, 0 }
 0x31e   : > { %vm1597_vm4 = vcmp.ge.bf16.partialorder %v1565_v39, 0  ;;  %v1629_v30 = vmul.bf16 %v1565_v39, %v3913_v63  ;;  %v1662_v42 = vsel %vm1598_vm5, %v1566_v37, %v1630_v40 }
 0x320   : > { %v1661_v41 = vsel %vm1597_vm4, %v1565_v39, %v1629_v30 }
 0x321   : > { %3113 = vmatprep.mubr.bf16.mxu1 %v1661_v41 }
 0x322   : > { %3114 = vmatmul.mubr.bf16.gmra.mxu1 %v1662_v42 }
 0x323   : > { %v3039_v43 = vpop.f32.mrf.mxu1 }
 0x324   : > { %v1475_v46 = vadd.f32 %v3039_v43, %v4031_v10 }
 0x325   : > { %v1466_v44 = vpop.f32.mrf.mxu1 }
 0x326   : > { %v1467_v49 = vadd.f32 %v4031_v10, %v1466_v44 }
 0x327   : > { %v3040_v45 = vpop.f32.mrf.mxu1 }
 0x328   : > { %v1478_v47 = vadd.f32 %v3040_v45, %v4031_v10 }
 0x329   : > { %v1469_v48 = vpop.f32.mrf.mxu1 }
 0x32a   : > { %v1568_v51 = vpack.c.bf16 %v1478_v47, %v1475_v46  ;;  %v1470_v52 = vadd.f32 %v4031_v10, %v1469_v48 }
 0x32c   : > { %v1567_v54 = vpack.c.bf16 %v1470_v52, %v1467_v49  ;;  %v1632_v50 = vmul.bf16 %v1568_v51, %v3913_v63  ;;  %vm1600_vm7 = vcmp.ge.bf16.partialorder %v1568_v51, 0  ;;  %v4134_v49 = vld [vmem:[#allocation14] ss:$0 sm:$0xff] }
 0x32e   : > { %vm1599_vm6 = vcmp.ge.bf16.partialorder %v1567_v54, 0  ;;  %v1631_v55 = vmul.bf16 %v1567_v54, %v3913_v63  ;;  %v1664_v57 = vsel %vm1600_vm7, %v1568_v51, %v1632_v50 }
 0x330   : > { %v1663_v56 = vsel %vm1599_vm6, %v1567_v54, %v1631_v55 }
 0x331   : > { %3117 = vmatprep.mubr.bf16.mxu1 %v1663_v56 }
 0x332   : > { %3118 = vmatmul.mubr.bf16.gmra.mxu1 %v1664_v57 }
 0x333   : > { %v3043_v58 = vpop.f32.mrf.mxu1 }
 0x334   : > { %v1491_v61 = vadd.f32 %v3043_v58, %v4031_v10 }
 0x335   : > { %v1482_v59 = vpop.f32.mrf.mxu1 }
 0x336   : > { %v1483_v1 = vadd.f32 %v4031_v10, %v1482_v59 }
 0x337   : > { %v3044_v60 = vpop.f32.mrf.mxu1 }
 0x338   : > { %v1494_v62 = vadd.f32 %v3044_v60, %v4031_v10 }
 0x339   : > { %v1485_v0 = vpop.f32.mrf.mxu1 }
 0x33a   : > { %v1570_v2 = vpack.c.bf16 %v1494_v62, %v1491_v61  ;;  %v1486_v3 = vadd.f32 %v4031_v10, %v1485_v0 }
 0x33c   : > { %v1569_v4 = vpack.c.bf16 %v1486_v3, %v1483_v1  ;;  %v1634_v5 = vmul.bf16 %v1570_v2, %v3913_v63  ;;  %vm1602_vm9 = vcmp.ge.bf16.partialorder %v1570_v2, 0 }
 0x33e   : > { %vm1601_vm8 = vcmp.ge.bf16.partialorder %v1569_v4, 0  ;;  %v1633_v6 = vmul.bf16 %v1569_v4, %v3913_v63  ;;  %v1666_v8 = vsel %vm1602_vm9, %v1570_v2, %v1634_v5 }
 0x340   : > { %v1665_v7 = vsel %vm1601_vm8, %v1569_v4, %v1633_v6 }
 0x341   : > { %3121 = vmatprep.mubr.bf16.mxu1 %v1665_v7 }
 0x342   : > { %3122 = vmatmul.mubr.bf16.gmra.mxu1 %v1666_v8 }
 0x343   : > { %v3047_v9 = vpop.f32.mrf.mxu1 }
 0x344   : > { %v1507_v13 = vadd.f32 %v3047_v9, %v4031_v10 }
 0x345   : > { %v1498_v11 = vpop.f32.mrf.mxu1 }
 0x346   : > { %v1499_v16 = vadd.f32 %v4031_v10, %v1498_v11 }
 0x347   : > { %v3048_v12 = vpop.f32.mrf.mxu1 }
 0x348   : > { %v1510_v14 = vadd.f32 %v3048_v12, %v4031_v10 }
 0x349   : > { %v1501_v15 = vpop.f32.mrf.mxu1 }
 0x34a   : > { %v1572_v17 = vpack.c.bf16 %v1510_v14, %v1507_v13  ;;  %v1502_v18 = vadd.f32 %v4031_v10, %v1501_v15 }
 0x34c   : > { %v1571_v19 = vpack.c.bf16 %v1502_v18, %v1499_v16  ;;  %v1636_v20 = vmul.bf16 %v1572_v17, %v3913_v63  ;;  %vm1604_vm11 = vcmp.ge.bf16.partialorder %v1572_v17, 0 }
 0x34e   : > { %vm1603_vm10 = vcmp.ge.bf16.partialorder %v1571_v19, 0  ;;  %v1635_v21 = vmul.bf16 %v1571_v19, %v3913_v63  ;;  %v1668_v23 = vsel %vm1604_vm11, %v1572_v17, %v1636_v20 }
 0x350   : > { %v1667_v22 = vsel %vm1603_vm10, %v1571_v19, %v1635_v21 }
 0x351   : > { %3125 = vmatprep.mubr.bf16.mxu1 %v1667_v22 }
 0x352   : > { %3126 = vmatmul.mubr.bf16.gmra.mxu1 %v1668_v23 }
 0x353   : > { %v3051_v24 = vpop.f32.mrf.mxu1 }
 0x354   : > { %v1523_v27 = vadd.f32 %v3051_v24, %v4031_v10 }
 0x355   : > { %v1514_v25 = vpop.f32.mrf.mxu1 }
 0x356   : > { %v1515_v31 = vadd.f32 %v4031_v10, %v1514_v25 }
 0x357   : > { %v3052_v26 = vpop.f32.mrf.mxu1 }
 0x358   : > { %v1526_v28 = vadd.f32 %v3052_v26, %v4031_v10 }
 0x359   : > { %v1517_v29 = vpop.f32.mrf.mxu1 }
 0x35a   : > { %v1574_v32 = vpack.c.bf16 %v1526_v28, %v1523_v27  ;;  %v1518_v33 = vadd.f32 %v4031_v10, %v1517_v29 }
 0x35c   : > { %v1573_v53 = vpack.c.bf16 %v1518_v33, %v1515_v31  ;;  %v1638_v34 = vmul.bf16 %v1574_v32, %v3913_v63  ;;  %vm1606_vm13 = vcmp.ge.bf16.partialorder %v1574_v32, 0 }
 0x35e   : > { %vm1605_vm12 = vcmp.ge.bf16.partialorder %v1573_v53, 0  ;;  %v1637_v35 = vmul.bf16 %v1573_v53, %v3913_v63  ;;  %v1670_v37 = vsel %vm1606_vm13, %v1574_v32, %v1638_v34 }
 0x360   : > { %v1669_v36 = vsel %vm1605_vm12, %v1573_v53, %v1637_v35 }
 0x361   : > { %3129 = vmatprep.mubr.bf16.mxu1 %v1669_v36 }
 0x362   : > { %3130 = vmatmul.mubr.bf16.gmra.mxu1 %v1670_v37 }
 0x363   : > { %v3055_v38 = vpop.f32.mrf.mxu1 }
 0x364   : > { %v1539_v30 = vadd.f32 %v3055_v38, %v4031_v10 }
 0x365   : > { %v1530_v39 = vpop.f32.mrf.mxu1 }
 0x366   : > { %v1531_v43 = vadd.f32 %v4031_v10, %v1530_v39 }
 0x367   : > { %v3056_v40 = vpop.f32.mrf.mxu1 }
 0x368   : > { %v1542_v41 = vadd.f32 %v3056_v40, %v4031_v10 }
 0x369   : > { %v1533_v42 = vpop.f32.mrf.mxu1 }
 0x36a   : > { %v1576_v44 = vpack.c.bf16 %v1542_v41, %v1539_v30  ;;  %v1534_v45 = vadd.f32 %v4031_v10, %v1533_v42 }
 0x36b   : > { %v3075_v46 = vpop.f32.mrf.mxu1 }
 0x36c   : > { %v1575_v47 = vpack.c.bf16 %v1534_v45, %v1531_v43  ;;  %v1640_v48 = vmul.bf16 %v1576_v44, %v3913_v63  ;;  %vm1608_vm15 = vcmp.ge.bf16.partialorder %v1576_v44, 0  ;;  %v1787_v50 = vadd.f32 %v3075_v46, %v4134_v49 }
 0x36d   : > { %v1778_v51 = vpop.f32.mrf.mxu1 }
 0x36e   : > { %vm1607_vm14 = vcmp.ge.bf16.partialorder %v1575_v47, 0  ;;  %v1639_v52 = vmul.bf16 %v1575_v47, %v3913_v63  ;;  %v1672_v10 = vsel %vm1608_vm15, %v1576_v44, %v1640_v48  ;;  %v1779_v58 = vadd.f32 %v4134_v49, %v1778_v51 }
 0x36f   : > { %v3076_v54 = vpop.f32.mrf.mxu1 }
 0x370   : > { %v1790_v55 = vadd.f32 %v3076_v54, %v4134_v49  ;;  %v1671_v56 = vsel %vm1607_vm14, %v1575_v47, %v1639_v52 }
 0x371   : > { %v1781_v57 = vpop.f32.mrf.mxu1  ;;  %3133 = vmatprep.mubr.bf16.mxu1 %v1671_v56 }
 0x372   : > { %v2714_v59 = vpack.c.bf16 %v1790_v55, %v1787_v50  ;;  %v1782_v60 = vadd.f32 %v4134_v49, %v1781_v57  ;;  %3134 = vmatmul.mubr.bf16.gmra.mxu1 %v1672_v10 }
 0x373   : > { %v3079_v61 = vpop.f32.mrf.mxu1 }
 0x374   : > { %2866 = vst [vmem:[%s4142_s28 + $0x8] sm:$0xff] %v2714_v59   ;;  %v2709_v63 = vpack.c.bf16 %v1782_v60, %v1779_v58  ;;  %v1803_v1 = vadd.f32 %v3079_v61, %v4134_v49 }
 0x375   : > { %v1794_v62 = vpop.f32.mrf.mxu1 }
 0x376   : > { %2710 = vst [vmem:[%s4142_s28] sm:$0xff] %v2709_v63   ;;  %v1795_v4 = vadd.f32 %v4134_v49, %v1794_v62 }
 0x377   : > { %v3080_v0 = vpop.f32.mrf.mxu1 }
 0x378   : > { %v1806_v2 = vadd.f32 %v3080_v0, %v4134_v49 }
 0x379   : > { %v1797_v3 = vpop.f32.mrf.mxu1 }
 0x37a   : > { %v2724_v5 = vpack.c.bf16 %v1806_v2, %v1803_v1  ;;  %v1798_v6 = vadd.f32 %v4134_v49, %v1797_v3 }
 0x37b   : > { %v3083_v7 = vpop.f32.mrf.mxu1 }
 0x37c   : > { %2868 = vst [vmem:[%s4142_s28 + $0x18] sm:$0xff] %v2724_v5   ;;  %v2719_v8 = vpack.c.bf16 %v1798_v6, %v1795_v4  ;;  %v1819_v12 = vadd.f32 %v3083_v7, %v4134_v49 }
 0x37d   : > { %v1810_v9 = vpop.f32.mrf.mxu1 }
 0x37e   : > { %2867 = vst [vmem:[%s4142_s28 + $0x10] sm:$0xff] %v2719_v8   ;;  %v1811_v15 = vadd.f32 %v4134_v49, %v1810_v9 }
 0x37f   : > { %v3084_v11 = vpop.f32.mrf.mxu1 }
 0x380   : > { %v1822_v13 = vadd.f32 %v3084_v11, %v4134_v49 }
 0x381   : > { %v1813_v14 = vpop.f32.mrf.mxu1 }
 0x382   : > { %v2734_v16 = vpack.c.bf16 %v1822_v13, %v1819_v12  ;;  %v1814_v17 = vadd.f32 %v4134_v49, %v1813_v14 }
 0x383   : > { %v3087_v18 = vpop.f32.mrf.mxu1 }
 0x384   : > { %2870 = vst [vmem:[%s4142_s28 + $0x28] sm:$0xff] %v2734_v16   ;;  %v2729_v19 = vpack.c.bf16 %v1814_v17, %v1811_v15  ;;  %v1835_v22 = vadd.f32 %v3087_v18, %v4134_v49 }
 0x385   : > { %v1826_v20 = vpop.f32.mrf.mxu1 }
 0x386   : > { %2869 = vst [vmem:[%s4142_s28 + $0x20] sm:$0xff] %v2729_v19   ;;  %v1827_v25 = vadd.f32 %v4134_v49, %v1826_v20 }
 0x387   : > { %v3088_v21 = vpop.f32.mrf.mxu1 }
 0x388   : > { %v1838_v23 = vadd.f32 %v3088_v21, %v4134_v49 }
 0x389   : > { %v1829_v24 = vpop.f32.mrf.mxu1 }
 0x38a   : > { %v2744_v26 = vpack.c.bf16 %v1838_v23, %v1835_v22  ;;  %v1830_v27 = vadd.f32 %v4134_v49, %v1829_v24 }
 0x38b   : > { %v3091_v28 = vpop.f32.mrf.mxu1 }
 0x38c   : > { %2872 = vst [vmem:[%s4142_s28 + $0x38] sm:$0xff] %v2744_v26   ;;  %v2739_v29 = vpack.c.bf16 %v1830_v27, %v1827_v25  ;;  %v1851_v33 = vadd.f32 %v3091_v28, %v4134_v49 }
 0x38d   : > { %v1842_v31 = vpop.f32.mrf.mxu1 }
 0x38e   : > { %2871 = vst [vmem:[%s4142_s28 + $0x30] sm:$0xff] %v2739_v29   ;;  %v1843_v35 = vadd.f32 %v4134_v49, %v1842_v31 }
 0x38f   : > { %v3092_v32 = vpop.f32.mrf.mxu1 }
 0x390   : > { %v1854_v53 = vadd.f32 %v3092_v32, %v4134_v49 }
 0x391   : > { %v1845_v34 = vpop.f32.mrf.mxu1 }
 0x392   : > { %v2754_v36 = vpack.c.bf16 %v1854_v53, %v1851_v33  ;;  %v1846_v37 = vadd.f32 %v4134_v49, %v1845_v34 }
 0x393   : > { %v3095_v38 = vpop.f32.mrf.mxu1 }
 0x394   : > { %2874 = vst [vmem:[%s4142_s28 + $0x48] sm:$0xff] %v2754_v36   ;;  %v2749_v39 = vpack.c.bf16 %v1846_v37, %v1843_v35  ;;  %v1867_v41 = vadd.f32 %v3095_v38, %v4134_v49 }
 0x395   : > { %v1858_v40 = vpop.f32.mrf.mxu1 }
 0x396   : > { %2873 = vst [vmem:[%s4142_s28 + $0x40] sm:$0xff] %v2749_v39   ;;  %v1859_v44 = vadd.f32 %v4134_v49, %v1858_v40 }
 0x397   : > { %v3096_v30 = vpop.f32.mrf.mxu1 }
 0x398   : > { %v1870_v42 = vadd.f32 %v3096_v30, %v4134_v49 }
 0x399   : > { %v1861_v43 = vpop.f32.mrf.mxu1 }
 0x39a   : > { %v2764_v45 = vpack.c.bf16 %v1870_v42, %v1867_v41  ;;  %v1862_v46 = vadd.f32 %v4134_v49, %v1861_v43 }
 0x39c   : > { %2876 = vst [vmem:[%s4142_s28 + $0x58] sm:$0xff] %v2764_v45   ;;  %v2759_v47 = vpack.c.bf16 %v1862_v46, %v1859_v44 }
 0x39e   : > { %2875 = vst [vmem:[%s4142_s28 + $0x50] sm:$0xff] %v2759_v47  }
 0x3a2   : > { %v3099_v48 = vpop.f32.mrf.mxu1 }
 0x3a3   : > { %v1883_v54 = vadd.f32 %v3099_v48, %v4134_v49 }
 0x3a4   : > { %v1874_v51 = vpop.f32.mrf.mxu1 }
 0x3a5   : > { %v1875_v56 = vadd.f32 %v4134_v49, %v1874_v51 }
 0x3a6   : > { %v3100_v52 = vpop.f32.mrf.mxu1 }
 0x3a7   : > { %v1886_v50 = vadd.f32 %v3100_v52, %v4134_v49 }
 0x3a8   : > { %v1877_v55 = vpop.f32.mrf.mxu1 }
 0x3a9   : > { %v2774_v57 = vpack.c.bf16 %v1886_v50, %v1883_v54  ;;  %v1878_v10 = vadd.f32 %v4134_v49, %v1877_v55 }
 0x3ab   : > { %2878 = vst [vmem:[%s4142_s28 + $0x68] sm:$0xff] %v2774_v57   ;;  %v2769_v58 = vpack.c.bf16 %v1878_v10, %v1875_v56 }
 0x3ad   : > { %2877 = vst [vmem:[%s4142_s28 + $0x60] sm:$0xff] %v2769_v58  }
 0x3b2   : > { %v3103_v59 = vpop.f32.mrf.mxu1 }
 0x3b3   : > { %v1899_v63 = vadd.f32 %v3103_v59, %v4134_v49 }
 0x3b4   : > { %v1890_v60 = vpop.f32.mrf.mxu1 }
 0x3b5   : > { %v1891_v1 = vadd.f32 %v4134_v49, %v1890_v60 }
 0x3b6   : > { %v3104_v61 = vpop.f32.mrf.mxu1 }
 0x3b7   : > { %v1902_v62 = vadd.f32 %v3104_v61, %v4134_v49 }
 0x3b8   : > { %v1893_v0 = vpop.f32.mrf.mxu1 }
 0x3b9   : > { %v2784_v2 = vpack.c.bf16 %v1902_v62, %v1899_v63  ;;  %v1894_v3 = vadd.f32 %v4134_v49, %v1893_v0 }
 0x3bb   : > { %2880 = vst [vmem:[%s4142_s28 + $0x78] sm:$0xff] %v2784_v2   ;;  %v2779_v4 = vpack.c.bf16 %v1894_v3, %v1891_v1 }
 0x3bd   : > { %2879 = vst [vmem:[%s4142_s28 + $0x70] sm:$0xff] %v2779_v4  }
 0x3c2   : > { %v3107_v5 = vpop.f32.mrf.mxu1 }
 0x3c3   : > { %v1915_v8 = vadd.f32 %v3107_v5, %v4134_v49 }
 0x3c4   : > { %v1906_v6 = vpop.f32.mrf.mxu1 }
 0x3c5   : > { %v1907_v12 = vadd.f32 %v4134_v49, %v1906_v6 }
 0x3c6   : > { %v3108_v7 = vpop.f32.mrf.mxu1 }
 0x3c7   : > { %v1918_v9 = vadd.f32 %v3108_v7, %v4134_v49 }
 0x3c8   : > { %v1909_v11 = vpop.f32.mrf.mxu1 }
 0x3c9   : > { %v2794_v13 = vpack.c.bf16 %v1918_v9, %v1915_v8  ;;  %v1910_v14 = vadd.f32 %v4134_v49, %v1909_v11 }
 0x3cb   : > { %2882 = vst [vmem:[%s4142_s28 + $0x88] sm:$0xff] %v2794_v13   ;;  %v2789_v15 = vpack.c.bf16 %v1910_v14, %v1907_v12 }
 0x3cd   : > { %2881 = vst [vmem:[%s4142_s28 + $0x80] sm:$0xff] %v2789_v15  }
 0x3d2   : > { %v3111_v16 = vpop.f32.mrf.mxu1 }
 0x3d3   : > { %v1931_v19 = vadd.f32 %v3111_v16, %v4134_v49 }
 0x3d4   : > { %v1922_v17 = vpop.f32.mrf.mxu1 }
 0x3d5   : > { %v1923_v22 = vadd.f32 %v4134_v49, %v1922_v17 }
 0x3d6   : > { %v3112_v18 = vpop.f32.mrf.mxu1 }
 0x3d7   : > { %v1934_v20 = vadd.f32 %v3112_v18, %v4134_v49 }
 0x3d8   : > { %v1925_v21 = vpop.f32.mrf.mxu1 }
 0x3d9   : > { %v2804_v23 = vpack.c.bf16 %v1934_v20, %v1931_v19  ;;  %v1926_v24 = vadd.f32 %v4134_v49, %v1925_v21 }
 0x3db   : > { %2884 = vst [vmem:[%s4142_s28 + $0x98] sm:$0xff] %v2804_v23   ;;  %v2799_v25 = vpack.c.bf16 %v1926_v24, %v1923_v22 }
 0x3dd   : > { %2883 = vst [vmem:[%s4142_s28 + $0x90] sm:$0xff] %v2799_v25  }
 0x3e2   : > { %v3115_v26 = vpop.f32.mrf.mxu1 }
 0x3e3   : > { %v1947_v29 = vadd.f32 %v3115_v26, %v4134_v49 }
 0x3e4   : > { %v1938_v27 = vpop.f32.mrf.mxu1 }
 0x3e5   : > { %v1939_v33 = vadd.f32 %v4134_v49, %v1938_v27 }
 0x3e6   : > { %v3116_v28 = vpop.f32.mrf.mxu1 }
 0x3e7   : > { %v1950_v31 = vadd.f32 %v3116_v28, %v4134_v49 }
 0x3e8   : > { %v1941_v32 = vpop.f32.mrf.mxu1 }
 0x3e9   : > { %v2814_v53 = vpack.c.bf16 %v1950_v31, %v1947_v29  ;;  %v1942_v34 = vadd.f32 %v4134_v49, %v1941_v32 }
 0x3eb   : > { %2886 = vst [vmem:[%s4142_s28 + $0xa8] sm:$0xff] %v2814_v53   ;;  %v2809_v35 = vpack.c.bf16 %v1942_v34, %v1939_v33 }
 0x3ed   : > { %2885 = vst [vmem:[%s4142_s28 + $0xa0] sm:$0xff] %v2809_v35  }
 0x3f2   : > { %v3119_v36 = vpop.f32.mrf.mxu1 }
 0x3f3   : > { %v1963_v39 = vadd.f32 %v3119_v36, %v4134_v49 }
 0x3f4   : > { %v1954_v37 = vpop.f32.mrf.mxu1 }
 0x3f5   : > { %v1955_v41 = vadd.f32 %v4134_v49, %v1954_v37 }
 0x3f6   : > { %v3120_v38 = vpop.f32.mrf.mxu1 }
 0x3f7   : > { %v1966_v40 = vadd.f32 %v3120_v38, %v4134_v49 }
 0x3f8   : > { %v1957_v30 = vpop.f32.mrf.mxu1 }
 0x3f9   : > { %v2824_v42 = vpack.c.bf16 %v1966_v40, %v1963_v39  ;;  %v1958_v43 = vadd.f32 %v4134_v49, %v1957_v30 }
 0x3fb   : > { %2888 = vst [vmem:[%s4142_s28 + $0xb8] sm:$0xff] %v2824_v42   ;;  %v2819_v44 = vpack.c.bf16 %v1958_v43, %v1955_v41 }
 0x3fd   : > { %2887 = vst [vmem:[%s4142_s28 + $0xb0] sm:$0xff] %v2819_v44  }
 0x402   : > { %v3123_v45 = vpop.f32.mrf.mxu1 }
 0x403   : > { %v1979_v48 = vadd.f32 %v3123_v45, %v4134_v49 }
 0x404   : > { %v1970_v46 = vpop.f32.mrf.mxu1 }
 0x405   : > { %v1971_v54 = vadd.f32 %v4134_v49, %v1970_v46 }
 0x406   : > { %v3124_v47 = vpop.f32.mrf.mxu1 }
 0x407   : > { %v1982_v51 = vadd.f32 %v3124_v47, %v4134_v49 }
 0x408   : > { %v1973_v52 = vpop.f32.mrf.mxu1 }
 0x409   : > { %v2834_v50 = vpack.c.bf16 %v1982_v51, %v1979_v48  ;;  %v1974_v55 = vadd.f32 %v4134_v49, %v1973_v52 }
 0x40b   : > { %2890 = vst [vmem:[%s4142_s28 + $0xc8] sm:$0xff] %v2834_v50   ;;  %v2829_v56 = vpack.c.bf16 %v1974_v55, %v1971_v54 }
 0x40d   : > { %2889 = vst [vmem:[%s4142_s28 + $0xc0] sm:$0xff] %v2829_v56  }
 0x412   : > { %v3127_v57 = vpop.f32.mrf.mxu1 }
 0x413   : > { %v1995_v59 = vadd.f32 %v3127_v57, %v4134_v49 }
 0x414   : > { %v1986_v10 = vpop.f32.mrf.mxu1 }
 0x415   : > { %v1987_v63 = vadd.f32 %v4134_v49, %v1986_v10 }
 0x416   : > { %v3128_v58 = vpop.f32.mrf.mxu1 }
 0x417   : > { %v1998_v60 = vadd.f32 %v3128_v58, %v4134_v49 }
 0x418   : > { %v1989_v61 = vpop.f32.mrf.mxu1 }
 0x419   : > { %v2844_v62 = vpack.c.bf16 %v1998_v60, %v1995_v59  ;;  %v1990_v0 = vadd.f32 %v4134_v49, %v1989_v61 }
 0x41b   : > { %2892 = vst [vmem:[%s4142_s28 + $0xd8] sm:$0xff] %v2844_v62   ;;  %v2839_v1 = vpack.c.bf16 %v1990_v0, %v1987_v63 }
 0x41d   : > { %2891 = vst [vmem:[%s4142_s28 + $0xd0] sm:$0xff] %v2839_v1  }
 0x422   : > { %v3131_v2 = vpop.f32.mrf.mxu1 }
 0x423   : > { %v2011_v5 = vadd.f32 %v3131_v2, %v4134_v49 }
 0x424   : > { %v2002_v3 = vpop.f32.mrf.mxu1 }
 0x425   : > { %v2003_v8 = vadd.f32 %v4134_v49, %v2002_v3 }
 0x426   : > { %v3132_v4 = vpop.f32.mrf.mxu1 }
 0x427   : > { %v2014_v6 = vadd.f32 %v3132_v4, %v4134_v49 }
 0x428   : > { %v2005_v7 = vpop.f32.mrf.mxu1 }
 0x429   : > { %v2854_v9 = vpack.c.bf16 %v2014_v6, %v2011_v5  ;;  %v2006_v11 = vadd.f32 %v4134_v49, %v2005_v7 }
 0x42b   : > { %2894 = vst [vmem:[%s4142_s28 + $0xe8] sm:$0xff] %v2854_v9   ;;  %v2849_v12 = vpack.c.bf16 %v2006_v11, %v2003_v8 }
 0x42d   : > { %2893 = vst [vmem:[%s4142_s28 + $0xe0] sm:$0xff] %v2849_v12  }
 0x432   : > { %v3135_v13 = vpop.f32.mrf.mxu1 }
 0x433   : > { %v2027_v16 = vadd.f32 %v3135_v13, %v4134_v49 }
 0x434   : > { %v2018_v14 = vpop.f32.mrf.mxu1 }
 0x435   : > { %v2019_v19 = vadd.f32 %v4134_v49, %v2018_v14 }
 0x436   : > { %v3136_v15 = vpop.f32.mrf.mxu1 }
 0x437   : > { %v2030_v17 = vadd.f32 %v3136_v15, %v4134_v49 }
 0x438   : > { %v2021_v18 = vpop.f32.mrf.mxu1 }
 0x439   : > { %v2864_v20 = vpack.c.bf16 %v2030_v17, %v2027_v16  ;;  %v2022_v21 = vadd.f32 %v4134_v49, %v2021_v18  ;;  %2360 = sbr.rel (!%p4327_p10) target bundleno = 1113 (0x459), region = 84 }
 0x43b   : > { %2896 = vst [vmem:[%s4142_s28 + $0xf8] sm:$0xff] %v2864_v20   ;;  %v2859_v22 = vpack.c.bf16 %v2022_v21, %v2019_v19 }
 0x43d   : > { %2895 = vst [vmem:[%s4142_s28 + $0xf0] sm:$0xff] %v2859_v22  }
 0x43e   : > { %s4339_s25 = smov (!%p2363_p12, %s2362_s25), 64 }
 0x43f   : > { %s4240_s23 = sshll.u32 %s4339_s25, 6 }
 0x440   : > { %s2367_s17 = ssub.s32 4096, %s4240_s23 }
 0x441   : > { %2368 = vsyncadd %s2354_s26, %s2367_s17  ;;  %p2632_p1 = scmp.ne.s32.totalorder %s4240_s23, 0  ;;  %s2705_s18 = sshll.u32 %s3620_s1, 12 }
 0x442   : > { %s4250_s24 = scalar_lea.hbm %s4305_s8, %s2705_s18  ;;  %s2373_s27 = sshll.u32 %s4142_s28, 4  ;;  %s4253_s27 = int_to_ptr.vmem [resolvable:$true] %s2373_s27 }
 0x443   : > { %s3458_s22 = scalar_lea.vmem %s4253_s27, %s4240_s23  ;;  %s3548_s14 = smov [#allocation15]  }
 0x444   : > { %p3459_p6 = scmp.ne.s32.totalorder %s4253_s27, %s3458_s22  ;;  %s3462_s16 = sshll.u32 %s3548_s14, 4  ;;  %s3463_s16 = int_to_ptr.vmem [resolvable:$false] %s3462_s16 }
 0x445   : > { %s3464_s1 = scalar_lea.vmem %s3463_s16, 8192  ;;  %p3465_p2 = scmp.lt.s32.totalorder %s4253_s27, %s3463_s16 }
 0x446   : > { %p3460_p11 = pnand %p3459_p6, %p2632_p1  ;;  %p3466_p5 = scmp.lt.s32.totalorder %s3464_s1, %s3458_s22 }
 0x448   : > { %p3461_p13 = pneg %p3460_p11  ;;  %p3467_p0 = por %p3466_p5, %p3465_p2 }
 0x44a   : > { %p3468_p7 = pnand %p3467_p0, %p3461_p13 }
 0x44c   : > { %3471 = shalt.err (!%p3468_p7)
}
 0x44d   : > { %s3472_s2 = scalar_lea.hbm %s4250_s24, %s4240_s23  ;;  %s3476_s13 = scalar_lea.hbm %s4305_s8, 16000 }
 0x44e   : > { %p3473_p3 = scmp.ne.s32.totalorder %s4250_s24, %s3472_s2  ;;  %p3477_p4 = scmp.lt.s32.totalorder %s4250_s24, %s4305_s8 }
 0x44f   : > { %p3478_p10 = scmp.lt.s32.totalorder %s3476_s13, %s3472_s2 }
 0x450   : > { %p3474_p9 = pnand %p3473_p3, %p2632_p1 }
 0x451   : > { %p3479_p12 = por %p3478_p10, %p3477_p4 }
 0x452   : > { %p3475_p8 = pneg %p3474_p9 }
 0x454   : > { %p3480_p6 = pnand %p3479_p12, %p3475_p8 }
 0x456   : > { %3483 = shalt.err (!%p3480_p6)
}
 0x457   : > { %s3549_s18 = smov 64   ;;  %s3550_s20 = smov 4  }
 0x458   : > { %2379 = dma.vmem_to_hbm [thread:$0]  (%p2632_p1), %s4253_s27, %s4240_s23, %s4250_s24, %s2354_s26, %s3549_s18, %s3549_s18, %s3550_s20  }
 0x459 PF: > { %p3198_p11 = scmp.ge.s32.totalorder %s3534_s10, 2  ;;  %s2388_s21 = sand.u32 1, %s3522_s29  }
 0x45a   : > { %p4328_p13 = scmp.ne.s32.totalorder %s4314_s19, 0  ;;  %s2389_s22 = scalar_lea.sflag [#allocation5], %s2388_s21 }
 0x45c   : > { %p3183_p2 = pnand %p3198_p11, %p4328_p13 }
 0x45e   : > { %p3184_p5 = pneg %p3183_p2 }
 0x460   : > { %3517 = dma.done.wait (%p3184_p5), %s2389_s22, 4096  }
 0x461   : > { %3519 = vsyncadd (%p3184_p5), %s2389_s22, 4294963200  ;;  %s4329_s14 = sld [smem:[#allocation21_spill]]  ;;  %p25_p0 = scmp.ge.s32.totalorder %s3624_s12, 6  }
 0x462   : > { %s4330_s29 = smov %s3526_s30  ;;  %s4331_s30 = smov %s3530_s9 }
 0x463   : > { %s4333_s10 = smov %s3624_s12  ;;  %27 = sbr.rel (!%p25_p0) target bundleno = 11 (0xb), region = 121 }
 0x467   : > { %s4332_s9 = smov %s4329_s14 }
 0x468   :  { %2394 = vsyncpa [#allocation4], 1 }
 0x469   :  { %2396 = vsyncpa [#allocation4 + $0x1], 1 }
 0x46a   :  { %2397 = vsyncpa [#allocation7], 1 }
 0x46b   :  { %2398 = vsyncpa [#allocation10], 1 }
 0x46c   :  { %2399 = vsyncpa [#allocation13], 1 }
 0x46d   :  { %2400 = vsyncpa [#allocation5], 1 }
 0x46e   :  { %2402 = vsyncpa [#allocation5 + $0x1], 1 }

// kernel: tpu_custom_call.1
= control target key start
LH: loop header
LB: loop body
LE: loop exit
PB: predicated region body
PF: predicated region fallthrough
CT: control target
= control target key end

     0   :  { %s4297_s0 = inlined_call_operand.hbm [shape: f32[2000,256], index: 0, kind: input, shape index: {}]   ;;  %s4298_s1 = inlined_call_operand.<no memory space> [shape: f32[1], index: 1, kind: input, shape index: {}]   ;;  %s4299_s2 = inlined_call_operand.hbm [shape: bf16[256,128], index: 2, kind: input, shape index: {}]   ;;  %s4300_s3 = inlined_call_operand.hbm [shape: f32[1,128], index: 3, kind: input, shape index: {}]   ;;  %s4301_s4 = inlined_call_operand.hbm [shape: bf16[128,128], index: 4, kind: input, shape index: {}]   ;;  %s4302_s5 = inlined_call_operand.hbm [shape: f32[1,128], index: 5, kind: input, shape index: {}]   ;;  %s4303_s6 = inlined_call_operand.hbm [shape: bf16[128,128], index: 6, kind: input, shape index: {}]   ;;  %s4304_s7 = inlined_call_operand.hbm [shape: f32[1,128], index: 7, kind: input, shape index: {}]   ;;  %s4305_s8 = inlined_call_operand.hbm [shape: bf16[2000,128], index: 8, kind: output, shape index: {}]  }
   0x1   :  { %4309 = sst [smem:[#allocation22_spill]] %s4299_s2 }
   0x2   :  { %13 = sst [smem:[#allocation2]] %s4298_s1 }
   0x3   :  { %14 = vsyncpa [#allocation4], 0 }
   0x4   :  { %16 = vsyncpa [#allocation4 + $0x1], 0 }
   0x5   :  { %17 = vsyncpa [#allocation7], 0 }
   0x6   :  { %18 = vsyncpa [#allocation10], 0 }
   0x7   :  { %19 = vsyncpa [#allocation13], 0 }
   0x8   :  { %20 = vsyncpa [#allocation5], 0 }
   0x9   :  { %22 = vsyncpa [#allocation5 + $0x1], 0  ;;  %s3599_s29 = smov 0   ;;  %s3601_s30 = smov 0  }
   0xa   :  { %s3603_s9 = smov 0   ;;  %s3605_s10 = smov 0  }
   0xb LB: > { %s3620_s1 = sadd.s32 4294967295, %s3534_s10   ;;  %s2503_s11 = sadd.s32 4294967294, %s3534_s10   ;;  %s3534_s10 = sphi %s3605_s10, %s4333_s10   ;;  %s3530_s9 = sphi %s3603_s9, %s4332_s9   ;;  %s3526_s30 = sphi %s3601_s30, %s4331_s30   ;;  %s3522_s29 = sphi %s3599_s29, %s4330_s29  }
   0xc   : > { %s3624_s12 = sadd.s32 1, %s3534_s10   ;;  %s35_s13 = sadd.s32 1, %s3530_s9 }
   0xd   : > { %s32_s14 = ssub.s32 %s3534_s10, %s3624_s12  ;;  %p42_p0 = scmp.ne.s32.totalorder %s3530_s9, %s3526_s30 }
   0xe   : > { %p33_p1 = scmp.eq.s32.totalorder %s32_s14, 0  ;;  %p43_p2 = scmp.eq.s32.totalorder %s3534_s10, 0 }
   0xf   : > { %p48_p3 = scmp.ne.s32.totalorder %s3526_s30, %s3522_s29  ;;  %p4306_p4 = scmp.eq.s32.totalorder %s3620_s1, 0 }
  0x10   : > { %s3636_s15 = scalar_select %p33_p1, %s3530_s9, %s35_s13  }
  0x11   : > { %p3638_p5 = por %p43_p2, %p42_p0  ;;  %p3644_p6 = por %p4306_p4, %p48_p3 }
  0x12   : > { %4310 = sst [smem:[#allocation21_spill]] %s3636_s15  ;;  %p219_p7 = scmp.eq.s32.totalorder %s3620_s1, 3 }
  0x13   : > { %s4312_s17 = scalar_select %p3644_p6, 1, 0 }
  0x14   : > { %p225_p8 = scmp.eq.s32.totalorder %s2503_s11, 3  ;;  %p2504_p9 = scmp.ge.s32.totalorder %s3534_s10, 1 }
  0x15   : > { %p232_p10 = scmp.lt.s32.totalorder %s3534_s10, 5  ;;  %p3651_p11 = por %p219_p7, %p42_p0 }
  0x16   : > { %p3655_p12 = por %p225_p8, %p48_p3  ;;  %s3536_s21 = smov [#allocation6]  }
  0x17   : > { %s4313_s18 = scalar_select %p3651_p11, 1, 0 }
  0x18   : > { %s4314_s19 = scalar_select %p3655_p12, 1, 0 }
  0x19   : > { %p3659_p13 = pnand %p2504_p9, %p232_p10  ;;  %s247_s22 = sshll.u32 %s3536_s21, 4  ;;  %s248_s22 = int_to_ptr.vmem [resolvable:$true] %s247_s22 }
  0x1a   : > { %s3537_s24 = smov [#allocation9]   ;;  %s3287_s27 = scalar_lea.vmem %s248_s22, 2048 }
  0x1b   : > { %s4315_s20 = scalar_select %p3659_p13, 1, 0 }
  0x1c   : > { %p3163_p1 = pneg %p3659_p13  ;;  %s271_s25 = sshll.u32 %s3537_s24, 4  ;;  %s272_s25 = int_to_ptr.vmem [resolvable:$true] %s271_s25 }
  0x1d   : > { %p3288_p3 = scmp.ne.s32.totalorder %s248_s22, %s3287_s27  ;;  %p3295_p9 = scmp.lt.s32.totalorder %s248_s22, %s248_s22 }
  0x1e   : > { %p3667_p2 = pnand %p3163_p1, %p4306_p4  ;;  %p3296_p10 = scmp.lt.s32.totalorder %s3287_s27, %s3287_s27 }
  0x20   : > { %p3673_p0 = pneg %p3667_p2  ;;  %p3297_p1 = por %p3296_p10, %p3295_p9 }
  0x22   : > { %p3290_p7 = pnand %p3288_p3, %p3673_p0 }
  0x24   : > { %p3291_p8 = pneg %p3290_p7 }
  0x26   : > { %p3298_p4 = pnand %p3297_p1, %p3291_p8 }
  0x28   : > { %3301 = shalt.err (!%p3298_p4)
}
  0x29   : > { %s3538_s28 = smov 64   ;;  %s3539_s11 = smov 4  }
  0x2a   : > { %s4318_s2 = sld [smem:[#allocation22_spill]]  ;;  %s3313_s21 = scalar_lea.vmem %s272_s25, 1024 }
  0x2b   : > { %p3314_p3 = scmp.ne.s32.totalorder %s272_s25, %s3313_s21  ;;  %p3321_p9 = scmp.lt.s32.totalorder %s272_s25, %s272_s25 }
  0x2c   : > { %p3322_p8 = scmp.lt.s32.totalorder %s3313_s21, %s3313_s21 }
  0x2d   : > { %p3316_p7 = pnand %p3314_p3, %p3673_p0 }
  0x2e   : > { %p3323_p4 = por %p3322_p8, %p3321_p9 }
  0x2f   : > { %p3317_p12 = pneg %p3316_p7 }
  0x30   : > { %3166 = dma.hbm_to_vmem [thread:$0]  (!%p3667_p2), %s4318_s2, 2048, %s248_s22, [#allocation7], %s3538_s28, %s3538_s28, %s3539_s11  }
  0x31   : > { %p3324_p10 = pnand %p3323_p4, %p3317_p12 }
  0x33   : > { %3327 = shalt.err (!%p3324_p10)
}
  0x34   : > { %3172 = dma.hbm_to_vmem [thread:$0]  (!%p3667_p2), %s4301_s4, 1024, %s272_s25, [#allocation10], %s3538_s28, %s3538_s28, %s3539_s11  }
  0x35   : > { %s3540_s22 = smov [#allocation12]   ;;  %s3541_s14 = smov [#allocation8]  }
  0x36   : > { %s295_s13 = sshll.u32 %s3540_s22, 4  ;;  %s261_s2 = sshll.u32 %s3541_s14, 4  ;;  %s296_s13 = int_to_ptr.vmem [resolvable:$true] %s295_s13  ;;  %s262_s2 = int_to_ptr.vmem [resolvable:$true] %s261_s2 }
  0x37   : > { %s3339_s15 = scalar_lea.vmem %s296_s13, 1024  ;;  %p3347_p7 = scmp.lt.s32.totalorder %s296_s13, %s296_s13 }
  0x38   : > { %p3340_p1 = scmp.ne.s32.totalorder %s296_s13, %s3339_s15  ;;  %p3348_p9 = scmp.lt.s32.totalorder %s3339_s15, %s3339_s15 }
  0x3a   : > { %p3342_p12 = pnand %p3340_p1, %p3673_p0  ;;  %p3349_p8 = por %p3348_p9, %p3347_p7 }
  0x3c   : > { %p3343_p3 = pneg %p3342_p12 }
  0x3e   : > { %p3350_p4 = pnand %p3349_p8, %p3343_p3 }
  0x40   : > { %3353 = shalt.err (!%p3350_p4)
}
  0x41   : > { %3178 = dma.hbm_to_vmem [thread:$0]  (!%p3667_p2), %s4303_s6, 1024, %s296_s13, [#allocation13], %s3538_s28, %s3538_s28, %s3539_s11  }
  0x42   : > { %s3365_s24 = scalar_lea.vmem %s262_s2, 16  ;;  %s3372_s15 = scalar_lea.vmem %s262_s2, 32 }
  0x43   : > { %p3366_p10 = scmp.ne.s32.totalorder %s262_s2, %s3365_s24  ;;  %p3373_p7 = scmp.lt.s32.totalorder %s262_s2, %s262_s2 }
  0x44   : > { %p3374_p3 = scmp.lt.s32.totalorder %s3372_s15, %s3365_s24 }
  0x45   : > { %p3368_p1 = pnand %p3366_p10, %p3673_p0 }
  0x46   : > { %p3375_p9 = por %p3374_p3, %p3373_p7 }
  0x47   : > { %p3369_p12 = pneg %p3368_p1 }
  0x49   : > { %p3376_p8 = pnand %p3375_p9, %p3369_p12 }
  0x4b   : > { %3379 = shalt.err (!%p3376_p8)
}
  0x4c   : > { %3169 = dma.hbm_to_vmem [thread:$0]  (!%p3667_p2), %s4300_s3, 16, %s262_s2, [#allocation7]  }
  0x4d   : > { %s3542_s28 = smov [#allocation11]   ;;  %s3543_s13 = smov [#allocation14]  }
  0x4e   : > { %s285_s11 = sshll.u32 %s3542_s28, 4  ;;  %s309_s14 = sshll.u32 %s3543_s13, 4  ;;  %s286_s11 = int_to_ptr.vmem [resolvable:$true] %s285_s11  ;;  %s310_s14 = int_to_ptr.vmem [resolvable:$true] %s309_s14 }
  0x4f   : > { %s3391_s25 = scalar_lea.vmem %s286_s11, 16  ;;  %s3398_s21 = scalar_lea.vmem %s286_s11, 32 }
  0x50   : > { %p3392_p4 = scmp.ne.s32.totalorder %s286_s11, %s3391_s25  ;;  %p3399_p12 = scmp.lt.s32.totalorder %s286_s11, %s286_s11 }
  0x51   : > { %p3400_p7 = scmp.lt.s32.totalorder %s3398_s21, %s3391_s25 }
  0x52   : > { %p3394_p10 = pnand %p3392_p4, %p3673_p0 }
  0x53   : > { %p3401_p3 = por %p3400_p7, %p3399_p12 }
  0x54   : > { %p3395_p1 = pneg %p3394_p10 }
  0x56   : > { %p3402_p9 = pnand %p3401_p3, %p3395_p1 }
  0x58   : > { %3405 = shalt.err (!%p3402_p9)
}
  0x59   : > { %3175 = dma.hbm_to_vmem [thread:$0]  (!%p3667_p2), %s4302_s5, 16, %s286_s11, [#allocation10]  }
  0x5a   : > { %s3417_s15 = scalar_lea.vmem %s310_s14, 16  ;;  %s3424_s27 = scalar_lea.vmem %s310_s14, 32 }
  0x5b   : > { %p3418_p8 = scmp.ne.s32.totalorder %s310_s14, %s3417_s15  ;;  %p3425_p10 = scmp.lt.s32.totalorder %s310_s14, %s310_s14 }
  0x5c   : > { %p3426_p6 = scmp.lt.s32.totalorder %s3424_s27, %s3417_s15 }
  0x5d   : > { %p3420_p11 = pnand %p3418_p8, %p3673_p0 }
  0x5e   : > { %p3427_p13 = por %p3426_p6, %p3425_p10 }
  0x5f   : > { %p3421_p4 = pneg %p3420_p11 }
  0x61   : > { %p3428_p12 = pnand %p3427_p13, %p3421_p4 }
  0x63   : > { %3431 = shalt.err (!%p3428_p12)
}
  0x64   : > { %3181 = dma.hbm_to_vmem [thread:$0]  (!%p3667_p2), %s4304_s7, 16, %s310_s14, [#allocation13]  }
  0x65   : > { %p2511_p1 = scmp.ge.s32.totalorder %s3534_s10, 4 }
  0x67   : > { %316 = sbr.rel (%p2511_p1) target bundleno = 140 (0x8c), region = 44 }
  0x6c   : > { %319 = sbr.rel (!%p3638_p5) target bundleno = 140 (0x8c), region = 48  ;;  %s320_s26 = sand.u32 (%p3638_p5), 1, %s3530_s9  }
  0x6d   : > { %s2513_s11 = sshll.u32 (%p3638_p5), %s3534_s10, 6  ;;  %s2512_s13 = sshll.u32 (%p3638_p5), %s320_s26, 10 }
  0x6e   : > { %s326_s25 = ssub.s32 (%p3638_p5), 250, %s2513_s11  ;;  %s3736_s24 = scalar_lea.sflag (%p3638_p5), [#allocation4], %s320_s26 }
  0x6f   : > { %p327_p6 = scmp.lt.s32.totalorder (%p3638_p5), %s326_s25, 64  ;;  %s324_s14 = scalar_lea.vmem (%p3638_p5), [#allocation3], %s2512_s13 }
  0x71   : > { %s4335_s25 = smov (!%p327_p6, %s326_s25), 64 }
  0x72   : > { %s3733_s21 = sshll.u32 %s4335_s25, 8 }
  0x73   : > { %s332_s23 = ssub.s32 16384, %s3733_s21 }
  0x74   : > { %333 = vsyncadd %s3736_s24, %s332_s23  ;;  %p2516_p5 = scmp.ne.s32.totalorder %s3733_s21, 0  ;;  %s2640_s16 = sshll.u32 %s3534_s10, 14 }
  0x75   : > { %s3744_s27 = scalar_lea.hbm %s4297_s0, %s2640_s16  ;;  %s339_s22 = sshll.u32 %s324_s14, 4  ;;  %s3746_s22 = int_to_ptr.vmem [resolvable:$true] %s339_s22 }
  0x76   : > { %s3432_s28 = scalar_lea.hbm %s3744_s27, %s3733_s21  ;;  %s3436_s13 = scalar_lea.hbm %s4297_s0, 64000 }
  0x77   : > { %p3433_p11 = scmp.ne.s32.totalorder %s3744_s27, %s3432_s28  ;;  %p3437_p0 = scmp.lt.s32.totalorder %s3744_s27, %s4297_s0 }
  0x78   : > { %p3438_p7 = scmp.lt.s32.totalorder %s3436_s13, %s3432_s28 }
  0x79   : > { %p3434_p13 = pnand %p3433_p11, %p2516_p5 }
  0x7a   : > { %p3439_p3 = por %p3438_p7, %p3437_p0 }
  0x7b   : > { %p3435_p2 = pneg %p3434_p13 }
  0x7d   : > { %p3440_p9 = pnand %p3439_p3, %p3435_p2 }
  0x7f   : > { %3443 = shalt.err (!%p3440_p9)
}
  0x80   : > { %s3444_s14 = scalar_lea.vmem %s3746_s22, %s3733_s21  ;;  %s3544_s16 = smov [#allocation3]  }
  0x81   : > { %p3445_p8 = scmp.ne.s32.totalorder %s3746_s22, %s3444_s14  ;;  %s3448_s2 = sshll.u32 %s3544_s16, 4  ;;  %s3449_s2 = int_to_ptr.vmem [resolvable:$false] %s3448_s2 }
  0x82   : > { %s3450_s15 = scalar_lea.vmem %s3449_s2, 32768  ;;  %p3451_p12 = scmp.lt.s32.totalorder %s3746_s22, %s3449_s2 }
  0x83   : > { %p3446_p4 = pnand %p3445_p8, %p2516_p5  ;;  %p3452_p1 = scmp.lt.s32.totalorder %s3450_s15, %s3444_s14 }
  0x85   : > { %p3447_p10 = pneg %p3446_p4  ;;  %p3453_p6 = por %p3452_p1, %p3451_p12 }
  0x87   : > { %p3454_p11 = pnand %p3453_p6, %p3447_p10 }
  0x89   : > { %3457 = shalt.err (!%p3454_p11)
}
  0x8a   : > { %s3545_s28 = smov 256   ;;  %s3546_s26 = smov 16  }
  0x8b   : > { %345 = dma.hbm_to_vmem [thread:$0]  (%p2516_p5), %s3744_s27, %s3733_s21, %s3746_s22, %s3736_s24, %s3545_s28, %s3545_s28, %s3546_s26  }
  0x8c PF: > { %p4319_p13 = scmp.ne.s32.totalorder %s4315_s20, 0 }
  0x8d   : > { %s3775_s11 = sand.u32 (!%p4319_p13), 1, %s3526_s30   ;;  %p4320_p2 = scmp.ne.s32.totalorder (!%p4319_p13), %s4312_s17, 0 }
  0x8e   : > { %351 = sbr.rel (%p4319_p13) target bundleno = 1113 (0x459), region = 52  ;;  %s2522_s13 = sshll.u32 (!%p4319_p13), %s3775_s11, 10 }
  0x8f   : > { %s354_s25 = scalar_lea.sflag (!%p4319_p13), [#allocation4], %s3775_s11  ;;  %s3779_s23 = scalar_lea.vmem (!%p4319_p13), [#allocation3], %s2522_s13 }
  0x93   : > { %3501 = dma.done.wait (%p4320_p2), %s354_s25, 16384  }
  0x94   : > { %3503 = vsyncadd (%p4320_p2), %s354_s25, 4294950912  ;;  %p4321_p5 = scmp.eq.s32.totalorder %s3620_s1, 0 }
  0x96   : > { %3505 = dma.done.wait (%p4321_p5), [#allocation7], 2064   ;;  %p4322_p0 = pmov %p4321_p5 }
  0x98   : > { %3507 = vsyncadd (%p4322_p0), [#allocation7], 4294965232  ;;  %p4323_p7 = pmov %p4322_p0 }
  0x99   : > { %p4324_p3 = pmov %p4322_p0 }
  0x9a   : > { %3509 = dma.done.wait (%p4323_p7), [#allocation10], 1040  }
  0x9b   : > { %3511 = vsyncadd (%p4324_p3), [#allocation10], 4294966256  ;;  %p4325_p9 = pmov %p4322_p0 }
  0x9c   : > { %p4326_p8 = pmov %p4322_p0 }
  0x9d   : > { %3513 = dma.done.wait (%p4325_p9), [#allocation13], 1040  }
  0x9e   : > { %3515 = vsyncadd (%p4326_p8), [#allocation13], 4294966256  ;;  %v3547_v0 = vmov 0   ;;  %v3244_v1 = vld [vmem:[#allocation6 + $0x38] sm:$0xff]   ;;  %v3245_v2 = vld [vmem:[#allocation6 + $0x30] sm:$0xff]   ;;  %s3887_s17 = sld [smem:[#allocation2]] }
  0x9f   : > { %764 = vmatprep.subr.bf16.mxu0 %v3547_v0  ;;  %v3246_v3 = vld [vmem:[#allocation6 + $0x28] sm:$0xff]   ;;  %v3247_v4 = vld [vmem:[#allocation6 + $0x20] sm:$0xff]   ;;  %v3248_v5 = vld [vmem:[#allocation6 + $0x18] sm:$0xff]   ;;  %s2529_s15 = sshll.u32 %s3775_s11, 8  ;;  %s2354_s26 = scalar_lea.sflag [#allocation5], %s3775_s11 }
  0xa0   : > { %765 = vmatpush1.bf16.msra.mxu0 %v3244_v1  ;;  %v438_v6 = vld [vmem:[%s3779_s23 + $0x8] sm:$0xff]  ;;  %v440_v7 = vld [vmem:[%s3779_s23 + $0x18] sm:$0xff]  ;;  %v3249_v9 = vld [vmem:[#allocation6 + $0x10] sm:$0xff]   ;;  %s4142_s28 = scalar_lea.vmem [#allocation15], %s2529_s15  ;;  %p4327_p10 = scmp.ne.s32.totalorder %s4313_s18, 0 }
  0xa1   : > { %766 = vmatprep.subr.bf16.mxu0 %v3547_v0  ;;  %v566_v8 = vpack.c.bf16 %v440_v7, %v438_v6  ;;  %v3250_v10 = vld [vmem:[#allocation6 + $0x8] sm:$0xff]   ;;  %v3251_v11 = vld [vmem:[#allocation6] sm:$0xff]   ;;  %v3252_v12 = vld [vmem:[#allocation6 + $0x78] sm:$0xff]   ;;  %s2630_s13 = sshll.u32 (%p4327_p10), %s3620_s1, 6 }
  0xa2   : > { %v3253_v13 = vld [vmem:[#allocation6 + $0x70] sm:$0xff]   ;;  %v3254_v14 = vld [vmem:[#allocation6 + $0x68] sm:$0xff]   ;;  %v3255_v15 = vld [vmem:[#allocation6 + $0x60] sm:$0xff]   ;;  %s2362_s25 = ssub.s32 (%p4327_p10), 250, %s2630_s13 }
  0xa3   : > { %796 = vmatprep.mubr.bf16.mxu0 %v566_v8  ;;  %v3256_v16 = vld [vmem:[#allocation6 + $0x58] sm:$0xff]   ;;  %v3257_v17 = vld [vmem:[#allocation6 + $0x50] sm:$0xff]   ;;  %v3258_v18 = vld [vmem:[#allocation6 + $0x48] sm:$0xff]   ;;  %p2363_p12 = scmp.lt.s32.totalorder (%p4327_p10), %s2362_s25, 64 }
  0xa4   : > { %767 = vmatpush1.bf16.msra.mxu0 %v3245_v2  ;;  %v3259_v19 = vld [vmem:[#allocation6 + $0x40] sm:$0xff]   ;;  %v439_v21 = vld [vmem:[%s3779_s23 + $0x10] sm:$0xff]  ;;  %v442_v22 = vld [vmem:[%s3779_s23 + $0x28] sm:$0xff]  ;;  %s429_s20 = sshrl.u32 %s3887_s17, 16  ;;  %p428_p4 = scmp.ne.f32.partialorder %s3887_s17, %s3887_s17 }
  0xa5   : > { %768 = vmatprep.subr.bf16.mxu0 %v3547_v0  ;;  %v437_v20 = vld [vmem:[%s3779_s23] sm:$0xff]  ;;  %v444_v23 = vld [vmem:[%s3779_s23 + $0x38] sm:$0xff]  ;;  %v443_v27 = vld [vmem:[%s3779_s23 + $0x30] sm:$0xff]  ;;  %s430_s21 = sand.u32 1, %s429_s20 }
  0xa6   : > { %v565_v24 = vpack.c.bf16 %v439_v21, %v437_v20  ;;  %v568_v25 = vpack.c.bf16 %v444_v23, %v442_v22  ;;  %v441_v26 = vld [vmem:[%s3779_s23 + $0x20] sm:$0xff]  ;;  %v446_v28 = vld [vmem:[%s3779_s23 + $0x48] sm:$0xff]  ;;  %v448_v29 = vld [vmem:[%s3779_s23 + $0x58] sm:$0xff]  ;;  %s431_s24 = sadd.s32 32767, %s430_s21 }
  0xa7   : > { %v567_v30 = vpack.c.bf16 %v443_v27, %v441_v26  ;;  %v570_v31 = vpack.c.bf16 %v448_v29, %v446_v28  ;;  %v445_v32 = vld [vmem:[%s3779_s23 + $0x40] sm:$0xff]  ;;  %v447_v33 = vld [vmem:[%s3779_s23 + $0x50] sm:$0xff]  ;;  %v450_v34 = vld [vmem:[%s3779_s23 + $0x68] sm:$0xff]  ;;  %s432_s27 = sadd.s32 %s431_s24, %s3887_s17 }
  0xa8   : > { %769 = vmatpush1.bf16.msra.mxu0 %v3246_v3  ;;  %v452_v35 = vld [vmem:[%s3779_s23 + $0x78] sm:$0xff]  ;;  %v569_v36 = vpack.c.bf16 %v447_v33, %v445_v32  ;;  %v449_v38 = vld [vmem:[%s3779_s23 + $0x60] sm:$0xff]  ;;  %v451_v39 = vld [vmem:[%s3779_s23 + $0x70] sm:$0xff]  ;;  %s433_s22 = sand.u32 4294901760, %s432_s27 }
  0xa9   : > { %770 = vmatprep.subr.bf16.mxu0 %v3547_v0  ;;  %v572_v37 = vpack.c.bf16 %v452_v35, %v450_v34  ;;  %v454_v40 = vld [vmem:[%s3779_s23 + $0x88] sm:$0xff]  ;;  %v456_v41 = vld [vmem:[%s3779_s23 + $0x98] sm:$0xff]  ;;  %v571_v42 = vpack.c.bf16 %v451_v39, %v449_v38  ;;  %v453_v44 = vld [vmem:[%s3779_s23 + $0x80] sm:$0xff]  ;;  %s4337_s22 = smov (%p428_p4, %s433_s22), 2143289344 }
  0xaa   : > { %v574_v43 = vpack.c.bf16 %v456_v41, %v454_v40  ;;  %v455_v45 = vld [vmem:[%s3779_s23 + $0x90] sm:$0xff]  ;;  %v458_v46 = vld [vmem:[%s3779_s23 + $0xa8] sm:$0xff]  ;;  %v460_v47 = vld [vmem:[%s3779_s23 + $0xb8] sm:$0xff]  ;;  %s436_s14 = sshrl.u32 %s4337_s22, 16 }
  0xab   : > { %v573_v48 = vpack.c.bf16 %v455_v45, %v453_v44  ;;  %v576_v49 = vpack.c.bf16 %v460_v47, %v458_v46  ;;  %v457_v50 = vld [vmem:[%s3779_s23 + $0xa0] sm:$0xff]  ;;  %v459_v51 = vld [vmem:[%s3779_s23 + $0xb0] sm:$0xff]  ;;  %v462_v52 = vld [vmem:[%s3779_s23 + $0xc8] sm:$0xff]  ;;  %s1117_s16 = sshll.u32 %s436_s14, 16 }
  0xac   : > { %771 = vmatpush1.bf16.msra.mxu0 %v3247_v4  ;;  %v464_v53 = vld [vmem:[%s3779_s23 + $0xd8] sm:$0xff]  ;;  %v575_v54 = vpack.c.bf16 %v459_v51, %v457_v50  ;;  %v461_v56 = vld [vmem:[%s3779_s23 + $0xc0] sm:$0xff]  ;;  %v463_v57 = vld [vmem:[%s3779_s23 + $0xd0] sm:$0xff]  ;;  %s1118_s2 = sor.u32 %s1117_s16, %s436_s14 }
  0xad   : > { %772 = vmatprep.subr.bf16.mxu0 %v3547_v0  ;;  %v578_v55 = vpack.c.bf16 %v464_v53, %v462_v52  ;;  %v466_v58 = vld [vmem:[%s3779_s23 + $0xe8] sm:$0xff]  ;;  %v468_v59 = vld [vmem:[%s3779_s23 + $0xf8] sm:$0xff]  ;;  %v577_v60 = vpack.c.bf16 %v463_v57, %v461_v56  ;;  %v465_v63 = vld [vmem:[%s3779_s23 + $0xe0] sm:$0xff] }
  0xae   : > { %v580_v61 = vpack.c.bf16 %v468_v59, %v466_v58  ;;  %v3260_v62 = vld [vmem:[#allocation9 + $0x38] sm:$0xff]   ;;  %v470_v1 = vld [vmem:[%s3779_s23 + $0x108] sm:$0xff]  ;;  %v471_v8 = vld [vmem:[%s3779_s23 + $0x110] sm:$0xff] }
  0xaf   : > { %v472_v2 = vld [vmem:[%s3779_s23 + $0x118] sm:$0xff]  ;;  %2977 = vmatprep.subr.bf16.mxu1 %v3260_v62  ;;  %v3262_v6 = vld [vmem:[#allocation9 + $0x28] sm:$0xff]   ;;  %v469_v7 = vld [vmem:[%s3779_s23 + $0x100] sm:$0xff] }
  0xb0   : > { %773 = vmatpush1.bf16.msra.mxu0 %v3248_v5  ;;  %2978 = vmatpush3.bf16.msra.mxu1 %v3260_v62  ;;  %v582_v4 = vpack.c.bf16 %v472_v2, %v470_v1  ;;  %v3261_v5 = vld [vmem:[#allocation9 + $0x30] sm:$0xff]   ;;  %v477_v22 = vld [vmem:[%s3779_s23 + $0x140] sm:$0xff]  ;;  %v3266_v26 = vld [vmem:[#allocation9 + $0x8] sm:$0xff]  }
  0xb1   : > { %774 = vmatprep.subr.bf16.mxu0 %v3547_v0  ;;  %2979 = vmatprep.subr.bf16.mxu1 %v3261_v5  ;;  %v3265_v21 = vld [vmem:[#allocation9 + $0x10] sm:$0xff]   ;;  %v3267_v29 = vld [vmem:[#allocation9] sm:$0xff]  }
  0xb2   : > { %v479_v23 = vld [vmem:[%s3779_s23 + $0x150] sm:$0xff]  ;;  %v486_v32 = vld [vmem:[%s3779_s23 + $0x188] sm:$0xff]  ;;  %v488_v33 = vld [vmem:[%s3779_s23 + $0x198] sm:$0xff] }
  0xb3   : > { %v585_v27 = vpack.c.bf16 %v479_v23, %v477_v22  ;;  %v590_v35 = vpack.c.bf16 %v488_v33, %v486_v32  ;;  %v490_v38 = vld [vmem:[%s3779_s23 + $0x1a8] sm:$0xff]  ;;  %v492_v39 = vld [vmem:[%s3779_s23 + $0x1b8] sm:$0xff]  ;;  %v505_v2 = vld [vmem:[%s3779_s23 + $0x220] sm:$0xff] }
  0xb4   : > { %775 = vmatpush1.bf16.msra.mxu0 %v3249_v9  ;;  %2980 = vmatpush3.bf16.msra.mxu1 %v3261_v5  ;;  %v474_v9 = vld [vmem:[%s3779_s23 + $0x128] sm:$0xff]  ;;  %v592_v41 = vpack.c.bf16 %v492_v39, %v490_v38  ;;  %v496_v45 = vld [vmem:[%s3779_s23 + $0x1d8] sm:$0xff]  ;;  %v525_v32 = vld [vmem:[%s3779_s23 + $0x2c0] sm:$0xff] }
  0xb5   : > { %776 = vmatprep.subr.bf16.mxu0 %v3547_v0  ;;  %2981 = vmatprep.subr.bf16.mxu1 %v3262_v6  ;;  %v494_v44 = vld [vmem:[%s3779_s23 + $0x1c8] sm:$0xff]  ;;  %v500_v51 = vld [vmem:[%s3779_s23 + $0x1f8] sm:$0xff]  ;;  %v527_v33 = vld [vmem:[%s3779_s23 + $0x2d0] sm:$0xff] }
  0xb6   : > { %v594_v47 = vpack.c.bf16 %v496_v45, %v494_v44  ;;  %v498_v50 = vld [vmem:[%s3779_s23 + $0x1e8] sm:$0xff]  ;;  %v504_v57 = vld [vmem:[%s3779_s23 + $0x218] sm:$0xff]  ;;  %v529_v38 = vld [vmem:[%s3779_s23 + $0x2e0] sm:$0xff] }
  0xb7   : > { %v596_v53 = vpack.c.bf16 %v500_v51, %v498_v50  ;;  %v502_v56 = vld [vmem:[%s3779_s23 + $0x208] sm:$0xff]  ;;  %v512_v5 = vld [vmem:[%s3779_s23 + $0x258] sm:$0xff]  ;;  %v531_v39 = vld [vmem:[%s3779_s23 + $0x2f0] sm:$0xff] }
  0xb8   : > { %777 = vmatpush1.bf16.msra.mxu0 %v3250_v10  ;;  %v476_v10 = vld [vmem:[%s3779_s23 + $0x138] sm:$0xff]  ;;  %2982 = vmatpush3.bf16.msra.mxu1 %v3262_v6  ;;  %v598_v59 = vpack.c.bf16 %v504_v57, %v502_v56  ;;  %v506_v62 = vld [vmem:[%s3779_s23 + $0x228] sm:$0xff]  ;;  %v533_v44 = vld [vmem:[%s3779_s23 + $0x300] sm:$0xff] }
  0xb9   : > { %778 = vmatprep.subr.bf16.mxu0 %v3547_v0  ;;  %v522_v22 = vld [vmem:[%s3779_s23 + $0x2a8] sm:$0xff]  ;;  %v524_v23 = vld [vmem:[%s3779_s23 + $0x2b8] sm:$0xff]  ;;  %v535_v45 = vld [vmem:[%s3779_s23 + $0x310] sm:$0xff] }
  0xba   : > { %v537_v51 = vld [vmem:[%s3779_s23 + $0x320] sm:$0xff]  ;;  %v544_v56 = vld [vmem:[%s3779_s23 + $0x358] sm:$0xff] }
  0xbc   : > { %779 = vmatpush1.bf16.msra.mxu0 %v3251_v11  ;;  %v581_v11 = vpack.c.bf16 %v471_v8, %v469_v7  ;;  %v509_v8 = vld [vmem:[%s3779_s23 + $0x240] sm:$0xff] }
  0xbd   : > { %780 = vmatprep.subr.bf16.mxu0 %v3547_v0 }
  0xc0   : > { %781 = vmatpush2.bf16.msra.mxu0 %v3252_v12  ;;  %v584_v12 = vpack.c.bf16 %v476_v10, %v474_v9  ;;  %v511_v9 = vld [vmem:[%s3779_s23 + $0x250] sm:$0xff]  ;;  %v514_v10 = vld [vmem:[%s3779_s23 + $0x268] sm:$0xff] }
  0xc1   : > { %782 = vmatprep.subr.bf16.mxu0 %v3547_v0 }
  0xc4   : > { %783 = vmatpush2.bf16.msra.mxu0 %v3253_v13  ;;  %v3263_v13 = vld [vmem:[#allocation9 + $0x20] sm:$0xff]  }
  0xc5   : > { %784 = vmatprep.subr.bf16.mxu0 %v3547_v0  ;;  %2983 = vmatprep.subr.bf16.mxu1 %v3263_v13 }
  0xc6   : > { %2984 = vmatpush3.bf16.msra.mxu1 %v3263_v13 }
  0xc8   : > { %785 = vmatpush2.bf16.msra.mxu0 %v3254_v14  ;;  %v473_v14 = vld [vmem:[%s3779_s23 + $0x120] sm:$0xff] }
  0xc9   : > { %786 = vmatprep.subr.bf16.mxu0 %v3547_v0 }
  0xcc   : > { %787 = vmatpush2.bf16.msra.mxu0 %v3255_v15  ;;  %v475_v15 = vld [vmem:[%s3779_s23 + $0x130] sm:$0xff] }
  0xcd   : > { %788 = vmatprep.subr.bf16.mxu0 %v3547_v0 }
  0xd0   : > { %789 = vmatpush2.bf16.msra.mxu0 %v3256_v16  ;;  %v478_v16 = vld [vmem:[%s3779_s23 + $0x148] sm:$0xff] }
  0xd1   : > { %790 = vmatprep.subr.bf16.mxu0 %v3547_v0 }
  0xd4   : > { %791 = vmatpush2.bf16.msra.mxu0 %v3257_v17  ;;  %v480_v17 = vld [vmem:[%s3779_s23 + $0x158] sm:$0xff] }
  0xd5   : > { %792 = vmatprep.subr.bf16.mxu0 %v3547_v0  ;;  %v586_v20 = vpack.c.bf16 %v480_v17, %v478_v16  ;;  %v518_v16 = vld [vmem:[%s3779_s23 + $0x288] sm:$0xff]  ;;  %v520_v17 = vld [vmem:[%s3779_s23 + $0x298] sm:$0xff] }
  0xd8   : > { %793 = vmatpush2.bf16.msra.mxu0 %v3258_v18  ;;  %v3264_v18 = vld [vmem:[#allocation9 + $0x18] sm:$0xff]  }
  0xd9   : > { %794 = vmatprep.subr.bf16.mxu0 %v3547_v0  ;;  %v467_v0 = vld [vmem:[%s3779_s23 + $0xf0] sm:$0xff]  ;;  %2985 = vmatprep.subr.bf16.mxu1 %v3264_v18 }
  0xda   : > { %v579_v3 = vpack.c.bf16 %v467_v0, %v465_v63  ;;  %2986 = vmatpush3.bf16.msra.mxu1 %v3264_v18  ;;  %v508_v63 = vld [vmem:[%s3779_s23 + $0x238] sm:$0xff] }
  0xdb   : > { %2987 = vmatprep.subr.bf16.mxu1 %v3265_v21  ;;  %v600_v1 = vpack.c.bf16 %v508_v63, %v506_v62  ;;  %v3913_v63 = vstv %s1118_s2 }
  0xdc   : > { %795 = vmatpush2.bf16.msra.mxu0 %v3259_v19  ;;  %v583_v19 = vpack.c.bf16 %v475_v15, %v473_v14  ;;  %v513_v14 = vld [vmem:[%s3779_s23 + $0x260] sm:$0xff]  ;;  %v515_v15 = vld [vmem:[%s3779_s23 + $0x270] sm:$0xff] }
  0xdd   : > { %v603_v18 = vpack.c.bf16 %v515_v15, %v513_v14 }
  0xde   : > { %2988 = vmatpush3.bf16.msra.mxu1 %v3265_v21  ;;  %v519_v21 = vld [vmem:[%s3779_s23 + $0x290] sm:$0xff] }
  0xdf   : > { %797 = vmatmul.mubr.bf16.vlgmr.msra.gmra.mxu0 %v565_v24  ;;  %v482_v24 = vld [vmem:[%s3779_s23 + $0x168] sm:$0xff]  ;;  %2989 = vmatprep.subr.bf16.mxu1 %v3266_v26 }
  0xe0   : > { %804 = vmatprep.mubr.bf16.mxu0 %v568_v25  ;;  %v484_v25 = vld [vmem:[%s3779_s23 + $0x178] sm:$0xff] }
  0xe1   : > { %v588_v28 = vpack.c.bf16 %v484_v25, %v482_v24  ;;  %v608_v25 = vpack.c.bf16 %v524_v23, %v522_v22  ;;  %v552_v22 = vld [vmem:[%s3779_s23 + $0x398] sm:$0xff] }
  0xe2   : > { %2990 = vmatpush3.bf16.msra.mxu1 %v3266_v26  ;;  %v521_v26 = vld [vmem:[%s3779_s23 + $0x2a0] sm:$0xff] }
  0xe3   : > { %2991 = vmatprep.subr.bf16.mxu1 %v3267_v29 }
  0xe6   : > { %2992 = vmatpush3.bf16.msra.mxu1 %v3267_v29  ;;  %v528_v29 = vld [vmem:[%s3779_s23 + $0x2d8] sm:$0xff] }
  0xe7   : > { %805 = vmatmul.mubr.bf16.gmra.mxu0 %v567_v30  ;;  %v481_v30 = vld [vmem:[%s3779_s23 + $0x160] sm:$0xff] }
  0xe8   : > { %812 = vmatprep.mubr.bf16.mxu0 %v570_v31  ;;  %v483_v31 = vld [vmem:[%s3779_s23 + $0x170] sm:$0xff] }
  0xe9   : > { %v587_v34 = vpack.c.bf16 %v483_v31, %v481_v30 }
  0xef   : > { %813 = vmatmul.mubr.bf16.gmra.mxu0 %v569_v36  ;;  %v485_v36 = vld [vmem:[%s3779_s23 + $0x180] sm:$0xff] }
  0xf0   : > { %820 = vmatprep.mubr.bf16.mxu0 %v572_v37  ;;  %v487_v37 = vld [vmem:[%s3779_s23 + $0x190] sm:$0xff] }
  0xf1   : > { %v589_v40 = vpack.c.bf16 %v487_v37, %v485_v36  ;;  %v609_v36 = vpack.c.bf16 %v527_v33, %v525_v32  ;;  %v549_v33 = vld [vmem:[%s3779_s23 + $0x380] sm:$0xff] }
  0xf7   : > { %821 = vmatmul.mubr.bf16.gmra.mxu0 %v571_v42  ;;  %v489_v42 = vld [vmem:[%s3779_s23 + $0x1a0] sm:$0xff] }
  0xf8   : > { %828 = vmatprep.mubr.bf16.mxu0 %v574_v43  ;;  %v491_v43 = vld [vmem:[%s3779_s23 + $0x1b0] sm:$0xff] }
  0xf9   : > { %v591_v46 = vpack.c.bf16 %v491_v43, %v489_v42  ;;  %v611_v42 = vpack.c.bf16 %v531_v39, %v529_v38 }
  0xff   : > { %829 = vmatmul.mubr.bf16.gmra.mxu0 %v573_v48  ;;  %v493_v48 = vld [vmem:[%s3779_s23 + $0x1c0] sm:$0xff] }
 0x100   : > { %836 = vmatprep.mubr.bf16.mxu0 %v576_v49  ;;  %v495_v49 = vld [vmem:[%s3779_s23 + $0x1d0] sm:$0xff] }
 0x101   : > { %v593_v52 = vpack.c.bf16 %v495_v49, %v493_v48  ;;  %v613_v48 = vpack.c.bf16 %v535_v45, %v533_v44 }
 0x107   : > { %837 = vmatmul.mubr.bf16.gmra.mxu0 %v575_v54  ;;  %v497_v54 = vld [vmem:[%s3779_s23 + $0x1e0] sm:$0xff] }
 0x108   : > { %844 = vmatprep.mubr.bf16.mxu0 %v578_v55  ;;  %v499_v55 = vld [vmem:[%s3779_s23 + $0x1f0] sm:$0xff] }
 0x109   : > { %v595_v58 = vpack.c.bf16 %v499_v55, %v497_v54  ;;  %v542_v55 = vld [vmem:[%s3779_s23 + $0x348] sm:$0xff] }
 0x10f   : > { %845 = vmatmul.mubr.bf16.gmra.mxu0 %v577_v60  ;;  %v501_v60 = vld [vmem:[%s3779_s23 + $0x200] sm:$0xff] }
 0x110   : > { %852 = vmatprep.mubr.bf16.mxu0 %v580_v61  ;;  %v503_v61 = vld [vmem:[%s3779_s23 + $0x210] sm:$0xff] }
 0x111   : > { %v597_v0 = vpack.c.bf16 %v503_v61, %v501_v60  ;;  %v618_v61 = vpack.c.bf16 %v544_v56, %v542_v55 }
 0x117   : > { %853 = vmatmul.mubr.bf16.gmra.mxu0 %v579_v3  ;;  %v507_v3 = vld [vmem:[%s3779_s23 + $0x230] sm:$0xff] }
 0x118   : > { %860 = vmatprep.mubr.bf16.mxu0 %v582_v4  ;;  %v510_v4 = vld [vmem:[%s3779_s23 + $0x248] sm:$0xff]  ;;  %v599_v6 = vpack.c.bf16 %v507_v3, %v505_v2  ;;  %v541_v3 = vld [vmem:[%s3779_s23 + $0x340] sm:$0xff] }
 0x119   : > { %v602_v7 = vpack.c.bf16 %v512_v5, %v510_v4  ;;  %v543_v4 = vld [vmem:[%s3779_s23 + $0x350] sm:$0xff] }
 0x11f   : > { %861 = vmatmul.mubr.bf16.gmra.mxu0 %v581_v11  ;;  %v516_v11 = vld [vmem:[%s3779_s23 + $0x278] sm:$0xff] }
 0x120   : > { %868 = vmatprep.mubr.bf16.mxu0 %v584_v12  ;;  %v601_v12 = vpack.c.bf16 %v511_v9, %v509_v8  ;;  %v604_v13 = vpack.c.bf16 %v516_v11, %v514_v10  ;;  %v617_v10 = vpack.c.bf16 %v543_v4, %v541_v3  ;;  %v562_v4 = vld [vmem:[%s3779_s23 + $0x3e8] sm:$0xff] }
 0x127   : > { %869 = vmatmul.mubr.bf16.gmra.mxu0 %v583_v19  ;;  %v606_v19 = vpack.c.bf16 %v520_v17, %v518_v16 }
 0x128   : > { %876 = vmatprep.mubr.bf16.mxu0 %v586_v20  ;;  %v517_v20 = vld [vmem:[%s3779_s23 + $0x280] sm:$0xff] }
 0x129   : > { %v605_v24 = vpack.c.bf16 %v519_v21, %v517_v20  ;;  %v550_v21 = vld [vmem:[%s3779_s23 + $0x388] sm:$0xff] }
 0x12f   : > { %877 = vmatmul.mubr.bf16.gmra.mxu0 %v585_v27  ;;  %v523_v27 = vld [vmem:[%s3779_s23 + $0x2b0] sm:$0xff] }
 0x130   : > { %884 = vmatprep.mubr.bf16.mxu0 %v588_v28  ;;  %v526_v28 = vld [vmem:[%s3779_s23 + $0x2c8] sm:$0xff]  ;;  %v607_v30 = vpack.c.bf16 %v523_v27, %v521_v26 }
 0x131   : > { %v610_v31 = vpack.c.bf16 %v528_v29, %v526_v28  ;;  %v622_v28 = vpack.c.bf16 %v552_v22, %v550_v21 }
 0x137   : > { %885 = vmatmul.mubr.bf16.gmra.mxu0 %v587_v34  ;;  %v530_v34 = vld [vmem:[%s3779_s23 + $0x2e8] sm:$0xff] }
 0x138   : > { %892 = vmatprep.mubr.bf16.mxu0 %v590_v35  ;;  %v532_v35 = vld [vmem:[%s3779_s23 + $0x2f8] sm:$0xff] }
 0x139   : > { %v612_v37 = vpack.c.bf16 %v532_v35, %v530_v34  ;;  %v551_v34 = vld [vmem:[%s3779_s23 + $0x390] sm:$0xff] }
 0x13f   : > { %893 = vmatmul.mubr.bf16.gmra.mxu0 %v589_v40  ;;  %v534_v40 = vld [vmem:[%s3779_s23 + $0x308] sm:$0xff] }
 0x140   : > { %900 = vmatprep.mubr.bf16.mxu0 %v592_v41  ;;  %v536_v41 = vld [vmem:[%s3779_s23 + $0x318] sm:$0xff] }
 0x141   : > { %v614_v43 = vpack.c.bf16 %v536_v41, %v534_v40  ;;  %v621_v40 = vpack.c.bf16 %v551_v34, %v549_v33 }
 0x147   : > { %901 = vmatmul.mubr.bf16.gmra.mxu0 %v591_v46  ;;  %v538_v46 = vld [vmem:[%s3779_s23 + $0x328] sm:$0xff] }
 0x148   : > { %908 = vmatprep.mubr.bf16.mxu0 %v594_v47  ;;  %v540_v47 = vld [vmem:[%s3779_s23 + $0x338] sm:$0xff] }
 0x149   : > { %v616_v49 = vpack.c.bf16 %v540_v47, %v538_v46 }
 0x14f   : > { %909 = vmatmul.mubr.bf16.gmra.mxu0 %v593_v52  ;;  %v539_v52 = vld [vmem:[%s3779_s23 + $0x330] sm:$0xff] }
 0x150   : > { %916 = vmatprep.mubr.bf16.mxu0 %v596_v53  ;;  %v3907_v53 = vld [vmem:[#allocation8] ss:$0 sm:$0xff] }
 0x157   : > { %917 = vmatmul.mubr.bf16.gmra.mxu0 %v595_v58  ;;  %v615_v58 = vpack.c.bf16 %v539_v52, %v537_v51  ;;  %v558_v51 = vld [vmem:[%s3779_s23 + $0x3c8] sm:$0xff]  ;;  %v560_v52 = vld [vmem:[%s3779_s23 + $0x3d8] sm:$0xff] }
 0x158   : > { %924 = vmatprep.mubr.bf16.mxu0 %v598_v59 }
 0x15f   : > { %925 = vmatmul.mubr.bf16.gmra.mxu0 %v597_v0 }
 0x160   : > { %932 = vmatprep.mubr.bf16.mxu0 %v600_v1 }
 0x167   : > { %933 = vmatmul.mubr.bf16.gmra.mxu0 %v599_v6  ;;  %v546_v6 = vld [vmem:[%s3779_s23 + $0x368] sm:$0xff] }
 0x168   : > { %940 = vmatprep.mubr.bf16.mxu0 %v602_v7  ;;  %v548_v7 = vld [vmem:[%s3779_s23 + $0x378] sm:$0xff] }
 0x16f   : > { %941 = vmatmul.mubr.bf16.gmra.mxu0 %v601_v12 }
 0x170   : > { %948 = vmatprep.mubr.bf16.mxu0 %v604_v13  ;;  %v620_v13 = vpack.c.bf16 %v548_v7, %v546_v6 }
 0x177   : > { %949 = vmatmul.mubr.bf16.gmra.mxu0 %v603_v18  ;;  %v545_v18 = vld [vmem:[%s3779_s23 + $0x360] sm:$0xff] }
 0x178   : > { %956 = vmatprep.mubr.bf16.mxu0 %v606_v19  ;;  %v547_v19 = vld [vmem:[%s3779_s23 + $0x370] sm:$0xff] }
 0x17f   : > { %957 = vmatmul.mubr.bf16.gmra.mxu0 %v605_v24 }
 0x180   : > { %964 = vmatprep.mubr.bf16.mxu0 %v608_v25  ;;  %v619_v25 = vpack.c.bf16 %v547_v19, %v545_v18 }
 0x187   : > { %965 = vmatmul.mubr.bf16.gmra.mxu0 %v607_v30 }
 0x188   : > { %972 = vmatprep.mubr.bf16.mxu0 %v610_v31 }
 0x18f   : > { %973 = vmatmul.mubr.bf16.gmra.mxu0 %v609_v36  ;;  %v554_v36 = vld [vmem:[%s3779_s23 + $0x3a8] sm:$0xff] }
 0x190   : > { %980 = vmatprep.mubr.bf16.mxu0 %v612_v37  ;;  %v556_v37 = vld [vmem:[%s3779_s23 + $0x3b8] sm:$0xff] }
 0x197   : > { %981 = vmatmul.mubr.bf16.gmra.mxu0 %v611_v42 }
 0x198   : > { %988 = vmatprep.mubr.bf16.mxu0 %v614_v43  ;;  %v624_v43 = vpack.c.bf16 %v556_v37, %v554_v36 }
 0x19f   : > { %v798_v50 = vpop.f32.mrf.mxu0  ;;  %989 = vmatmul.mubr.bf16.gmra.mxu0 %v613_v48  ;;  %v553_v48 = vld [vmem:[%s3779_s23 + $0x3a0] sm:$0xff] }
 0x1a0   : > { %996 = vmatprep.mubr.bf16.mxu0 %v616_v49  ;;  %v799_v59 = vadd.f32 %v3907_v53, %v798_v50  ;;  %v555_v49 = vld [vmem:[%s3779_s23 + $0x3b0] sm:$0xff] }
 0x1a1   : > { %v800_v54 = vpop.f32.mrf.mxu0  ;;  %v623_v56 = vpack.c.bf16 %v555_v49, %v553_v48 }
 0x1a3   : > { %v801_v57 = vpop.f32.mrf.mxu0 }
 0x1a4   : > { %v802_v60 = vadd.f32 %v3907_v53, %v801_v57 }
 0x1a5   : > { %v803_v62 = vpop.f32.mrf.mxu0 }
 0x1a6   : > { %v1053_v0 = vpack.c.bf16 %v802_v60, %v799_v59  ;;  %v626_v59 = vpack.c.bf16 %v560_v52, %v558_v51 }
 0x1a7   : > { %v806_v1 = vpop.f32.mrf.mxu0  ;;  %997 = vmatmul.mubr.bf16.gmra.mxu0 %v615_v58 }
 0x1a8   : > { %vm1085_vm0 = vcmp.ge.bf16.partialorder %v1053_v0, 0  ;;  %v1121_v2 = vmul.bf16 %v3913_v63, %v1053_v0  ;;  %1004 = vmatprep.mubr.bf16.mxu0 %v618_v61  ;;  %v807_v11 = vadd.f32 %v3907_v53, %v806_v1  ;;  %v557_v1 = vld [vmem:[%s3779_s23 + $0x3c0] sm:$0xff] }
 0x1a9   : > { %v808_v5 = vpop.f32.mrf.mxu0 }
 0x1aa   : > { %v1153_v8 = vsel %vm1085_vm0, %v1053_v0, %v1121_v2  ;;  %v559_v2 = vld [vmem:[%s3779_s23 + $0x3d0] sm:$0xff]  ;;  %v564_v5 = vld [vmem:[%s3779_s23 + $0x3f8] sm:$0xff] }
 0x1ab   : > { %v809_v9 = vpop.f32.mrf.mxu0  ;;  %2993 = vmatprep.mubr.bf16.mxu1 %v1153_v8  ;;  %v625_v8 = vpack.c.bf16 %v559_v2, %v557_v1 }
 0x1ac   : > { %v810_v12 = vadd.f32 %v3907_v53, %v809_v9 }
 0x1ad   : > { %v811_v14 = vpop.f32.mrf.mxu0 }
 0x1ae   : > { %v1054_v15 = vpack.c.bf16 %v810_v12, %v807_v11  ;;  %v628_v11 = vpack.c.bf16 %v564_v5, %v562_v4 }
 0x1af   : > { %v814_v16 = vpop.f32.mrf.mxu0  ;;  %1005 = vmatmul.mubr.bf16.gmra.mxu0 %v617_v10 }
 0x1b0   : > { %vm1086_vm1 = vcmp.ge.bf16.partialorder %v1054_v15, 0  ;;  %v1122_v17 = vmul.bf16 %v3913_v63, %v1054_v15  ;;  %1012 = vmatprep.mubr.bf16.mxu0 %v620_v13  ;;  %v815_v26 = vadd.f32 %v3907_v53, %v814_v16  ;;  %v561_v16 = vld [vmem:[%s3779_s23 + $0x3e0] sm:$0xff] }
 0x1b1   : > { %v816_v20 = vpop.f32.mrf.mxu0 }
 0x1b2   : > { %v1154_v23 = vsel %vm1086_vm1, %v1054_v15, %v1122_v17  ;;  %v563_v17 = vld [vmem:[%s3779_s23 + $0x3f0] sm:$0xff] }
 0x1b3   : > { %v817_v24 = vpop.f32.mrf.mxu0  ;;  %2994 = vmatmul.mubr.bf16.vlgmr.msra.gmra.mxu1 %v1154_v23  ;;  %v627_v21 = vpack.c.bf16 %v563_v17, %v561_v16 }
 0x1b4   : > { %v818_v27 = vadd.f32 %v3907_v53, %v817_v24 }
 0x1b5   : > { %v819_v29 = vpop.f32.mrf.mxu0 }
 0x1b6   : > { %v1055_v30 = vpack.c.bf16 %v818_v27, %v815_v26 }
 0x1b7   : > { %v822_v31 = vpop.f32.mrf.mxu0  ;;  %1013 = vmatmul.mubr.bf16.gmra.mxu0 %v619_v25 }
 0x1b8   : > { %vm1087_vm2 = vcmp.ge.bf16.partialorder %v1055_v30, 0  ;;  %v1123_v32 = vmul.bf16 %v3913_v63, %v1055_v30  ;;  %1020 = vmatprep.mubr.bf16.mxu0 %v622_v28  ;;  %v823_v41 = vadd.f32 %v3907_v53, %v822_v31 }
 0x1b9   : > { %v824_v35 = vpop.f32.mrf.mxu0 }
 0x1ba   : > { %v1155_v38 = vsel %vm1087_vm2, %v1055_v30, %v1123_v32 }
 0x1bb   : > { %v825_v39 = vpop.f32.mrf.mxu0  ;;  %2997 = vmatprep.mubr.bf16.mxu1 %v1155_v38 }
 0x1bc   : > { %v826_v42 = vadd.f32 %v3907_v53, %v825_v39 }
 0x1bd   : > { %v827_v44 = vpop.f32.mrf.mxu0 }
 0x1be   : > { %v1056_v45 = vpack.c.bf16 %v826_v42, %v823_v41 }
 0x1bf   : > { %v830_v46 = vpop.f32.mrf.mxu0  ;;  %1021 = vmatmul.mubr.bf16.gmra.mxu0 %v621_v40 }
 0x1c0   : > { %vm1088_vm3 = vcmp.ge.bf16.partialorder %v1056_v45, 0  ;;  %v1124_v47 = vmul.bf16 %v3913_v63, %v1056_v45  ;;  %1028 = vmatprep.mubr.bf16.mxu0 %v624_v43  ;;  %v831_v57 = vadd.f32 %v3907_v53, %v830_v46 }
 0x1c1   : > { %v832_v50 = vpop.f32.mrf.mxu0 }
 0x1c2   : > { %v1156_v54 = vsel %vm1088_vm3, %v1056_v45, %v1124_v47 }
 0x1c3   : > { %v833_v55 = vpop.f32.mrf.mxu0  ;;  %2998 = vmatmul.mubr.bf16.gmra.mxu1 %v1156_v54 }
 0x1c4   : > { %v834_v58 = vadd.f32 %v3907_v53, %v833_v55 }
 0x1c5   : > { %v835_v60 = vpop.f32.mrf.mxu0 }
 0x1c6   : > { %v1057_v61 = vpack.c.bf16 %v834_v58, %v831_v57 }
 0x1c7   : > { %v838_v62 = vpop.f32.mrf.mxu0  ;;  %1029 = vmatmul.mubr.bf16.gmra.mxu0 %v623_v56 }
 0x1c8   : > { %vm1089_vm4 = vcmp.ge.bf16.partialorder %v1057_v61, 0  ;;  %v1125_v0 = vmul.bf16 %v3913_v63, %v1057_v61  ;;  %1036 = vmatprep.mubr.bf16.mxu0 %v626_v59  ;;  %v839_v9 = vadd.f32 %v3907_v53, %v838_v62 }
 0x1c9   : > { %v840_v3 = vpop.f32.mrf.mxu0 }
 0x1ca   : > { %v1157_v6 = vsel %vm1089_vm4, %v1057_v61, %v1125_v0 }
 0x1cb   : > { %v841_v7 = vpop.f32.mrf.mxu0  ;;  %3001 = vmatprep.mubr.bf16.mxu1 %v1157_v6 }
 0x1cc   : > { %v842_v10 = vadd.f32 %v3907_v53, %v841_v7  ;;  %v3268_v7 = vld [vmem:[#allocation12 + $0x38] sm:$0xff]  }
 0x1cd   : > { %v843_v12 = vpop.f32.mrf.mxu0  ;;  %3057 = vmatprep.subr.bf16.mxu1 %v3268_v7 }
 0x1ce   : > { %v1058_v13 = vpack.c.bf16 %v842_v10, %v839_v9  ;;  %3058 = vmatpush3.bf16.msra.mxu1 %v3268_v7 }
 0x1cf   : > { %v846_v14 = vpop.f32.mrf.mxu0  ;;  %1037 = vmatmul.mubr.bf16.gmra.mxu0 %v625_v8 }
 0x1d0   : > { %vm1090_vm5 = vcmp.ge.bf16.partialorder %v1058_v13, 0  ;;  %v1126_v15 = vmul.bf16 %v3913_v63, %v1058_v13  ;;  %1044 = vmatprep.mubr.bf16.mxu0 %v628_v11  ;;  %v847_v22 = vadd.f32 %v3907_v53, %v846_v14 }
 0x1d1   : > { %v848_v18 = vpop.f32.mrf.mxu0 }
 0x1d2   : > { %v1158_v19 = vsel %vm1090_vm5, %v1058_v13, %v1126_v15 }
 0x1d3   : > { %v849_v20 = vpop.f32.mrf.mxu0  ;;  %3002 = vmatmul.mubr.bf16.gmra.mxu1 %v1158_v19 }
 0x1d4   : > { %v850_v23 = vadd.f32 %v3907_v53, %v849_v20 }
 0x1d5   : > { %v851_v24 = vpop.f32.mrf.mxu0 }
 0x1d6   : > { %v1059_v25 = vpack.c.bf16 %v850_v23, %v847_v22 }
 0x1d7   : > { %v854_v26 = vpop.f32.mrf.mxu0  ;;  %1045 = vmatmul.mubr.bf16.gmra.mxu0 %v627_v21 }
 0x1d8   : > { %vm1091_vm6 = vcmp.ge.bf16.partialorder %v1059_v25, 0  ;;  %v1127_v27 = vmul.bf16 %v3913_v63, %v1059_v25  ;;  %v855_v31 = vadd.f32 %v3907_v53, %v854_v26  ;;  %v3269_v26 = vld [vmem:[#allocation12 + $0x30] sm:$0xff]  }
 0x1d9   : > { %v856_v28 = vpop.f32.mrf.mxu0  ;;  %3059 = vmatprep.subr.bf16.mxu1 %v3269_v26 }
 0x1da   : > { %v1159_v29 = vsel %vm1091_vm6, %v1059_v25, %v1127_v27  ;;  %3060 = vmatpush3.bf16.msra.mxu1 %v3269_v26 }
 0x1db   : > { %v857_v30 = vpop.f32.mrf.mxu0  ;;  %3005 = vmatprep.mubr.bf16.mxu1 %v1159_v29 }
 0x1dc   : > { %v858_v32 = vadd.f32 %v3907_v53, %v857_v30 }
 0x1dd   : > { %v859_v33 = vpop.f32.mrf.mxu0 }
 0x1de   : > { %v1060_v34 = vpack.c.bf16 %v858_v32, %v855_v31  ;;  %v3270_v32 = vld [vmem:[#allocation12 + $0x28] sm:$0xff]  }
 0x1df   : > { %v862_v35 = vpop.f32.mrf.mxu0  ;;  %3061 = vmatprep.subr.bf16.mxu1 %v3270_v32 }
 0x1e0   : > { %vm1092_vm7 = vcmp.ge.bf16.partialorder %v1060_v34, 0  ;;  %v1128_v36 = vmul.bf16 %v3913_v63, %v1060_v34  ;;  %v863_v40 = vadd.f32 %v3907_v53, %v862_v35  ;;  %3062 = vmatpush3.bf16.msra.mxu1 %v3270_v32 }
 0x1e1   : > { %v864_v37 = vpop.f32.mrf.mxu0 }
 0x1e2   : > { %v1160_v38 = vsel %vm1092_vm7, %v1060_v34, %v1128_v36 }
 0x1e3   : > { %v865_v39 = vpop.f32.mrf.mxu0  ;;  %3006 = vmatmul.mubr.bf16.gmra.mxu1 %v1160_v38  ;;  %v3271_v38 = vld [vmem:[#allocation12 + $0x20] sm:$0xff]  }
 0x1e4   : > { %v866_v41 = vadd.f32 %v3907_v53, %v865_v39  ;;  %3063 = vmatprep.subr.bf16.mxu1 %v3271_v38 }
 0x1e5   : > { %v867_v42 = vpop.f32.mrf.mxu0  ;;  %3064 = vmatpush3.bf16.msra.mxu1 %v3271_v38 }
 0x1e6   : > { %v1061_v43 = vpack.c.bf16 %v866_v41, %v863_v40 }
 0x1e7   : > { %v870_v44 = vpop.f32.mrf.mxu0 }
 0x1e8   : > { %vm1093_vm8 = vcmp.ge.bf16.partialorder %v1061_v43, 0  ;;  %v1129_v45 = vmul.bf16 %v3913_v63, %v1061_v43  ;;  %v871_v49 = vadd.f32 %v3907_v53, %v870_v44 }
 0x1e9   : > { %v872_v46 = vpop.f32.mrf.mxu0 }
 0x1ea   : > { %v1161_v47 = vsel %vm1093_vm8, %v1061_v43, %v1129_v45  ;;  %v3272_v43 = vld [vmem:[#allocation12 + $0x18] sm:$0xff]  }
 0x1eb   : > { %v873_v48 = vpop.f32.mrf.mxu0  ;;  %3009 = vmatprep.mubr.bf16.mxu1 %v1161_v47  ;;  %3065 = vmatprep.subr.bf16.mxu1 %v3272_v43 }
 0x1ec   : > { %v874_v50 = vadd.f32 %v3907_v53, %v873_v48  ;;  %3066 = vmatpush3.bf16.msra.mxu1 %v3272_v43 }
 0x1ed   : > { %v875_v51 = vpop.f32.mrf.mxu0 }
 0x1ee   : > { %v1062_v52 = vpack.c.bf16 %v874_v50, %v871_v49  ;;  %v3273_v49 = vld [vmem:[#allocation12 + $0x10] sm:$0xff]  }
 0x1ef   : > { %v878_v54 = vpop.f32.mrf.mxu0  ;;  %3067 = vmatprep.subr.bf16.mxu1 %v3273_v49 }
 0x1f0   : > { %vm1094_vm9 = vcmp.ge.bf16.partialorder %v1062_v52, 0  ;;  %v1130_v55 = vmul.bf16 %v3913_v63, %v1062_v52  ;;  %v879_v59 = vadd.f32 %v3907_v53, %v878_v54  ;;  %3068 = vmatpush3.bf16.msra.mxu1 %v3273_v49 }
 0x1f1   : > { %v880_v56 = vpop.f32.mrf.mxu0 }
 0x1f2   : > { %v1162_v57 = vsel %vm1094_vm9, %v1062_v52, %v1130_v55  ;;  %v3274_v55 = vld [vmem:[#allocation12 + $0x8] sm:$0xff]  }
 0x1f3   : > { %v881_v58 = vpop.f32.mrf.mxu0  ;;  %3010 = vmatmul.mubr.bf16.gmra.mxu1 %v1162_v57  ;;  %3069 = vmatprep.subr.bf16.mxu1 %v3274_v55 }
 0x1f4   : > { %v882_v60 = vadd.f32 %v3907_v53, %v881_v58  ;;  %3070 = vmatpush3.bf16.msra.mxu1 %v3274_v55 }
 0x1f5   : > { %v883_v61 = vpop.f32.mrf.mxu0 }
 0x1f6   : > { %v1063_v62 = vpack.c.bf16 %v882_v60, %v879_v59  ;;  %v3275_v61 = vld [vmem:[#allocation12] sm:$0xff]  }
 0x1f7   : > { %v886_v0 = vpop.f32.mrf.mxu0  ;;  %3071 = vmatprep.subr.bf16.mxu1 %v3275_v61 }
 0x1f8   : > { %vm1095_vm10 = vcmp.ge.bf16.partialorder %v1063_v62, 0  ;;  %v1131_v1 = vmul.bf16 %v3913_v63, %v1063_v62  ;;  %v887_v5 = vadd.f32 %v3907_v53, %v886_v0  ;;  %3072 = vmatpush3.bf16.msra.mxu1 %v3275_v61 }
 0x1f9   : > { %v888_v2 = vpop.f32.mrf.mxu0 }
 0x1fa   : > { %v1163_v3 = vsel %vm1095_vm10, %v1063_v62, %v1131_v1 }
 0x1fb   : > { %v889_v4 = vpop.f32.mrf.mxu0  ;;  %3013 = vmatprep.mubr.bf16.mxu1 %v1163_v3 }
 0x1fc   : > { %v890_v6 = vadd.f32 %v3907_v53, %v889_v4 }
 0x1fd   : > { %v891_v8 = vpop.f32.mrf.mxu0 }
 0x1fe   : > { %v1064_v9 = vpack.c.bf16 %v890_v6, %v887_v5 }
 0x1ff   : > { %v894_v10 = vpop.f32.mrf.mxu0 }
 0x200   : > { %vm1096_vm11 = vcmp.ge.bf16.partialorder %v1064_v9, 0  ;;  %v1132_v11 = vmul.bf16 %v3913_v63, %v1064_v9  ;;  %v895_v15 = vadd.f32 %v3907_v53, %v894_v10 }
 0x201   : > { %v896_v12 = vpop.f32.mrf.mxu0 }
 0x202   : > { %v1164_v13 = vsel %vm1096_vm11, %v1064_v9, %v1132_v11 }
 0x203   : > { %v897_v14 = vpop.f32.mrf.mxu0  ;;  %3014 = vmatmul.mubr.bf16.gmra.mxu1 %v1164_v13 }
 0x204   : > { %v898_v16 = vadd.f32 %v3907_v53, %v897_v14 }
 0x205   : > { %v899_v17 = vpop.f32.mrf.mxu0 }
 0x206   : > { %v1065_v18 = vpack.c.bf16 %v898_v16, %v895_v15 }
 0x207   : > { %v902_v19 = vpop.f32.mrf.mxu0 }
 0x208   : > { %vm1097_vm12 = vcmp.ge.bf16.partialorder %v1065_v18, 0  ;;  %v1133_v20 = vmul.bf16 %v3913_v63, %v1065_v18  ;;  %v903_v24 = vadd.f32 %v3907_v53, %v902_v19 }
 0x209   : > { %v904_v21 = vpop.f32.mrf.mxu0 }
 0x20a   : > { %v1165_v22 = vsel %vm1097_vm12, %v1065_v18, %v1133_v20 }
 0x20b   : > { %v905_v23 = vpop.f32.mrf.mxu0  ;;  %3017 = vmatprep.mubr.bf16.mxu1 %v1165_v22 }
 0x20c   : > { %v906_v25 = vadd.f32 %v3907_v53, %v905_v23 }
 0x20d   : > { %v907_v27 = vpop.f32.mrf.mxu0 }
 0x20e   : > { %v1066_v28 = vpack.c.bf16 %v906_v25, %v903_v24 }
 0x20f   : > { %v910_v29 = vpop.f32.mrf.mxu0 }
 0x210   : > { %vm1098_vm13 = vcmp.ge.bf16.partialorder %v1066_v28, 0  ;;  %v1134_v30 = vmul.bf16 %v3913_v63, %v1066_v28  ;;  %v911_v35 = vadd.f32 %v3907_v53, %v910_v29 }
 0x211   : > { %v912_v31 = vpop.f32.mrf.mxu0 }
 0x212   : > { %v1166_v33 = vsel %vm1098_vm13, %v1066_v28, %v1134_v30 }
 0x213   : > { %v913_v34 = vpop.f32.mrf.mxu0  ;;  %3018 = vmatmul.mubr.bf16.gmra.mxu1 %v1166_v33 }
 0x214   : > { %v914_v36 = vadd.f32 %v3907_v53, %v913_v34 }
 0x215   : > { %v915_v37 = vpop.f32.mrf.mxu0 }
 0x216   : > { %v1067_v39 = vpack.c.bf16 %v914_v36, %v911_v35 }
 0x217   : > { %v918_v40 = vpop.f32.mrf.mxu0 }
 0x218   : > { %vm1099_vm14 = vcmp.ge.bf16.partialorder %v1067_v39, 0  ;;  %v1135_v41 = vmul.bf16 %v3913_v63, %v1067_v39  ;;  %v919_v46 = vadd.f32 %v3907_v53, %v918_v40 }
 0x219   : > { %v920_v42 = vpop.f32.mrf.mxu0 }
 0x21a   : > { %v1167_v44 = vsel %vm1099_vm14, %v1067_v39, %v1135_v41 }
 0x21b   : > { %v921_v45 = vpop.f32.mrf.mxu0  ;;  %3021 = vmatprep.mubr.bf16.mxu1 %v1167_v44 }
 0x21c   : > { %v922_v47 = vadd.f32 %v3907_v53, %v921_v45 }
 0x21d   : > { %v923_v48 = vpop.f32.mrf.mxu0 }
 0x21e   : > { %v1068_v50 = vpack.c.bf16 %v922_v47, %v919_v46 }
 0x21f   : > { %v926_v51 = vpop.f32.mrf.mxu0 }
 0x220   : > { %vm1100_vm15 = vcmp.ge.bf16.partialorder %v1068_v50, 0  ;;  %v1136_v52 = vmul.bf16 %v3913_v63, %v1068_v50  ;;  %v927_v58 = vadd.f32 %v3907_v53, %v926_v51 }
 0x221   : > { %v928_v54 = vpop.f32.mrf.mxu0 }
 0x222   : > { %v1168_v56 = vsel %vm1100_vm15, %v1068_v50, %v1136_v52 }
 0x223   : > { %v929_v57 = vpop.f32.mrf.mxu0  ;;  %3022 = vmatmul.mubr.bf16.gmra.mxu1 %v1168_v56 }
 0x224   : > { %v930_v59 = vadd.f32 %v3907_v53, %v929_v57 }
 0x225   : > { %v931_v60 = vpop.f32.mrf.mxu0 }
 0x226   : > { %v1069_v62 = vpack.c.bf16 %v930_v59, %v927_v58 }
 0x227   : > { %v934_v0 = vpop.f32.mrf.mxu0 }
 0x228   : > { %vm1101_vm0 = vcmp.ge.bf16.partialorder %v1069_v62, 0  ;;  %v1137_v1 = vmul.bf16 %v3913_v63, %v1069_v62  ;;  %v935_v5 = vadd.f32 %v3907_v53, %v934_v0 }
 0x229   : > { %v936_v2 = vpop.f32.mrf.mxu0 }
 0x22a   : > { %v1169_v3 = vsel %vm1101_vm0, %v1069_v62, %v1137_v1 }
 0x22b   : > { %v937_v4 = vpop.f32.mrf.mxu0  ;;  %3025 = vmatprep.mubr.bf16.mxu1 %v1169_v3 }
 0x22c   : > { %v938_v6 = vadd.f32 %v3907_v53, %v937_v4 }
 0x22d   : > { %v939_v7 = vpop.f32.mrf.mxu0 }
 0x22e   : > { %v1070_v8 = vpack.c.bf16 %v938_v6, %v935_v5 }
 0x22f   : > { %v942_v9 = vpop.f32.mrf.mxu0 }
 0x230   : > { %vm1102_vm1 = vcmp.ge.bf16.partialorder %v1070_v8, 0  ;;  %v1138_v10 = vmul.bf16 %v3913_v63, %v1070_v8  ;;  %v943_v14 = vadd.f32 %v3907_v53, %v942_v9 }
 0x231   : > { %v944_v11 = vpop.f32.mrf.mxu0 }
 0x232   : > { %v1170_v12 = vsel %vm1102_vm1, %v1070_v8, %v1138_v10 }
 0x233   : > { %v945_v13 = vpop.f32.mrf.mxu0  ;;  %3026 = vmatmul.mubr.bf16.gmra.mxu1 %v1170_v12 }
 0x234   : > { %v946_v15 = vadd.f32 %v3907_v53, %v945_v13 }
 0x235   : > { %v947_v16 = vpop.f32.mrf.mxu0 }
 0x236   : > { %v1071_v17 = vpack.c.bf16 %v946_v15, %v943_v14 }
 0x237   : > { %v950_v18 = vpop.f32.mrf.mxu0 }
 0x238   : > { %vm1103_vm2 = vcmp.ge.bf16.partialorder %v1071_v17, 0  ;;  %v1139_v19 = vmul.bf16 %v3913_v63, %v1071_v17  ;;  %v951_v23 = vadd.f32 %v3907_v53, %v950_v18 }
 0x239   : > { %v952_v20 = vpop.f32.mrf.mxu0 }
 0x23a   : > { %v1171_v21 = vsel %vm1103_vm2, %v1071_v17, %v1139_v19 }
 0x23b   : > { %v953_v22 = vpop.f32.mrf.mxu0  ;;  %3029 = vmatprep.mubr.bf16.mxu1 %v1171_v21 }
 0x23c   : > { %v954_v24 = vadd.f32 %v3907_v53, %v953_v22 }
 0x23d   : > { %v955_v25 = vpop.f32.mrf.mxu0 }
 0x23e   : > { %v1072_v26 = vpack.c.bf16 %v954_v24, %v951_v23 }
 0x23f   : > { %v958_v27 = vpop.f32.mrf.mxu0 }
 0x240   : > { %vm1104_vm3 = vcmp.ge.bf16.partialorder %v1072_v26, 0  ;;  %v1140_v28 = vmul.bf16 %v3913_v63, %v1072_v26  ;;  %v959_v32 = vadd.f32 %v3907_v53, %v958_v27 }
 0x241   : > { %v960_v29 = vpop.f32.mrf.mxu0 }
 0x242   : > { %v1172_v30 = vsel %vm1104_vm3, %v1072_v26, %v1140_v28 }
 0x243   : > { %v961_v31 = vpop.f32.mrf.mxu0  ;;  %3030 = vmatmul.mubr.bf16.gmra.mxu1 %v1172_v30 }
 0x244   : > { %v962_v33 = vadd.f32 %v3907_v53, %v961_v31 }
 0x245   : > { %v963_v34 = vpop.f32.mrf.mxu0 }
 0x246   : > { %v1073_v35 = vpack.c.bf16 %v962_v33, %v959_v32 }
 0x247   : > { %v966_v36 = vpop.f32.mrf.mxu0 }
 0x248   : > { %vm1105_vm4 = vcmp.ge.bf16.partialorder %v1073_v35, 0  ;;  %v1141_v37 = vmul.bf16 %v3913_v63, %v1073_v35  ;;  %v967_v41 = vadd.f32 %v3907_v53, %v966_v36 }
 0x249   : > { %v968_v38 = vpop.f32.mrf.mxu0 }
 0x24a   : > { %v1173_v39 = vsel %vm1105_vm4, %v1073_v35, %v1141_v37 }
 0x24b   : > { %v969_v40 = vpop.f32.mrf.mxu0  ;;  %3033 = vmatprep.mubr.bf16.mxu1 %v1173_v39 }
 0x24c   : > { %v970_v42 = vadd.f32 %v3907_v53, %v969_v40 }
 0x24d   : > { %v971_v43 = vpop.f32.mrf.mxu0 }
 0x24e   : > { %v1074_v44 = vpack.c.bf16 %v970_v42, %v967_v41 }
 0x24f   : > { %v974_v45 = vpop.f32.mrf.mxu0 }
 0x250   : > { %vm1106_vm5 = vcmp.ge.bf16.partialorder %v1074_v44, 0  ;;  %v1142_v46 = vmul.bf16 %v3913_v63, %v1074_v44  ;;  %v975_v50 = vadd.f32 %v3907_v53, %v974_v45 }
 0x251   : > { %v976_v47 = vpop.f32.mrf.mxu0 }
 0x252   : > { %v1174_v48 = vsel %vm1106_vm5, %v1074_v44, %v1142_v46 }
 0x253   : > { %v977_v49 = vpop.f32.mrf.mxu0  ;;  %3034 = vmatmul.mubr.bf16.gmra.mxu1 %v1174_v48 }
 0x254   : > { %v978_v51 = vadd.f32 %v3907_v53, %v977_v49 }
 0x255   : > { %v979_v52 = vpop.f32.mrf.mxu0 }
 0x256   : > { %v1075_v54 = vpack.c.bf16 %v978_v51, %v975_v50 }
 0x257   : > { %v982_v55 = vpop.f32.mrf.mxu0 }
 0x258   : > { %vm1107_vm6 = vcmp.ge.bf16.partialorder %v1075_v54, 0  ;;  %v1143_v56 = vmul.bf16 %v3913_v63, %v1075_v54  ;;  %v983_v60 = vadd.f32 %v3907_v53, %v982_v55 }
 0x259   : > { %v984_v57 = vpop.f32.mrf.mxu0 }
 0x25a   : > { %v1175_v58 = vsel %vm1107_vm6, %v1075_v54, %v1143_v56 }
 0x25b   : > { %v985_v59 = vpop.f32.mrf.mxu0  ;;  %3037 = vmatprep.mubr.bf16.mxu1 %v1175_v58 }
 0x25c   : > { %v986_v61 = vadd.f32 %v3907_v53, %v985_v59 }
 0x25d   : > { %v987_v62 = vpop.f32.mrf.mxu0 }
 0x25e   : > { %v1076_v0 = vpack.c.bf16 %v986_v61, %v983_v60 }
 0x25f   : > { %v990_v1 = vpop.f32.mrf.mxu0 }
 0x260   : > { %vm1108_vm7 = vcmp.ge.bf16.partialorder %v1076_v0, 0  ;;  %v1144_v2 = vmul.bf16 %v3913_v63, %v1076_v0  ;;  %v991_v6 = vadd.f32 %v3907_v53, %v990_v1 }
 0x261   : > { %v992_v3 = vpop.f32.mrf.mxu0 }
 0x262   : > { %v1176_v4 = vsel %vm1108_vm7, %v1076_v0, %v1144_v2 }
 0x263   : > { %v993_v5 = vpop.f32.mrf.mxu0  ;;  %3038 = vmatmul.mubr.bf16.gmra.mxu1 %v1176_v4 }
 0x264   : > { %v994_v7 = vadd.f32 %v3907_v53, %v993_v5 }
 0x265   : > { %v995_v8 = vpop.f32.mrf.mxu0 }
 0x266   : > { %v1077_v9 = vpack.c.bf16 %v994_v7, %v991_v6 }
 0x267   : > { %v998_v10 = vpop.f32.mrf.mxu0 }
 0x268   : > { %vm1109_vm8 = vcmp.ge.bf16.partialorder %v1077_v9, 0  ;;  %v1145_v11 = vmul.bf16 %v3913_v63, %v1077_v9  ;;  %v999_v15 = vadd.f32 %v3907_v53, %v998_v10  ;;  %v4031_v10 = vld [vmem:[#allocation11] ss:$0 sm:$0xff] }
 0x269   : > { %v1000_v12 = vpop.f32.mrf.mxu0 }
 0x26a   : > { %v1177_v13 = vsel %vm1109_vm8, %v1077_v9, %v1145_v11 }
 0x26b   : > { %v1001_v14 = vpop.f32.mrf.mxu0  ;;  %3041 = vmatprep.mubr.bf16.mxu1 %v1177_v13 }
 0x26c   : > { %v1002_v16 = vadd.f32 %v3907_v53, %v1001_v14 }
 0x26d   : > { %v1003_v17 = vpop.f32.mrf.mxu0 }
 0x26e   : > { %v1078_v18 = vpack.c.bf16 %v1002_v16, %v999_v15 }
 0x26f   : > { %v1006_v19 = vpop.f32.mrf.mxu0 }
 0x270   : > { %vm1110_vm9 = vcmp.ge.bf16.partialorder %v1078_v18, 0  ;;  %v1146_v20 = vmul.bf16 %v3913_v63, %v1078_v18  ;;  %v1007_v24 = vadd.f32 %v3907_v53, %v1006_v19 }
 0x271   : > { %v1008_v21 = vpop.f32.mrf.mxu0 }
 0x272   : > { %v1178_v22 = vsel %vm1110_vm9, %v1078_v18, %v1146_v20 }
 0x273   : > { %v1009_v23 = vpop.f32.mrf.mxu0  ;;  %3042 = vmatmul.mubr.bf16.gmra.mxu1 %v1178_v22  ;;  %v4016_v30 = vpop.f32.mrf.mxu1 }
 0x274   : > { %v1010_v25 = vadd.f32 %v3907_v53, %v1009_v23 }
 0x275   : > { %v1011_v26 = vpop.f32.mrf.mxu0  ;;  %v1290_v36 = vpop.f32.mrf.mxu1 }
 0x276   : > { %v1079_v27 = vpack.c.bf16 %v1010_v25, %v1007_v24  ;;  %v1291_v15 = vadd.f32 %v4031_v10, %v1290_v36 }
 0x277   : > { %v1014_v28 = vpop.f32.mrf.mxu0  ;;  %v2996_v41 = vpop.f32.mrf.mxu1 }
 0x278   : > { %vm1111_vm10 = vcmp.ge.bf16.partialorder %v1079_v27, 0  ;;  %v1147_v29 = vmul.bf16 %v3913_v63, %v1079_v27  ;;  %v1015_v34 = vadd.f32 %v3907_v53, %v1014_v28  ;;  %v1302_v25 = vadd.f32 %v2996_v41, %v4031_v10 }
 0x279   : > { %v1016_v31 = vpop.f32.mrf.mxu0  ;;  %v1293_v47 = vpop.f32.mrf.mxu1 }
 0x27a   : > { %v1179_v32 = vsel %vm1111_vm10, %v1079_v27, %v1147_v29  ;;  %v1294_v12 = vadd.f32 %v4031_v10, %v1293_v47  ;;  %v1299_v29 = vadd.f32 %v4016_v30, %v4031_v10 }
 0x27b   : > { %v1017_v33 = vpop.f32.mrf.mxu0  ;;  %3045 = vmatprep.mubr.bf16.mxu1 %v1179_v32 }
 0x27c   : > { %v1018_v35 = vadd.f32 %v3907_v53, %v1017_v33  ;;  %v1545_v19 = vpack.c.bf16 %v1294_v12, %v1291_v15 }
 0x27d   : > { %v1019_v37 = vpop.f32.mrf.mxu0 }
 0x27e   : > { %v1080_v38 = vpack.c.bf16 %v1018_v35, %v1015_v34  ;;  %v1609_v28 = vmul.bf16 %v1545_v19, %v3913_v63  ;;  %vm1577_vm0 = vcmp.ge.bf16.partialorder %v1545_v19, 0 }
 0x27f   : > { %v1022_v39 = vpop.f32.mrf.mxu0 }
 0x280   : > { %vm1112_vm11 = vcmp.ge.bf16.partialorder %v1080_v38, 0  ;;  %v1148_v40 = vmul.bf16 %v3913_v63, %v1080_v38  ;;  %v1023_v45 = vadd.f32 %v3907_v53, %v1022_v39  ;;  %v1641_v37 = vsel %vm1577_vm0, %v1545_v19, %v1609_v28 }
 0x281   : > { %v1024_v42 = vpop.f32.mrf.mxu0 }
 0x282   : > { %v1180_v43 = vsel %vm1112_vm11, %v1080_v38, %v1148_v40 }
 0x283   : > { %v1025_v44 = vpop.f32.mrf.mxu0  ;;  %3046 = vmatmul.mubr.bf16.gmra.mxu1 %v1180_v43  ;;  %v4023_v50 = vpop.f32.mrf.mxu1 }
 0x284   : > { %v1026_v46 = vadd.f32 %v3907_v53, %v1025_v44  ;;  %v1315_v42 = vadd.f32 %v4023_v50, %v4031_v10 }
 0x285   : > { %v1027_v48 = vpop.f32.mrf.mxu0  ;;  %v1306_v56 = vpop.f32.mrf.mxu1 }
 0x286   : > { %v1081_v49 = vpack.c.bf16 %v1026_v46, %v1023_v45  ;;  %v1307_v32 = vadd.f32 %v4031_v10, %v1306_v56 }
 0x287   : > { %v1030_v51 = vpop.f32.mrf.mxu0  ;;  %v3000_v62 = vpop.f32.mrf.mxu1 }
 0x288   : > { %vm1113_vm12 = vcmp.ge.bf16.partialorder %v1081_v49, 0  ;;  %v1149_v52 = vmul.bf16 %v3913_v63, %v1081_v49  ;;  %v1031_v58 = vadd.f32 %v3907_v53, %v1030_v51  ;;  %v1318_v40 = vadd.f32 %v3000_v62, %v4031_v10 }
 0x289   : > { %v1032_v54 = vpop.f32.mrf.mxu0  ;;  %v1309_v4 = vpop.f32.mrf.mxu1 }
 0x28a   : > { %v1181_v55 = vsel %vm1113_vm12, %v1081_v49, %v1149_v52  ;;  %v1310_v27 = vadd.f32 %v4031_v10, %v1309_v4  ;;  %v1548_v45 = vpack.c.bf16 %v1318_v40, %v1315_v42 }
 0x28b   : > { %v1033_v57 = vpop.f32.mrf.mxu0  ;;  %3049 = vmatprep.mubr.bf16.mxu1 %v1181_v55 }
 0x28c   : > { %v1034_v59 = vadd.f32 %v3907_v53, %v1033_v57  ;;  %v1547_v35 = vpack.c.bf16 %v1310_v27, %v1307_v32  ;;  %v1612_v52 = vmul.bf16 %v1548_v45, %v3913_v63  ;;  %vm1580_vm3 = vcmp.ge.bf16.partialorder %v1548_v45, 0 }
 0x28d   : > { %v1035_v60 = vpop.f32.mrf.mxu0 }
 0x28e   : > { %v1082_v61 = vpack.c.bf16 %v1034_v59, %v1031_v58  ;;  %v1611_v41 = vmul.bf16 %v1547_v35, %v3913_v63  ;;  %vm1579_vm2 = vcmp.ge.bf16.partialorder %v1547_v35, 0  ;;  %v1644_v58 = vsel %vm1580_vm3, %v1548_v45, %v1612_v52 }
 0x28f   : > { %v1038_v0 = vpop.f32.mrf.mxu0 }
 0x290   : > { %vm1114_vm13 = vcmp.ge.bf16.partialorder %v1082_v61, 0  ;;  %v1150_v1 = vmul.bf16 %v3913_v63, %v1082_v61  ;;  %v1039_v6 = vadd.f32 %v3907_v53, %v1038_v0  ;;  %v1643_v48 = vsel %vm1579_vm2, %v1547_v35, %v1611_v41 }
 0x291   : > { %v1040_v2 = vpop.f32.mrf.mxu0 }
 0x292   : > { %v1182_v3 = vsel %vm1114_vm13, %v1082_v61, %v1150_v1 }
 0x293   : > { %v1041_v5 = vpop.f32.mrf.mxu0  ;;  %3050 = vmatmul.mubr.bf16.gmra.mxu1 %v1182_v3  ;;  %v3003_v8 = vpop.f32.mrf.mxu1 }
 0x294   : > { %v1042_v7 = vadd.f32 %v3907_v53, %v1041_v5  ;;  %v1331_v55 = vadd.f32 %v3003_v8, %v4031_v10 }
 0x295   : > { %v1043_v9 = vpop.f32.mrf.mxu0  ;;  %v1322_v16 = vpop.f32.mrf.mxu1 }
 0x296   : > { %v1083_v11 = vpack.c.bf16 %v1042_v7, %v1039_v6  ;;  %v1323_v44 = vadd.f32 %v4031_v10, %v1322_v16 }
 0x297   : > { %v1046_v13 = vpop.f32.mrf.mxu0  ;;  %v3004_v23 = vpop.f32.mrf.mxu1 }
 0x298   : > { %vm1115_vm14 = vcmp.ge.bf16.partialorder %v1083_v11, 0  ;;  %v1151_v14 = vmul.bf16 %v3913_v63, %v1083_v11  ;;  %v1047_v21 = vadd.f32 %v3907_v53, %v1046_v13  ;;  %v1334_v51 = vadd.f32 %v3004_v23, %v4031_v10 }
 0x299   : > { %v1048_v17 = vpop.f32.mrf.mxu0  ;;  %v1325_v33 = vpop.f32.mrf.mxu1 }
 0x29a   : > { %v1183_v18 = vsel %vm1115_vm14, %v1083_v11, %v1151_v14  ;;  %v1326_v30 = vadd.f32 %v4031_v10, %v1325_v33  ;;  %v1550_v57 = vpack.c.bf16 %v1334_v51, %v1331_v55 }
 0x29b   : > { %v1049_v20 = vpop.f32.mrf.mxu0  ;;  %3053 = vmatprep.mubr.bf16.mxu1 %v1183_v18 }
 0x29c   : > { %v1050_v22 = vadd.f32 %v3907_v53, %v1049_v20  ;;  %v1546_v53 = vpack.c.bf16 %v1302_v25, %v1299_v29  ;;  %v1549_v47 = vpack.c.bf16 %v1326_v30, %v1323_v44  ;;  %v1614_v1 = vmul.bf16 %v1550_v57, %v3913_v63 }
 0x29d   : > { %v1051_v24 = vpop.f32.mrf.mxu0  ;;  %vm1582_vm5 = vcmp.ge.bf16.partialorder %v1550_v57, 0 }
 0x29e   : > { %v1084_v26 = vpack.c.bf16 %v1050_v22, %v1047_v21  ;;  %v1610_v39 = vmul.bf16 %v1546_v53, %v3913_v63  ;;  %vm1578_vm1 = vcmp.ge.bf16.partialorder %v1546_v53, 0  ;;  %v1613_v50 = vmul.bf16 %v1549_v47, %v3913_v63 }
 0x29f   : > { %vm1581_vm4 = vcmp.ge.bf16.partialorder %v1549_v47, 0  ;;  %v1646_v9 = vsel %vm1582_vm5, %v1550_v57, %v1614_v1 }
 0x2a0   : > { %vm1116_vm15 = vcmp.ge.bf16.partialorder %v1084_v26, 0  ;;  %v1152_v31 = vmul.bf16 %v3913_v63, %v1084_v26  ;;  %v1642_v46 = vsel %vm1578_vm1, %v1546_v53, %v1610_v39  ;;  %v1645_v61 = vsel %vm1581_vm4, %v1549_v47, %v1613_v50 }
 0x2a2   : > { %v1184_v34 = vsel %vm1116_vm15, %v1084_v26, %v1152_v31 }
 0x2a3   : > { %v3007_v36 = vpop.f32.mrf.mxu1  ;;  %3054 = vmatmul.mubr.bf16.gmra.mxu1 %v1184_v34 }
 0x2a4   : > { %3073 = vmatprep.mubr.bf16.mxu1 %v1641_v37  ;;  %v1347_v4 = vadd.f32 %v3007_v36, %v4031_v10 }
 0x2a5   : > { %v1338_v38 = vpop.f32.mrf.mxu1 }
 0x2a6   : > { %v1339_v56 = vadd.f32 %v4031_v10, %v1338_v38 }
 0x2a7   : > { %v3008_v43 = vpop.f32.mrf.mxu1 }
 0x2a8   : > { %v1350_v0 = vadd.f32 %v3008_v43, %v4031_v10 }
 0x2a9   : > { %v1341_v49 = vpop.f32.mrf.mxu1 }
 0x2aa   : > { %v1342_v54 = vadd.f32 %v4031_v10, %v1341_v49  ;;  %v1552_v6 = vpack.c.bf16 %v1350_v0, %v1347_v4 }
 0x2ab   : > { %3074 = vmatmul.mubr.bf16.vlgmr.msra.gmra.mxu1 %v1642_v46 }
 0x2ac   : > { %3077 = vmatprep.mubr.bf16.mxu1 %v1643_v48  ;;  %v1551_v59 = vpack.c.bf16 %v1342_v54, %v1339_v56  ;;  %v1616_v14 = vmul.bf16 %v1552_v6, %v3913_v63  ;;  %vm1584_vm7 = vcmp.ge.bf16.partialorder %v1552_v6, 0 }
 0x2ae   : > { %v1615_v3 = vmul.bf16 %v1551_v59, %v3913_v63  ;;  %vm1583_vm6 = vcmp.ge.bf16.partialorder %v1551_v59, 0  ;;  %v1648_v18 = vsel %vm1584_vm7, %v1552_v6, %v1616_v14 }
 0x2b0   : > { %v1647_v11 = vsel %vm1583_vm6, %v1551_v59, %v1615_v3 }
 0x2b3   : > { %v3011_v60 = vpop.f32.mrf.mxu1  ;;  %3078 = vmatmul.mubr.bf16.gmra.mxu1 %v1644_v58 }
 0x2b4   : > { %3081 = vmatprep.mubr.bf16.mxu1 %v1645_v61  ;;  %v1363_v16 = vadd.f32 %v3011_v60, %v4031_v10 }
 0x2b5   : > { %v1354_v62 = vpop.f32.mrf.mxu1 }
 0x2b6   : > { %v1355_v7 = vadd.f32 %v4031_v10, %v1354_v62 }
 0x2b7   : > { %v3012_v2 = vpop.f32.mrf.mxu1 }
 0x2b8   : > { %v1366_v13 = vadd.f32 %v3012_v2, %v4031_v10 }
 0x2b9   : > { %v1357_v5 = vpop.f32.mrf.mxu1 }
 0x2ba   : > { %v1358_v8 = vadd.f32 %v4031_v10, %v1357_v5  ;;  %v1554_v17 = vpack.c.bf16 %v1366_v13, %v1363_v16 }
 0x2bb   : > { %3082 = vmatmul.mubr.bf16.gmra.mxu1 %v1646_v9 }
 0x2bc   : > { %v1553_v12 = vpack.c.bf16 %v1358_v8, %v1355_v7  ;;  %3085 = vmatprep.mubr.bf16.mxu1 %v1647_v11  ;;  %v1618_v22 = vmul.bf16 %v1554_v17, %v3913_v63  ;;  %vm1586_vm9 = vcmp.ge.bf16.partialorder %v1554_v17, 0 }
 0x2be   : > { %v1617_v15 = vmul.bf16 %v1553_v12, %v3913_v63  ;;  %vm1585_vm8 = vcmp.ge.bf16.partialorder %v1553_v12, 0  ;;  %v1650_v31 = vsel %vm1586_vm9, %v1554_v17, %v1618_v22 }
 0x2c0   : > { %v1649_v20 = vsel %vm1585_vm8, %v1553_v12, %v1617_v15 }
 0x2c3   : > { %v3015_v19 = vpop.f32.mrf.mxu1  ;;  %3086 = vmatmul.mubr.bf16.gmra.mxu1 %v1648_v18 }
 0x2c4   : > { %3089 = vmatprep.mubr.bf16.mxu1 %v1649_v20  ;;  %v1379_v24 = vadd.f32 %v3015_v19, %v4031_v10 }
 0x2c5   : > { %v1370_v21 = vpop.f32.mrf.mxu1 }
 0x2c6   : > { %v1371_v27 = vadd.f32 %v4031_v10, %v1370_v21 }
 0x2c7   : > { %v3016_v23 = vpop.f32.mrf.mxu1 }
 0x2c8   : > { %v1382_v25 = vadd.f32 %v3016_v23, %v4031_v10 }
 0x2c9   : > { %v1373_v26 = vpop.f32.mrf.mxu1 }
 0x2ca   : > { %v1556_v28 = vpack.c.bf16 %v1382_v25, %v1379_v24  ;;  %v1374_v29 = vadd.f32 %v4031_v10, %v1373_v26 }
 0x2cb   : > { %3090 = vmatmul.mubr.bf16.gmra.mxu1 %v1650_v31 }
 0x2cc   : > { %v1555_v32 = vpack.c.bf16 %v1374_v29, %v1371_v27  ;;  %v1620_v53 = vmul.bf16 %v1556_v28, %v3913_v63  ;;  %vm1588_vm11 = vcmp.ge.bf16.partialorder %v1556_v28, 0 }
 0x2ce   : > { %vm1587_vm10 = vcmp.ge.bf16.partialorder %v1555_v32, 0  ;;  %v1619_v33 = vmul.bf16 %v1555_v32, %v3913_v63  ;;  %v1652_v35 = vsel %vm1588_vm11, %v1556_v28, %v1620_v53 }
 0x2d0   : > { %v1651_v34 = vsel %vm1587_vm10, %v1555_v32, %v1619_v33 }
 0x2d1   : > { %3093 = vmatprep.mubr.bf16.mxu1 %v1651_v34 }
 0x2d3   : > { %v3019_v36 = vpop.f32.mrf.mxu1  ;;  %3094 = vmatmul.mubr.bf16.gmra.mxu1 %v1652_v35 }
 0x2d4   : > { %v1395_v39 = vadd.f32 %v3019_v36, %v4031_v10 }
 0x2d5   : > { %v1386_v37 = vpop.f32.mrf.mxu1 }
 0x2d6   : > { %v1387_v41 = vadd.f32 %v4031_v10, %v1386_v37 }
 0x2d7   : > { %v3020_v38 = vpop.f32.mrf.mxu1 }
 0x2d8   : > { %v1398_v40 = vadd.f32 %v3020_v38, %v4031_v10 }
 0x2d9   : > { %v1389_v30 = vpop.f32.mrf.mxu1 }
 0x2da   : > { %v1558_v42 = vpack.c.bf16 %v1398_v40, %v1395_v39  ;;  %v1390_v43 = vadd.f32 %v4031_v10, %v1389_v30 }
 0x2dc   : > { %v1557_v44 = vpack.c.bf16 %v1390_v43, %v1387_v41  ;;  %v1622_v45 = vmul.bf16 %v1558_v42, %v3913_v63  ;;  %vm1590_vm13 = vcmp.ge.bf16.partialorder %v1558_v42, 0 }
 0x2de   : > { %vm1589_vm12 = vcmp.ge.bf16.partialorder %v1557_v44, 0  ;;  %v1621_v46 = vmul.bf16 %v1557_v44, %v3913_v63  ;;  %v1654_v48 = vsel %vm1590_vm13, %v1558_v42, %v1622_v45 }
 0x2e0   : > { %v1653_v47 = vsel %vm1589_vm12, %v1557_v44, %v1621_v46 }
 0x2e1   : > { %3097 = vmatprep.mubr.bf16.mxu1 %v1653_v47 }
 0x2e2   : > { %3098 = vmatmul.mubr.bf16.gmra.mxu1 %v1654_v48 }
 0x2e3   : > { %v3023_v49 = vpop.f32.mrf.mxu1 }
 0x2e4   : > { %v1411_v54 = vadd.f32 %v3023_v49, %v4031_v10 }
 0x2e5   : > { %v1402_v51 = vpop.f32.mrf.mxu1 }
 0x2e6   : > { %v1403_v56 = vadd.f32 %v4031_v10, %v1402_v51 }
 0x2e7   : > { %v3024_v52 = vpop.f32.mrf.mxu1 }
 0x2e8   : > { %v1414_v50 = vadd.f32 %v3024_v52, %v4031_v10 }
 0x2e9   : > { %v1405_v55 = vpop.f32.mrf.mxu1 }
 0x2ea   : > { %v1560_v57 = vpack.c.bf16 %v1414_v50, %v1411_v54  ;;  %v1406_v58 = vadd.f32 %v4031_v10, %v1405_v55 }
 0x2ec   : > { %v1559_v59 = vpack.c.bf16 %v1406_v58, %v1403_v56  ;;  %v1624_v60 = vmul.bf16 %v1560_v57, %v3913_v63  ;;  %vm1592_vm15 = vcmp.ge.bf16.partialorder %v1560_v57, 0 }
 0x2ee   : > { %vm1591_vm14 = vcmp.ge.bf16.partialorder %v1559_v59, 0  ;;  %v1623_v61 = vmul.bf16 %v1559_v59, %v3913_v63  ;;  %v1656_v0 = vsel %vm1592_vm15, %v1560_v57, %v1624_v60 }
 0x2f0   : > { %v1655_v62 = vsel %vm1591_vm14, %v1559_v59, %v1623_v61 }
 0x2f1   : > { %3101 = vmatprep.mubr.bf16.mxu1 %v1655_v62 }
 0x2f2   : > { %3102 = vmatmul.mubr.bf16.gmra.mxu1 %v1656_v0 }
 0x2f3   : > { %v3027_v1 = vpop.f32.mrf.mxu1 }
 0x2f4   : > { %v1427_v4 = vadd.f32 %v3027_v1, %v4031_v10 }
 0x2f5   : > { %v1418_v2 = vpop.f32.mrf.mxu1 }
 0x2f6   : > { %v1419_v7 = vadd.f32 %v4031_v10, %v1418_v2 }
 0x2f7   : > { %v3028_v3 = vpop.f32.mrf.mxu1 }
 0x2f8   : > { %v1430_v5 = vadd.f32 %v3028_v3, %v4031_v10 }
 0x2f9   : > { %v1421_v6 = vpop.f32.mrf.mxu1 }
 0x2fa   : > { %v1562_v8 = vpack.c.bf16 %v1430_v5, %v1427_v4  ;;  %v1422_v9 = vadd.f32 %v4031_v10, %v1421_v6 }
 0x2fc   : > { %v1561_v11 = vpack.c.bf16 %v1422_v9, %v1419_v7  ;;  %v1626_v12 = vmul.bf16 %v1562_v8, %v3913_v63  ;;  %vm1594_vm1 = vcmp.ge.bf16.partialorder %v1562_v8, 0 }
 0x2fe   : > { %vm1593_vm0 = vcmp.ge.bf16.partialorder %v1561_v11, 0  ;;  %v1625_v13 = vmul.bf16 %v1561_v11, %v3913_v63  ;;  %v1658_v15 = vsel %vm1594_vm1, %v1562_v8, %v1626_v12 }
 0x300   : > { %v1657_v14 = vsel %vm1593_vm0, %v1561_v11, %v1625_v13 }
 0x301   : > { %3105 = vmatprep.mubr.bf16.mxu1 %v1657_v14 }
 0x302   : > { %3106 = vmatmul.mubr.bf16.gmra.mxu1 %v1658_v15 }
 0x303   : > { %v3031_v16 = vpop.f32.mrf.mxu1 }
 0x304   : > { %v1443_v19 = vadd.f32 %v3031_v16, %v4031_v10 }
 0x305   : > { %v1434_v17 = vpop.f32.mrf.mxu1 }
 0x306   : > { %v1435_v22 = vadd.f32 %v4031_v10, %v1434_v17 }
 0x307   : > { %v3032_v18 = vpop.f32.mrf.mxu1 }
 0x308   : > { %v1446_v20 = vadd.f32 %v3032_v18, %v4031_v10 }
 0x309   : > { %v1437_v21 = vpop.f32.mrf.mxu1 }
 0x30a   : > { %v1564_v23 = vpack.c.bf16 %v1446_v20, %v1443_v19  ;;  %v1438_v24 = vadd.f32 %v4031_v10, %v1437_v21 }
 0x30c   : > { %v1563_v25 = vpack.c.bf16 %v1438_v24, %v1435_v22  ;;  %v1628_v26 = vmul.bf16 %v1564_v23, %v3913_v63  ;;  %vm1596_vm3 = vcmp.ge.bf16.partialorder %v1564_v23, 0 }
 0x30e   : > { %vm1595_vm2 = vcmp.ge.bf16.partialorder %v1563_v25, 0  ;;  %v1627_v27 = vmul.bf16 %v1563_v25, %v3913_v63  ;;  %v1660_v29 = vsel %vm1596_vm3, %v1564_v23, %v1628_v26 }
 0x310   : > { %v1659_v28 = vsel %vm1595_vm2, %v1563_v25, %v1627_v27 }
 0x311   : > { %3109 = vmatprep.mubr.bf16.mxu1 %v1659_v28 }
 0x312   : > { %3110 = vmatmul.mubr.bf16.gmra.mxu1 %v1660_v29 }
 0x313   : > { %v3035_v31 = vpop.f32.mrf.mxu1 }
 0x314   : > { %v1459_v53 = vadd.f32 %v3035_v31, %v4031_v10 }
 0x315   : > { %v1450_v32 = vpop.f32.mrf.mxu1 }
 0x316   : > { %v1451_v36 = vadd.f32 %v4031_v10, %v1450_v32 }
 0x317   : > { %v3036_v33 = vpop.f32.mrf.mxu1 }
 0x318   : > { %v1462_v34 = vadd.f32 %v3036_v33, %v4031_v10 }
 0x319   : > { %v1453_v35 = vpop.f32.mrf.mxu1 }
 0x31a   : > { %v1566_v37 = vpack.c.bf16 %v1462_v34, %v1459_v53  ;;  %v1454_v38 = vadd.f32 %v4031_v10, %v1453_v35 }
 0x31c   : > { %v1565_v39 = vpack.c.bf16 %v1454_v38, %v1451_v36  ;;  %v1630_v40 = vmul.bf16 %v1566_v37, %v3913_v63  ;;  %vm1598_vm5 = vcmp.ge.bf16.partialorder %v1566_v37, 0 }
 0x31e   : > { %vm1597_vm4 = vcmp.ge.bf16.partialorder %v1565_v39, 0  ;;  %v1629_v30 = vmul.bf16 %v1565_v39, %v3913_v63  ;;  %v1662_v42 = vsel %vm1598_vm5, %v1566_v37, %v1630_v40 }
 0x320   : > { %v1661_v41 = vsel %vm1597_vm4, %v1565_v39, %v1629_v30 }
 0x321   : > { %3113 = vmatprep.mubr.bf16.mxu1 %v1661_v41 }
 0x322   : > { %3114 = vmatmul.mubr.bf16.gmra.mxu1 %v1662_v42 }
 0x323   : > { %v3039_v43 = vpop.f32.mrf.mxu1 }
 0x324   : > { %v1475_v46 = vadd.f32 %v3039_v43, %v4031_v10 }
 0x325   : > { %v1466_v44 = vpop.f32.mrf.mxu1 }
 0x326   : > { %v1467_v49 = vadd.f32 %v4031_v10, %v1466_v44 }
 0x327   : > { %v3040_v45 = vpop.f32.mrf.mxu1 }
 0x328   : > { %v1478_v47 = vadd.f32 %v3040_v45, %v4031_v10 }
 0x329   : > { %v1469_v48 = vpop.f32.mrf.mxu1 }
 0x32a   : > { %v1568_v51 = vpack.c.bf16 %v1478_v47, %v1475_v46  ;;  %v1470_v52 = vadd.f32 %v4031_v10, %v1469_v48 }
 0x32c   : > { %v1567_v54 = vpack.c.bf16 %v1470_v52, %v1467_v49  ;;  %v1632_v50 = vmul.bf16 %v1568_v51, %v3913_v63  ;;  %vm1600_vm7 = vcmp.ge.bf16.partialorder %v1568_v51, 0  ;;  %v4134_v49 = vld [vmem:[#allocation14] ss:$0 sm:$0xff] }
 0x32e   : > { %vm1599_vm6 = vcmp.ge.bf16.partialorder %v1567_v54, 0  ;;  %v1631_v55 = vmul.bf16 %v1567_v54, %v3913_v63  ;;  %v1664_v57 = vsel %vm1600_vm7, %v1568_v51, %v1632_v50 }
 0x330   : > { %v1663_v56 = vsel %vm1599_vm6, %v1567_v54, %v1631_v55 }
 0x331   : > { %3117 = vmatprep.mubr.bf16.mxu1 %v1663_v56 }
 0x332   : > { %3118 = vmatmul.mubr.bf16.gmra.mxu1 %v1664_v57 }
 0x333   : > { %v3043_v58 = vpop.f32.mrf.mxu1 }
 0x334   : > { %v1491_v61 = vadd.f32 %v3043_v58, %v4031_v10 }
 0x335   : > { %v1482_v59 = vpop.f32.mrf.mxu1 }
 0x336   : > { %v1483_v1 = vadd.f32 %v4031_v10, %v1482_v59 }
 0x337   : > { %v3044_v60 = vpop.f32.mrf.mxu1 }
 0x338   : > { %v1494_v62 = vadd.f32 %v3044_v60, %v4031_v10 }
 0x339   : > { %v1485_v0 = vpop.f32.mrf.mxu1 }
 0x33a   : > { %v1570_v2 = vpack.c.bf16 %v1494_v62, %v1491_v61  ;;  %v1486_v3 = vadd.f32 %v4031_v10, %v1485_v0 }
 0x33c   : > { %v1569_v4 = vpack.c.bf16 %v1486_v3, %v1483_v1  ;;  %v1634_v5 = vmul.bf16 %v1570_v2, %v3913_v63  ;;  %vm1602_vm9 = vcmp.ge.bf16.partialorder %v1570_v2, 0 }
 0x33e   : > { %vm1601_vm8 = vcmp.ge.bf16.partialorder %v1569_v4, 0  ;;  %v1633_v6 = vmul.bf16 %v1569_v4, %v3913_v63  ;;  %v1666_v8 = vsel %vm1602_vm9, %v1570_v2, %v1634_v5 }
 0x340   : > { %v1665_v7 = vsel %vm1601_vm8, %v1569_v4, %v1633_v6 }
 0x341   : > { %3121 = vmatprep.mubr.bf16.mxu1 %v1665_v7 }
 0x342   : > { %3122 = vmatmul.mubr.bf16.gmra.mxu1 %v1666_v8 }
 0x343   : > { %v3047_v9 = vpop.f32.mrf.mxu1 }
 0x344   : > { %v1507_v13 = vadd.f32 %v3047_v9, %v4031_v10 }
 0x345   : > { %v1498_v11 = vpop.f32.mrf.mxu1 }
 0x346   : > { %v1499_v16 = vadd.f32 %v4031_v10, %v1498_v11 }
 0x347   : > { %v3048_v12 = vpop.f32.mrf.mxu1 }
 0x348   : > { %v1510_v14 = vadd.f32 %v3048_v12, %v4031_v10 }
 0x349   : > { %v1501_v15 = vpop.f32.mrf.mxu1 }
 0x34a   : > { %v1572_v17 = vpack.c.bf16 %v1510_v14, %v1507_v13  ;;  %v1502_v18 = vadd.f32 %v4031_v10, %v1501_v15 }
 0x34c   : > { %v1571_v19 = vpack.c.bf16 %v1502_v18, %v1499_v16  ;;  %v1636_v20 = vmul.bf16 %v1572_v17, %v3913_v63  ;;  %vm1604_vm11 = vcmp.ge.bf16.partialorder %v1572_v17, 0 }
 0x34e   : > { %vm1603_vm10 = vcmp.ge.bf16.partialorder %v1571_v19, 0  ;;  %v1635_v21 = vmul.bf16 %v1571_v19, %v3913_v63  ;;  %v1668_v23 = vsel %vm1604_vm11, %v1572_v17, %v1636_v20 }
 0x350   : > { %v1667_v22 = vsel %vm1603_vm10, %v1571_v19, %v1635_v21 }
 0x351   : > { %3125 = vmatprep.mubr.bf16.mxu1 %v1667_v22 }
 0x352   : > { %3126 = vmatmul.mubr.bf16.gmra.mxu1 %v1668_v23 }
 0x353   : > { %v3051_v24 = vpop.f32.mrf.mxu1 }
 0x354   : > { %v1523_v27 = vadd.f32 %v3051_v24, %v4031_v10 }
 0x355   : > { %v1514_v25 = vpop.f32.mrf.mxu1 }
 0x356   : > { %v1515_v31 = vadd.f32 %v4031_v10, %v1514_v25 }
 0x357   : > { %v3052_v26 = vpop.f32.mrf.mxu1 }
 0x358   : > { %v1526_v28 = vadd.f32 %v3052_v26, %v4031_v10 }
 0x359   : > { %v1517_v29 = vpop.f32.mrf.mxu1 }
 0x35a   : > { %v1574_v32 = vpack.c.bf16 %v1526_v28, %v1523_v27  ;;  %v1518_v33 = vadd.f32 %v4031_v10, %v1517_v29 }
 0x35c   : > { %v1573_v53 = vpack.c.bf16 %v1518_v33, %v1515_v31  ;;  %v1638_v34 = vmul.bf16 %v1574_v32, %v3913_v63  ;;  %vm1606_vm13 = vcmp.ge.bf16.partialorder %v1574_v32, 0 }
 0x35e   : > { %vm1605_vm12 = vcmp.ge.bf16.partialorder %v1573_v53, 0  ;;  %v1637_v35 = vmul.bf16 %v1573_v53, %v3913_v63  ;;  %v1670_v37 = vsel %vm1606_vm13, %v1574_v32, %v1638_v34 }
 0x360   : > { %v1669_v36 = vsel %vm1605_vm12, %v1573_v53, %v1637_v35 }
 0x361   : > { %3129 = vmatprep.mubr.bf16.mxu1 %v1669_v36 }
 0x362   : > { %3130 = vmatmul.mubr.bf16.gmra.mxu1 %v1670_v37 }
 0x363   : > { %v3055_v38 = vpop.f32.mrf.mxu1 }
 0x364   : > { %v1539_v30 = vadd.f32 %v3055_v38, %v4031_v10 }
 0x365   : > { %v1530_v39 = vpop.f32.mrf.mxu1 }
 0x366   : > { %v1531_v43 = vadd.f32 %v4031_v10, %v1530_v39 }
 0x367   : > { %v3056_v40 = vpop.f32.mrf.mxu1 }
 0x368   : > { %v1542_v41 = vadd.f32 %v3056_v40, %v4031_v10 }
 0x369   : > { %v1533_v42 = vpop.f32.mrf.mxu1 }
 0x36a   : > { %v1576_v44 = vpack.c.bf16 %v1542_v41, %v1539_v30  ;;  %v1534_v45 = vadd.f32 %v4031_v10, %v1533_v42 }
 0x36b   : > { %v3075_v46 = vpop.f32.mrf.mxu1 }
 0x36c   : > { %v1575_v47 = vpack.c.bf16 %v1534_v45, %v1531_v43  ;;  %v1640_v48 = vmul.bf16 %v1576_v44, %v3913_v63  ;;  %vm1608_vm15 = vcmp.ge.bf16.partialorder %v1576_v44, 0  ;;  %v1787_v50 = vadd.f32 %v3075_v46, %v4134_v49 }
 0x36d   : > { %v1778_v51 = vpop.f32.mrf.mxu1 }
 0x36e   : > { %vm1607_vm14 = vcmp.ge.bf16.partialorder %v1575_v47, 0  ;;  %v1639_v52 = vmul.bf16 %v1575_v47, %v3913_v63  ;;  %v1672_v10 = vsel %vm1608_vm15, %v1576_v44, %v1640_v48  ;;  %v1779_v58 = vadd.f32 %v4134_v49, %v1778_v51 }
 0x36f   : > { %v3076_v54 = vpop.f32.mrf.mxu1 }
 0x370   : > { %v1790_v55 = vadd.f32 %v3076_v54, %v4134_v49  ;;  %v1671_v56 = vsel %vm1607_vm14, %v1575_v47, %v1639_v52 }
 0x371   : > { %v1781_v57 = vpop.f32.mrf.mxu1  ;;  %3133 = vmatprep.mubr.bf16.mxu1 %v1671_v56 }
 0x372   : > { %v2714_v59 = vpack.c.bf16 %v1790_v55, %v1787_v50  ;;  %v1782_v60 = vadd.f32 %v4134_v49, %v1781_v57  ;;  %3134 = vmatmul.mubr.bf16.gmra.mxu1 %v1672_v10 }
 0x373   : > { %v3079_v61 = vpop.f32.mrf.mxu1 }
 0x374   : > { %2866 = vst [vmem:[%s4142_s28 + $0x8] sm:$0xff] %v2714_v59   ;;  %v2709_v63 = vpack.c.bf16 %v1782_v60, %v1779_v58  ;;  %v1803_v1 = vadd.f32 %v3079_v61, %v4134_v49 }
 0x375   : > { %v1794_v62 = vpop.f32.mrf.mxu1 }
 0x376   : > { %2710 = vst [vmem:[%s4142_s28] sm:$0xff] %v2709_v63   ;;  %v1795_v4 = vadd.f32 %v4134_v49, %v1794_v62 }
 0x377   : > { %v3080_v0 = vpop.f32.mrf.mxu1 }
 0x378   : > { %v1806_v2 = vadd.f32 %v3080_v0, %v4134_v49 }
 0x379   : > { %v1797_v3 = vpop.f32.mrf.mxu1 }
 0x37a   : > { %v2724_v5 = vpack.c.bf16 %v1806_v2, %v1803_v1  ;;  %v1798_v6 = vadd.f32 %v4134_v49, %v1797_v3 }
 0x37b   : > { %v3083_v7 = vpop.f32.mrf.mxu1 }
 0x37c   : > { %2868 = vst [vmem:[%s4142_s28 + $0x18] sm:$0xff] %v2724_v5   ;;  %v2719_v8 = vpack.c.bf16 %v1798_v6, %v1795_v4  ;;  %v1819_v12 = vadd.f32 %v3083_v7, %v4134_v49 }
 0x37d   : > { %v1810_v9 = vpop.f32.mrf.mxu1 }
 0x37e   : > { %2867 = vst [vmem:[%s4142_s28 + $0x10] sm:$0xff] %v2719_v8   ;;  %v1811_v15 = vadd.f32 %v4134_v49, %v1810_v9 }
 0x37f   : > { %v3084_v11 = vpop.f32.mrf.mxu1 }
 0x380   : > { %v1822_v13 = vadd.f32 %v3084_v11, %v4134_v49 }
 0x381   : > { %v1813_v14 = vpop.f32.mrf.mxu1 }
 0x382   : > { %v2734_v16 = vpack.c.bf16 %v1822_v13, %v1819_v12  ;;  %v1814_v17 = vadd.f32 %v4134_v49, %v1813_v14 }
 0x383   : > { %v3087_v18 = vpop.f32.mrf.mxu1 }
 0x384   : > { %2870 = vst [vmem:[%s4142_s28 + $0x28] sm:$0xff] %v2734_v16   ;;  %v2729_v19 = vpack.c.bf16 %v1814_v17, %v1811_v15  ;;  %v1835_v22 = vadd.f32 %v3087_v18, %v4134_v49 }
 0x385   : > { %v1826_v20 = vpop.f32.mrf.mxu1 }
 0x386   : > { %2869 = vst [vmem:[%s4142_s28 + $0x20] sm:$0xff] %v2729_v19   ;;  %v1827_v25 = vadd.f32 %v4134_v49, %v1826_v20 }
 0x387   : > { %v3088_v21 = vpop.f32.mrf.mxu1 }
 0x388   : > { %v1838_v23 = vadd.f32 %v3088_v21, %v4134_v49 }
 0x389   : > { %v1829_v24 = vpop.f32.mrf.mxu1 }
 0x38a   : > { %v2744_v26 = vpack.c.bf16 %v1838_v23, %v1835_v22  ;;  %v1830_v27 = vadd.f32 %v4134_v49, %v1829_v24 }
 0x38b   : > { %v3091_v28 = vpop.f32.mrf.mxu1 }
 0x38c   : > { %2872 = vst [vmem:[%s4142_s28 + $0x38] sm:$0xff] %v2744_v26   ;;  %v2739_v29 = vpack.c.bf16 %v1830_v27, %v1827_v25  ;;  %v1851_v33 = vadd.f32 %v3091_v28, %v4134_v49 }
 0x38d   : > { %v1842_v31 = vpop.f32.mrf.mxu1 }
 0x38e   : > { %2871 = vst [vmem:[%s4142_s28 + $0x30] sm:$0xff] %v2739_v29   ;;  %v1843_v35 = vadd.f32 %v4134_v49, %v1842_v31 }
 0x38f   : > { %v3092_v32 = vpop.f32.mrf.mxu1 }
 0x390   : > { %v1854_v53 = vadd.f32 %v3092_v32, %v4134_v49 }
 0x391   : > { %v1845_v34 = vpop.f32.mrf.mxu1 }
 0x392   : > { %v2754_v36 = vpack.c.bf16 %v1854_v53, %v1851_v33  ;;  %v1846_v37 = vadd.f32 %v4134_v49, %v1845_v34 }
 0x393   : > { %v3095_v38 = vpop.f32.mrf.mxu1 }
 0x394   : > { %2874 = vst [vmem:[%s4142_s28 + $0x48] sm:$0xff] %v2754_v36   ;;  %v2749_v39 = vpack.c.bf16 %v1846_v37, %v1843_v35  ;;  %v1867_v41 = vadd.f32 %v3095_v38, %v4134_v49 }
 0x395   : > { %v1858_v40 = vpop.f32.mrf.mxu1 }
 0x396   : > { %2873 = vst [vmem:[%s4142_s28 + $0x40] sm:$0xff] %v2749_v39   ;;  %v1859_v44 = vadd.f32 %v4134_v49, %v1858_v40 }
 0x397   : > { %v3096_v30 = vpop.f32.mrf.mxu1 }
 0x398   : > { %v1870_v42 = vadd.f32 %v3096_v30, %v4134_v49 }
 0x399   : > { %v1861_v43 = vpop.f32.mrf.mxu1 }
 0x39a   : > { %v2764_v45 = vpack.c.bf16 %v1870_v42, %v1867_v41  ;;  %v1862_v46 = vadd.f32 %v4134_v49, %v1861_v43 }
 0x39c   : > { %2876 = vst [vmem:[%s4142_s28 + $0x58] sm:$0xff] %v2764_v45   ;;  %v2759_v47 = vpack.c.bf16 %v1862_v46, %v1859_v44 }
 0x39e   : > { %2875 = vst [vmem:[%s4142_s28 + $0x50] sm:$0xff] %v2759_v47  }
 0x3a2   : > { %v3099_v48 = vpop.f32.mrf.mxu1 }
 0x3a3   : > { %v1883_v54 = vadd.f32 %v3099_v48, %v4134_v49 }
 0x3a4   : > { %v1874_v51 = vpop.f32.mrf.mxu1 }
 0x3a5   : > { %v1875_v56 = vadd.f32 %v4134_v49, %v1874_v51 }
 0x3a6   : > { %v3100_v52 = vpop.f32.mrf.mxu1 }
 0x3a7   : > { %v1886_v50 = vadd.f32 %v3100_v52, %v4134_v49 }
 0x3a8   : > { %v1877_v55 = vpop.f32.mrf.mxu1 }
 0x3a9   : > { %v2774_v57 = vpack.c.bf16 %v1886_v50, %v1883_v54  ;;  %v1878_v10 = vadd.f32 %v4134_v49, %v1877_v55 }
 0x3ab   : > { %2878 = vst [vmem:[%s4142_s28 + $0x68] sm:$0xff] %v2774_v57   ;;  %v2769_v58 = vpack.c.bf16 %v1878_v10, %v1875_v56 }
 0x3ad   : > { %2877 = vst [vmem:[%s4142_s28 + $0x60] sm:$0xff] %v2769_v58  }
 0x3b2   : > { %v3103_v59 = vpop.f32.mrf.mxu1 }
 0x3b3   : > { %v1899_v63 = vadd.f32 %v3103_v59, %v4134_v49 }
 0x3b4   : > { %v1890_v60 = vpop.f32.mrf.mxu1 }
 0x3b5   : > { %v1891_v1 = vadd.f32 %v4134_v49, %v1890_v60 }
 0x3b6   : > { %v3104_v61 = vpop.f32.mrf.mxu1 }
 0x3b7   : > { %v1902_v62 = vadd.f32 %v3104_v61, %v4134_v49 }
 0x3b8   : > { %v1893_v0 = vpop.f32.mrf.mxu1 }
 0x3b9   : > { %v2784_v2 = vpack.c.bf16 %v1902_v62, %v1899_v63  ;;  %v1894_v3 = vadd.f32 %v4134_v49, %v1893_v0 }
 0x3bb   : > { %2880 = vst [vmem:[%s4142_s28 + $0x78] sm:$0xff] %v2784_v2   ;;  %v2779_v4 = vpack.c.bf16 %v1894_v3, %v1891_v1 }
 0x3bd   : > { %2879 = vst [vmem:[%s4142_s28 + $0x70] sm:$0xff] %v2779_v4  }
 0x3c2   : > { %v3107_v5 = vpop.f32.mrf.mxu1 }
 0x3c3   : > { %v1915_v8 = vadd.f32 %v3107_v5, %v4134_v49 }
 0x3c4   : > { %v1906_v6 = vpop.f32.mrf.mxu1 }
 0x3c5   : > { %v1907_v12 = vadd.f32 %v4134_v49, %v1906_v6 }
 0x3c6   : > { %v3108_v7 = vpop.f32.mrf.mxu1 }
 0x3c7   : > { %v1918_v9 = vadd.f32 %v3108_v7, %v4134_v49 }
 0x3c8   : > { %v1909_v11 = vpop.f32.mrf.mxu1 }
 0x3c9   : > { %v2794_v13 = vpack.c.bf16 %v1918_v9, %v1915_v8  ;;  %v1910_v14 = vadd.f32 %v4134_v49, %v1909_v11 }
 0x3cb   : > { %2882 = vst [vmem:[%s4142_s28 + $0x88] sm:$0xff] %v2794_v13   ;;  %v2789_v15 = vpack.c.bf16 %v1910_v14, %v1907_v12 }
 0x3cd   : > { %2881 = vst [vmem:[%s4142_s28 + $0x80] sm:$0xff] %v2789_v15  }
 0x3d2   : > { %v3111_v16 = vpop.f32.mrf.mxu1 }
 0x3d3   : > { %v1931_v19 = vadd.f32 %v3111_v16, %v4134_v49 }
 0x3d4   : > { %v1922_v17 = vpop.f32.mrf.mxu1 }
 0x3d5   : > { %v1923_v22 = vadd.f32 %v4134_v49, %v1922_v17 }
 0x3d6   : > { %v3112_v18 = vpop.f32.mrf.mxu1 }
 0x3d7   : > { %v1934_v20 = vadd.f32 %v3112_v18, %v4134_v49 }
 0x3d8   : > { %v1925_v21 = vpop.f32.mrf.mxu1 }
 0x3d9   : > { %v2804_v23 = vpack.c.bf16 %v1934_v20, %v1931_v19  ;;  %v1926_v24 = vadd.f32 %v4134_v49, %v1925_v21 }
 0x3db   : > { %2884 = vst [vmem:[%s4142_s28 + $0x98] sm:$0xff] %v2804_v23   ;;  %v2799_v25 = vpack.c.bf16 %v1926_v24, %v1923_v22 }
 0x3dd   : > { %2883 = vst [vmem:[%s4142_s28 + $0x90] sm:$0xff] %v2799_v25  }
 0x3e2   : > { %v3115_v26 = vpop.f32.mrf.mxu1 }
 0x3e3   : > { %v1947_v29 = vadd.f32 %v3115_v26, %v4134_v49 }
 0x3e4   : > { %v1938_v27 = vpop.f32.mrf.mxu1 }
 0x3e5   : > { %v1939_v33 = vadd.f32 %v4134_v49, %v1938_v27 }
 0x3e6   : > { %v3116_v28 = vpop.f32.mrf.mxu1 }
 0x3e7   : > { %v1950_v31 = vadd.f32 %v3116_v28, %v4134_v49 }
 0x3e8   : > { %v1941_v32 = vpop.f32.mrf.mxu1 }
 0x3e9   : > { %v2814_v53 = vpack.c.bf16 %v1950_v31, %v1947_v29  ;;  %v1942_v34 = vadd.f32 %v4134_v49, %v1941_v32 }
 0x3eb   : > { %2886 = vst [vmem:[%s4142_s28 + $0xa8] sm:$0xff] %v2814_v53   ;;  %v2809_v35 = vpack.c.bf16 %v1942_v34, %v1939_v33 }
 0x3ed   : > { %2885 = vst [vmem:[%s4142_s28 + $0xa0] sm:$0xff] %v2809_v35  }
 0x3f2   : > { %v3119_v36 = vpop.f32.mrf.mxu1 }
 0x3f3   : > { %v1963_v39 = vadd.f32 %v3119_v36, %v4134_v49 }
 0x3f4   : > { %v1954_v37 = vpop.f32.mrf.mxu1 }
 0x3f5   : > { %v1955_v41 = vadd.f32 %v4134_v49, %v1954_v37 }
 0x3f6   : > { %v3120_v38 = vpop.f32.mrf.mxu1 }
 0x3f7   : > { %v1966_v40 = vadd.f32 %v3120_v38, %v4134_v49 }
 0x3f8   : > { %v1957_v30 = vpop.f32.mrf.mxu1 }
 0x3f9   : > { %v2824_v42 = vpack.c.bf16 %v1966_v40, %v1963_v39  ;;  %v1958_v43 = vadd.f32 %v4134_v49, %v1957_v30 }
 0x3fb   : > { %2888 = vst [vmem:[%s4142_s28 + $0xb8] sm:$0xff] %v2824_v42   ;;  %v2819_v44 = vpack.c.bf16 %v1958_v43, %v1955_v41 }
 0x3fd   : > { %2887 = vst [vmem:[%s4142_s28 + $0xb0] sm:$0xff] %v2819_v44  }
 0x402   : > { %v3123_v45 = vpop.f32.mrf.mxu1 }
 0x403   : > { %v1979_v48 = vadd.f32 %v3123_v45, %v4134_v49 }
 0x404   : > { %v1970_v46 = vpop.f32.mrf.mxu1 }
 0x405   : > { %v1971_v54 = vadd.f32 %v4134_v49, %v1970_v46 }
 0x406   : > { %v3124_v47 = vpop.f32.mrf.mxu1 }
 0x407   : > { %v1982_v51 = vadd.f32 %v3124_v47, %v4134_v49 }
 0x408   : > { %v1973_v52 = vpop.f32.mrf.mxu1 }
 0x409   : > { %v2834_v50 = vpack.c.bf16 %v1982_v51, %v1979_v48  ;;  %v1974_v55 = vadd.f32 %v4134_v49, %v1973_v52 }
 0x40b   : > { %2890 = vst [vmem:[%s4142_s28 + $0xc8] sm:$0xff] %v2834_v50   ;;  %v2829_v56 = vpack.c.bf16 %v1974_v55, %v1971_v54 }
 0x40d   : > { %2889 = vst [vmem:[%s4142_s28 + $0xc0] sm:$0xff] %v2829_v56  }
 0x412   : > { %v3127_v57 = vpop.f32.mrf.mxu1 }
 0x413   : > { %v1995_v59 = vadd.f32 %v3127_v57, %v4134_v49 }
 0x414   : > { %v1986_v10 = vpop.f32.mrf.mxu1 }
 0x415   : > { %v1987_v63 = vadd.f32 %v4134_v49, %v1986_v10 }
 0x416   : > { %v3128_v58 = vpop.f32.mrf.mxu1 }
 0x417   : > { %v1998_v60 = vadd.f32 %v3128_v58, %v4134_v49 }
 0x418   : > { %v1989_v61 = vpop.f32.mrf.mxu1 }
 0x419   : > { %v2844_v62 = vpack.c.bf16 %v1998_v60, %v1995_v59  ;;  %v1990_v0 = vadd.f32 %v4134_v49, %v1989_v61 }
 0x41b   : > { %2892 = vst [vmem:[%s4142_s28 + $0xd8] sm:$0xff] %v2844_v62   ;;  %v2839_v1 = vpack.c.bf16 %v1990_v0, %v1987_v63 }
 0x41d   : > { %2891 = vst [vmem:[%s4142_s28 + $0xd0] sm:$0xff] %v2839_v1  }
 0x422   : > { %v3131_v2 = vpop.f32.mrf.mxu1 }
 0x423   : > { %v2011_v5 = vadd.f32 %v3131_v2, %v4134_v49 }
 0x424   : > { %v2002_v3 = vpop.f32.mrf.mxu1 }
 0x425   : > { %v2003_v8 = vadd.f32 %v4134_v49, %v2002_v3 }
 0x426   : > { %v3132_v4 = vpop.f32.mrf.mxu1 }
 0x427   : > { %v2014_v6 = vadd.f32 %v3132_v4, %v4134_v49 }
 0x428   : > { %v2005_v7 = vpop.f32.mrf.mxu1 }
 0x429   : > { %v2854_v9 = vpack.c.bf16 %v2014_v6, %v2011_v5  ;;  %v2006_v11 = vadd.f32 %v4134_v49, %v2005_v7 }
 0x42b   : > { %2894 = vst [vmem:[%s4142_s28 + $0xe8] sm:$0xff] %v2854_v9   ;;  %v2849_v12 = vpack.c.bf16 %v2006_v11, %v2003_v8 }
 0x42d   : > { %2893 = vst [vmem:[%s4142_s28 + $0xe0] sm:$0xff] %v2849_v12  }
 0x432   : > { %v3135_v13 = vpop.f32.mrf.mxu1 }
 0x433   : > { %v2027_v16 = vadd.f32 %v3135_v13, %v4134_v49 }
 0x434   : > { %v2018_v14 = vpop.f32.mrf.mxu1 }
 0x435   : > { %v2019_v19 = vadd.f32 %v4134_v49, %v2018_v14 }
 0x436   : > { %v3136_v15 = vpop.f32.mrf.mxu1 }
 0x437   : > { %v2030_v17 = vadd.f32 %v3136_v15, %v4134_v49 }
 0x438   : > { %v2021_v18 = vpop.f32.mrf.mxu1 }
 0x439   : > { %v2864_v20 = vpack.c.bf16 %v2030_v17, %v2027_v16  ;;  %v2022_v21 = vadd.f32 %v4134_v49, %v2021_v18  ;;  %2360 = sbr.rel (!%p4327_p10) target bundleno = 1113 (0x459), region = 84 }
 0x43b   : > { %2896 = vst [vmem:[%s4142_s28 + $0xf8] sm:$0xff] %v2864_v20   ;;  %v2859_v22 = vpack.c.bf16 %v2022_v21, %v2019_v19 }
 0x43d   : > { %2895 = vst [vmem:[%s4142_s28 + $0xf0] sm:$0xff] %v2859_v22  }
 0x43e   : > { %s4339_s25 = smov (!%p2363_p12, %s2362_s25), 64 }
 0x43f   : > { %s4240_s23 = sshll.u32 %s4339_s25, 6 }
 0x440   : > { %s2367_s17 = ssub.s32 4096, %s4240_s23 }
 0x441   : > { %2368 = vsyncadd %s2354_s26, %s2367_s17  ;;  %p2632_p1 = scmp.ne.s32.totalorder %s4240_s23, 0  ;;  %s2705_s18 = sshll.u32 %s3620_s1, 12 }
 0x442   : > { %s4250_s24 = scalar_lea.hbm %s4305_s8, %s2705_s18  ;;  %s2373_s27 = sshll.u32 %s4142_s28, 4  ;;  %s4253_s27 = int_to_ptr.vmem [resolvable:$true] %s2373_s27 }
 0x443   : > { %s3458_s22 = scalar_lea.vmem %s4253_s27, %s4240_s23  ;;  %s3548_s14 = smov [#allocation15]  }
 0x444   : > { %p3459_p6 = scmp.ne.s32.totalorder %s4253_s27, %s3458_s22  ;;  %s3462_s16 = sshll.u32 %s3548_s14, 4  ;;  %s3463_s16 = int_to_ptr.vmem [resolvable:$false] %s3462_s16 }
 0x445   : > { %s3464_s1 = scalar_lea.vmem %s3463_s16, 8192  ;;  %p3465_p2 = scmp.lt.s32.totalorder %s4253_s27, %s3463_s16 }
 0x446   : > { %p3460_p11 = pnand %p3459_p6, %p2632_p1  ;;  %p3466_p5 = scmp.lt.s32.totalorder %s3464_s1, %s3458_s22 }
 0x448   : > { %p3461_p13 = pneg %p3460_p11  ;;  %p3467_p0 = por %p3466_p5, %p3465_p2 }
 0x44a   : > { %p3468_p7 = pnand %p3467_p0, %p3461_p13 }
 0x44c   : > { %3471 = shalt.err (!%p3468_p7)
}
 0x44d   : > { %s3472_s2 = scalar_lea.hbm %s4250_s24, %s4240_s23  ;;  %s3476_s13 = scalar_lea.hbm %s4305_s8, 16000 }
 0x44e   : > { %p3473_p3 = scmp.ne.s32.totalorder %s4250_s24, %s3472_s2  ;;  %p3477_p4 = scmp.lt.s32.totalorder %s4250_s24, %s4305_s8 }
 0x44f   : > { %p3478_p10 = scmp.lt.s32.totalorder %s3476_s13, %s3472_s2 }
 0x450   : > { %p3474_p9 = pnand %p3473_p3, %p2632_p1 }
 0x451   : > { %p3479_p12 = por %p3478_p10, %p3477_p4 }
 0x452   : > { %p3475_p8 = pneg %p3474_p9 }
 0x454   : > { %p3480_p6 = pnand %p3479_p12, %p3475_p8 }
 0x456   : > { %3483 = shalt.err (!%p3480_p6)
}
 0x457   : > { %s3549_s18 = smov 64   ;;  %s3550_s20 = smov 4  }
 0x458   : > { %2379 = dma.vmem_to_hbm [thread:$0]  (%p2632_p1), %s4253_s27, %s4240_s23, %s4250_s24, %s2354_s26, %s3549_s18, %s3549_s18, %s3550_s20  }
 0x459 PF: > { %p3198_p11 = scmp.ge.s32.totalorder %s3534_s10, 2  ;;  %s2388_s21 = sand.u32 1, %s3522_s29  }
 0x45a   : > { %p4328_p13 = scmp.ne.s32.totalorder %s4314_s19, 0  ;;  %s2389_s22 = scalar_lea.sflag [#allocation5], %s2388_s21 }
 0x45c   : > { %p3183_p2 = pnand %p3198_p11, %p4328_p13 }
 0x45e   : > { %p3184_p5 = pneg %p3183_p2 }
 0x460   : > { %3517 = dma.done.wait (%p3184_p5), %s2389_s22, 4096  }
 0x461   : > { %3519 = vsyncadd (%p3184_p5), %s2389_s22, 4294963200  ;;  %s4329_s14 = sld [smem:[#allocation21_spill]]  ;;  %p25_p0 = scmp.ge.s32.totalorder %s3624_s12, 6  }
 0x462   : > { %s4330_s29 = smov %s3526_s30  ;;  %s4331_s30 = smov %s3530_s9 }
 0x463   : > { %s4333_s10 = smov %s3624_s12  ;;  %27 = sbr.rel (!%p25_p0) target bundleno = 11 (0xb), region = 121 }
 0x467   : > { %s4332_s9 = smov %s4329_s14 }
 0x468   :  { %2394 = vsyncpa [#allocation4], 1 }
 0x469   :  { %2396 = vsyncpa [#allocation4 + $0x1], 1 }
 0x46a   :  { %2397 = vsyncpa [#allocation7], 1 }
 0x46b   :  { %2398 = vsyncpa [#allocation10], 1 }
 0x46c   :  { %2399 = vsyncpa [#allocation13], 1 }
 0x46d   :  { %2400 = vsyncpa [#allocation5], 1 }
 0x46e   :  { %2402 = vsyncpa [#allocation5 + $0x1], 1 }

</bundles_post_ra>
